<compile_context>
chip_gen: v7x
topology: tpu7x:2x2x1
jax: 0.10.0
libtpu: 0.0.40
codegen_flags: <defaults>
</compile_context>

<pallas_src>
import jax
import jax.numpy as jnp
from jax.experimental import pallas as pl
from jax.experimental.pallas import tpu as pltpu


def _ceil_to(n, m):
    return ((n + m - 1) // m) * m


# --------------------------------- fused kernel --------------------------------

def _make_kernel(C, h, w, boff):
    """Build the fused kernel, closing over static geometry and the row offsets of
    the packed f32 column bank (boff: name -> (row_offset, rows))."""
    Cg = C // 2
    N, Npad = h * w, _ceil_to(h * w, 128)
    h1, w1 = h // 2, w // 2
    N1 = h1 * w1
    # row offsets inside the packed bf16 weight bank [8C, C]
    W_XPROJ, W_REP, W_KV1, W_KV2, W_REP12 = 0, 4 * C, 5 * C, 6 * C, 7 * C
    f32, bf16 = jnp.float32, jnp.bfloat16

    def kernel(x_ref, p1_ref, wbank_ref, sr1w_ref, bank_ref, out_ref):
        def bvec(name):                                    # [rows, 1] f32 column
            o, l = boff[name]
            return bank_ref[o:o + l, :]

        def softmax_tokens(z, valid):                      # softmax over lanes, masked
            z = z - jnp.max(z, axis=1, keepdims=True)
            e = jnp.where(valid, jnp.exp(z), 0.0)
            return e * pl.reciprocal(jnp.sum(e, axis=1, keepdims=True), approx=True)

        def ln_gelu(z, g, b):                              # LayerNorm over channels + GELU
            mu = jnp.mean(z, axis=0, keepdims=True)
            zc = z - mu
            var = jnp.mean(zc * zc, axis=0, keepdims=True)
            y = zc * jax.lax.rsqrt(var + 1e-5) * g + b
            # Exact (erf) GELU = PyTorch nn.GELU default; erf via the Abramowitz-Stegun
            # 7.1.26 polynomial (|abs err| <= 1.5e-7).  All LN/GELU math stays f32.
            u = y * 0.7071067811865476
            a = jnp.abs(u)
            t = pl.reciprocal(1.0 + 0.3275911 * a, approx=True)
            poly = t * (0.254829592 + t * (-0.284496736 + t * (1.421413741
                        + t * (-1.453152027 + t * 1.061405429))))
            erf_a = 1.0 - poly * jnp.exp(-a * a)
            return 0.5 * y * (1.0 + jnp.where(u >= 0.0, erf_a, -erf_a))

        def depthwise3x3(vT, lc_name, Hs, Ws, Nb):
            """Depthwise 3x3 'same' conv on the (Hs, Ws) token grid of channel-major
            vT [Cg, Nb_pad]: 9 XLU lane rolls + boundary masks + VPU FMAs."""
            o, _ = boff[lc_name]
            Nb_pad = vT.shape[1]
            nf = jax.lax.broadcasted_iota(jnp.int32, (1, Nb_pad), 1).astype(f32)
            # token row/col without integer div/rem (exact for these small sizes)
            rf = jnp.floor((nf + 0.5) * (1.0 / Ws))
            cf = nf - Ws * rf
            acc = jnp.zeros_like(vT)
            t = 0
            for di in (-1, 0, 1):
                for dj in (-1, 0, 1):
                    s = di * Ws + dj                       # flat-token offset of the tap
                    shifted = vT if s == 0 else pltpu.roll(vT, (-s) % Nb_pad, axis=1)
                    ok = ((nf < Nb) & (rf + di >= 0) & (rf + di < Hs)
                          & (cf + dj >= 0) & (cf + dj < Ws))
                    taps = bank_ref[o + t * Cg:o + (t + 1) * Cg, :]     # [Cg, 1]
                    acc = acc + jnp.where(ok, shifted, 0.0) * taps
                    t += 1
            return acc

        def branch(xT, w_off, kvb, lcw, lcb, qhT, Hs, Ws, Nb):
            Nb_pad = xT.shape[1]
            valid = jax.lax.broadcasted_iota(jnp.int32, (1, Nb_pad), 1) < Nb
            kv = (jnp.dot(wbank_ref[w_off:w_off + C, :], xT.astype(bf16),
                          preferred_element_type=f32) + bvec(kvb))      # [C, Nb_pad]
            kT = softmax_tokens(kv[:Cg, :], valid)                      # [Cg, Nb_pad]
            vT = kv[Cg:, :]
            vT = vT + bvec(lcb) + depthwise3x3(vT, lcw, Hs, Ws, Nb)
            ctx = jax.lax.dot_general(vT.astype(bf16), kT.astype(bf16),
                                      (((1,), (1,)), ((), ())),
                                      preferred_element_type=f32)       # [Cg, Cg]
            return jnp.dot(ctx.astype(bf16), qhT, preferred_element_type=f32)

        x = x_ref[0]                                       # [C, Npad] bf16, channel-major
        tok_valid = jax.lax.broadcasted_iota(jnp.int32, (1, Npad), 1) < N

        # Fused 1x1 projections of x: rows = [q | keys | values | sr2] -> [4C, Npad].
        xp = (jnp.dot(wbank_ref[W_XPROJ:W_XPROJ + 4 * C, :], x,
                      preferred_element_type=f32) + bvec("xproj_b"))
        qz, keysz = xp[0:C, :], xp[C:2 * C, :]
        valuesT, x2z = xp[2 * C:3 * C, :], xp[3 * C:4 * C, :]

        # q: softmax over channels (PyTorch dim=2 -> sublane axis here).
        qz = qz - jnp.max(qz, axis=0, keepdims=True)
        qe = jnp.exp(qz)
        q_b = (qe * pl.reciprocal(jnp.sum(qe, axis=0, keepdims=True),
                                  approx=True)).astype(bf16)            # [C, Npad]

        # ---- full-resolution efficient attention + 1x1 reprojection (main path) ----
        keysT = softmax_tokens(keysz, tok_valid)                        # [C, Npad]
        ctx = jax.lax.dot_general(valuesT.astype(bf16), keysT.astype(bf16),
                                  (((1,), (1,)), ((), ())),
                                  preferred_element_type=f32)           # [C, C]
        att = jnp.dot(ctx.astype(bf16), q_b, preferred_element_type=f32)
        eff_main = (jnp.dot(wbank_ref[W_REP:W_REP + C, :], att.astype(bf16),
                            preferred_element_type=f32) + bvec("rep_b"))
        # Stash the first Conv3d(2,1,1) term in the VMEM-resident output block so its
        # live range does not span both pyramid branches.
        out_ref[0] = bvec("dw0") * eff_main

        # ---- pyramid branch 1: sr1 = 2x2/stride-2 conv (patchified in the wrapper) ----
        x1T = ln_gelu(jnp.dot(sr1w_ref[...], p1_ref[0], preferred_element_type=f32)
                      + bvec("sr1_b"), bvec("ln1_g"), bvec("ln1_b"))
        att1 = branch(x1T, W_KV1, "kv1_b", "lc1_w", "lc1_b", q_b[:Cg, :], h1, w1, N1)

        # ---- pyramid branch 2: sr2 = 1x1 conv (already fused into xproj above) ----
        x2T = ln_gelu(x2z, bvec("ln2_g"), bvec("ln2_b"))
        att2 = branch(x2T, W_KV2, "kv2_b", "lc2_w", "lc2_b", q_b[Cg:, :], h, w, N)

        # reprojection12 of concat([att1, att2]) as ONE full-width [C, C] matmul.
        att12 = jnp.concatenate([att1, att2], axis=0).astype(bf16)      # [C, Npad]
        eff2 = (jnp.dot(wbank_ref[W_REP12:W_REP12 + C, :], att12,
                        preferred_element_type=f32) + bvec("rep12_b"))

        # depthwise Conv3d(C, C, (2,1,1), groups=C, bias=False) fusion of the two maps.
        out_ref[0] = out_ref[0] + bvec("dw1") * eff2

    return kernel


# ------------------------------- parameters -----------------------------------

def init_params(key, C):
    """Synthetic parameters with the same shapes as the PyTorch module
    (layer == 3, key_channels = value_channels = in_channels = C)."""
    Cg = C // 2
    ks = iter(jax.random.split(key, 32))

    def nrm(shape, scale=0.05):
        return scale * jax.random.normal(next(ks), shape, jnp.float32)

    return dict(
        q_w=nrm((C, C)), q_b=nrm((C,)),
        keys_w=nrm((C, C)), keys_b=nrm((C,)),
        values_w=nrm((C, C)), values_b=nrm((C,)),
        sr1_w=nrm((C, C, 2, 2)), sr1_b=nrm((C,)),          # Conv2d(C,C,2,stride=2)
        sr2_w=nrm((C, C, 1, 1)), sr2_b=nrm((C,)),          # Conv2d(C,C,1,stride=1)
        ln1_g=jnp.ones((C,), jnp.float32), ln1_b=jnp.zeros((C,), jnp.float32),
        ln2_g=jnp.ones((C,), jnp.float32), ln2_b=jnp.zeros((C,), jnp.float32),
        kv1_w=nrm((C, C)), kv1_b=nrm((C,)),
        kv2_w=nrm((C, C)), kv2_b=nrm((C,)),
        lc1_w=nrm((Cg, 1, 3, 3)), lc1_b=nrm((Cg,)),        # depthwise 3x3
        lc2_w=nrm((Cg, 1, 3, 3)), lc2_b=nrm((Cg,)),
        rep_w=nrm((C, C, 1, 1)), rep_b=nrm((C,)),          # 1x1 conv
        rep12_w=nrm((C, C, 1, 1)), rep12_b=nrm((C,)),
        dw_w=nrm((C, 1, 2, 1, 1)),                         # Conv3d(C,C,(2,1,1),groups=C)
    )


# --------------------------------- forward ------------------------------------

def me_attention_forward(x_nchw, p):
    B, C, h, w = map(int, x_nchw.shape)
    Cg, N = C // 2, h * w
    h1, w1 = h // 2, w // 2
    N1 = h1 * w1
    Npad, N1pad = _ceil_to(N, 128), _ceil_to(N1, 128)
    bf16 = jnp.bfloat16

    # --- per-batch activations, channel-major, token (lane) axis zero-padded ------
    x_cn = jnp.pad(x_nchw.reshape(B, C, N),
                   ((0, 0), (0, 0), (0, Npad - N))).astype(bf16)
    # sr1 2x2/stride-2 patches, rows ordered (kh, kw, ci) to match sr1 weight matrix.
    p1t = (x_nchw.reshape(B, C, h1, 2, w1, 2)
                 .transpose(0, 3, 5, 1, 2, 4)
                 .reshape(B, 4 * C, N1))
    p1t = jnp.pad(p1t, ((0, 0), (0, 0), (0, N1pad - N1))).astype(bf16)

    # --- packed bf16 weight bank [8C, C]: rows = q|keys|values|sr2|rep|kv1|kv2|rep12 --
    wbank = jnp.concatenate(
        [p["q_w"], p["keys_w"], p["values_w"], p["sr2_w"][:, :, 0, 0],
         p["rep_w"][:, :, 0, 0], p["kv1_w"], p["kv2_w"], p["rep12_w"][:, :, 0, 0]],
        axis=0).astype(bf16)
    # sr1 conv as a [C, 4C] matmul against the (kh, kw, ci)-ordered patches.
    sr1_wm = jnp.transpose(p["sr1_w"], (0, 2, 3, 1)).reshape(C, 4 * C).astype(bf16)

    # --- packed f32 column bank: every bias / LN / scale / conv-tap vector -------
    segs, boff = [], {}
    off = 0

    def add(name, v):
        nonlocal off
        v = jnp.asarray(v, jnp.float32).reshape(-1, 1)
        boff[name] = (off, int(v.shape[0]))
        segs.append(v)
        off += int(v.shape[0])

    add("xproj_b", jnp.concatenate([p["q_b"], p["keys_b"], p["values_b"], p["sr2_b"]]))
    add("rep_b", p["rep_b"])
    add("sr1_b", p["sr1_b"])
    add("ln1_g", p["ln1_g"]); add("ln1_b", p["ln1_b"])
    add("ln2_g", p["ln2_g"]); add("ln2_b", p["ln2_b"])
    add("kv1_b", p["kv1_b"]); add("kv2_b", p["kv2_b"])
    add("lc1_b", p["lc1_b"]); add("lc2_b", p["lc2_b"])
    add("rep12_b", p["rep12_b"])
    add("dw0", p["dw_w"][:, 0, 0, 0, 0]); add("dw1", p["dw_w"][:, 0, 1, 0, 0])
    # depthwise 3x3 taps, tap-major then channel: row index = t*Cg + c
    add("lc1_w", jnp.transpose(p["lc1_w"].reshape(Cg, 9)).reshape(-1))
    add("lc2_w", jnp.transpose(p["lc2_w"].reshape(Cg, 9)).reshape(-1))
    bank = jnp.concatenate(segs, axis=0)                   # [off, 1] f32

    kernel = _make_kernel(C, h, w, boff)

    out_tok = pl.pallas_call(
        kernel,
        grid=(B,),
        in_specs=[
            pl.BlockSpec((1, C, Npad), lambda b: (b, 0, 0)),          # x      (bf16)
            pl.BlockSpec((1, 4 * C, N1pad), lambda b: (b, 0, 0)),     # p1     (bf16)
            pl.BlockSpec((8 * C, C), lambda b: (0, 0)),               # wbank  (bf16)
            pl.BlockSpec((C, 4 * C), lambda b: (0, 0)),               # sr1_wm (bf16)
            pl.BlockSpec((off, 1), lambda b: (0, 0)),                 # bank   (f32)
        ],
        out_specs=pl.BlockSpec((1, C, Npad), lambda b: (b, 0, 0)),
        out_shape=jax.ShapeDtypeStruct((B, C, Npad), jnp.float32),
        compiler_params=pltpu.CompilerParams(
            dimension_semantics=("parallel",)),
    )(x_cn, p1t, wbank, sr1_wm, bank)

    return out_tok[:, :, :N].reshape(B, C, h, w)           # NCHW


# ---------------------------------- main ---------------------------------------

if __name__ == "__main__":
    # layer == 3 geometry (local_conv views hard-code 7x7 / 14x14 => h = w = 14)
    B, C, h, w = 2, 32, 14, 14
    key = jax.random.PRNGKey(0)
    kx, kp = jax.random.split(key)
    x = jax.random.normal(kx, (B, C, h, w), jnp.float32)
    params = init_params(kp, C)

    fwd = jax.jit(me_attention_forward)
    out = jax.block_until_ready(fwd(x, params))
    assert out.shape == (B, C, h, w) and out.dtype == jnp.float32
    print("KERNEL_OK")
</pallas_src>

<mosaic_0001>
module attributes {stable_mosaic.version = 11 : i64} {
  func.func @kernel(%arg0: i32, %arg1: memref<1x32x256xbf16, #tpu.memory_space<vmem>>, %arg2: memref<1x128x128xbf16, #tpu.memory_space<vmem>>, %arg3: memref<256x32xbf16, #tpu.memory_space<vmem>>, %arg4: memref<32x128xbf16, #tpu.memory_space<vmem>>, %arg5: memref<800x1xf32, #tpu.memory_space<vmem>>, %arg6: memref<1x32x256xf32, #tpu.memory_space<vmem>>) attributes {dimension_semantics = [#tpu.dimension_semantics<parallel>], iteration_bounds = array<i64: 2>, scalar_prefetch = 0 : i64, scratch_operands = 0 : i64, tpu.core_type = #tpu.core_type<tc>, window_params = [{transform_indices = @transform_0, window_bounds = array<i64: 1, 32, 256>}, {transform_indices = @transform_1, window_bounds = array<i64: 1, 128, 128>}, {pipeline_mode = #tpu.pipeline_mode<synchronous>, transform_indices = @transform_2, window_bounds = array<i64: 256, 32>}, {pipeline_mode = #tpu.pipeline_mode<synchronous>, transform_indices = @transform_3, window_bounds = array<i64: 32, 128>}, {pipeline_mode = #tpu.pipeline_mode<synchronous>, transform_indices = @transform_4, window_bounds = array<i64: 800, 1>}, {transform_indices = @transform_5, window_bounds = array<i64: 1, 32, 256>}]} {
    %c0 = arith.constant 0 : index
    %c0_0 = arith.constant 0 : index
    %c0_1 = arith.constant 0 : index
    %0 = vector.load %arg1[%c0, %c0_0, %c0_1] : memref<1x32x256xbf16, #tpu.memory_space<vmem>>, vector<1x32x256xbf16>
    %1 = vector.shape_cast %0 : vector<1x32x256xbf16> to vector<32x256xbf16>
    %2 = tpu.iota {dimensions = array<i32: 1>} : vector<1x256xi32>
    %c196_i32 = arith.constant 196 : i32
    %3 = vector.broadcast %c196_i32 : i32 to vector<1x256xi32>
    %4 = arith.cmpi slt, %2, %3 : vector<1x256xi32>
    %c0_2 = arith.constant 0 : index
    %c0_3 = arith.constant 0 : index
    %5 = vector.load %arg3[%c0_2, %c0_3] : memref<256x32xbf16, #tpu.memory_space<vmem>>, vector<128x32xbf16>
    %cst = arith.constant dense<0.000000e+00> : vector<128x256xf32>
    %6 = tpu.matmul %5, %1, %cst {dimension_numbers = #tpu.dot_dimension_numbers<[1], [0], [0], [1], [0, 0, 1, 1], [], []>} : vector<128x32xbf16>, vector<32x256xbf16>, vector<128x256xf32> -> vector<128x256xf32>
    %c0_4 = arith.constant 0 : index
    %c0_5 = arith.constant 0 : index
    %7 = vector.load %arg5[%c0_4, %c0_5] : memref<800x1xf32, #tpu.memory_space<vmem>>, vector<128x1xf32>
    %8 = vector.broadcast %7 : vector<128x1xf32> to vector<128x256xf32>
    %9 = arith.addf %6, %8 : vector<128x256xf32>
    %10 = vector.extract_strided_slice %9 {offsets = [0, 0], sizes = [32, 256], strides = [1, 1]} : vector<128x256xf32> to vector<32x256xf32>
    %11 = vector.extract_strided_slice %9 {offsets = [32, 0], sizes = [32, 256], strides = [1, 1]} : vector<128x256xf32> to vector<32x256xf32>
    %12 = vector.extract_strided_slice %9 {offsets = [64, 0], sizes = [32, 256], strides = [1, 1]} : vector<128x256xf32> to vector<32x256xf32>
    %13 = vector.extract_strided_slice %9 {offsets = [96, 0], sizes = [32, 256], strides = [1, 1]} : vector<128x256xf32> to vector<32x256xf32>
    %cst_6 = arith.constant dense<0xFF800000> : vector<256xf32>
    %14 = vector.multi_reduction <maximumf>, %10, %cst_6 [0] : vector<32x256xf32> to vector<256xf32>
    %15 = vector.shape_cast %14 : vector<256xf32> to vector<1x256xf32>
    %16 = vector.broadcast %15 : vector<1x256xf32> to vector<32x256xf32>
    %17 = arith.subf %10, %16 : vector<32x256xf32>
    %18 = math.exp %17 : vector<32x256xf32>
    %cst_7 = arith.constant dense<0.000000e+00> : vector<256xf32>
    %19 = vector.multi_reduction <add>, %18, %cst_7 [0] : vector<32x256xf32> to vector<256xf32>
    %20 = vector.shape_cast %19 : vector<256xf32> to vector<1x256xf32>
    %21 = tpu.reciprocal %20 {approx = true} : vector<1x256xf32> -> vector<1x256xf32>
    %22 = vector.broadcast %21 : vector<1x256xf32> to vector<32x256xf32>
    %23 = arith.mulf %18, %22 : vector<32x256xf32>
    %24 = arith.truncf %23 : vector<32x256xf32> to vector<32x256xbf16>
    %cst_8 = arith.constant dense<0xFF800000> : vector<32xf32>
    %25 = vector.multi_reduction <maximumf>, %11, %cst_8 [1] : vector<32x256xf32> to vector<32xf32>
    %26 = vector.shape_cast %25 : vector<32xf32> to vector<32x1xf32>
    %27 = vector.broadcast %26 : vector<32x1xf32> to vector<32x256xf32>
    %28 = arith.subf %11, %27 : vector<32x256xf32>
    %29 = math.exp %28 : vector<32x256xf32>
    %cst_9 = arith.constant 0.000000e+00 : f32
    %30 = vector.shape_cast %4 : vector<1x256xi1> to vector<1x256xi1>
    %31 = vector.broadcast %30 : vector<1x256xi1> to vector<32x256xi1>
    %32 = vector.broadcast %cst_9 : f32 to vector<32x256xf32>
    %33 = arith.select %31, %29, %32 : vector<32x256xi1>, vector<32x256xf32>
    %cst_10 = arith.constant dense<0.000000e+00> : vector<32xf32>
    %34 = vector.multi_reduction <add>, %33, %cst_10 [1] : vector<32x256xf32> to vector<32xf32>
    %35 = vector.shape_cast %34 : vector<32xf32> to vector<32x1xf32>
    %36 = tpu.reciprocal %35 {approx = true} : vector<32x1xf32> -> vector<32x1xf32>
    %37 = vector.broadcast %36 : vector<32x1xf32> to vector<32x256xf32>
    %38 = arith.mulf %33, %37 : vector<32x256xf32>
    %39 = arith.truncf %12 : vector<32x256xf32> to vector<32x256xbf16>
    %40 = arith.truncf %38 : vector<32x256xf32> to vector<32x256xbf16>
    %cst_11 = arith.constant dense<0.000000e+00> : vector<32x32xf32>
    %41 = tpu.matmul %39, %40, %cst_11 {dimension_numbers = #tpu.dot_dimension_numbers<[1], [1], [0], [0], [0, 0, 1, 0], [], []>} : vector<32x256xbf16>, vector<32x256xbf16>, vector<32x32xf32> -> vector<32x32xf32>
    %42 = arith.truncf %41 : vector<32x32xf32> to vector<32x32xbf16>
    %cst_12 = arith.constant dense<0.000000e+00> : vector<32x256xf32>
    %43 = tpu.matmul %42, %24, %cst_12 {dimension_numbers = #tpu.dot_dimension_numbers<[1], [0], [0], [1], [0, 0, 1, 1], [], []>} : vector<32x32xbf16>, vector<32x256xbf16>, vector<32x256xf32> -> vector<32x256xf32>
    %c128 = arith.constant 128 : index
    %c0_13 = arith.constant 0 : index
    %44 = vector.load %arg3[%c128, %c0_13] : memref<256x32xbf16, #tpu.memory_space<vmem>>, vector<32x32xbf16>
    %45 = arith.truncf %43 : vector<32x256xf32> to vector<32x256xbf16>
    %cst_14 = arith.constant dense<0.000000e+00> : vector<32x256xf32>
    %46 = tpu.matmul %44, %45, %cst_14 {dimension_numbers = #tpu.dot_dimension_numbers<[1], [0], [0], [1], [0, 0, 1, 1], [], []>} : vector<32x32xbf16>, vector<32x256xbf16>, vector<32x256xf32> -> vector<32x256xf32>
    %c128_15 = arith.constant 128 : index
    %c0_16 = arith.constant 0 : index
    %47 = vector.load %arg5[%c128_15, %c0_16] : memref<800x1xf32, #tpu.memory_space<vmem>>, vector<32x1xf32>
    %48 = vector.broadcast %47 : vector<32x1xf32> to vector<32x256xf32>
    %49 = arith.addf %46, %48 : vector<32x256xf32>
    %c448 = arith.constant 448 : index
    %c0_17 = arith.constant 0 : index
    %50 = vector.load %arg5[%c448, %c0_17] : memref<800x1xf32, #tpu.memory_space<vmem>>, vector<32x1xf32>
    %51 = vector.broadcast %50 : vector<32x1xf32> to vector<32x256xf32>
    %52 = arith.mulf %51, %49 : vector<32x256xf32>
    %c0_18 = arith.constant 0 : index
    %c0_19 = arith.constant 0 : index
    %c0_20 = arith.constant 0 : index
    %53 = vector.load %arg6[%c0_18, %c0_19, %c0_20] : memref<1x32x256xf32, #tpu.memory_space<vmem>>, vector<1x32x256xf32>
    %54 = vector.shape_cast %53 : vector<1x32x256xf32> to vector<32x256xf32>
    %55 = vector.shape_cast %52 : vector<32x256xf32> to vector<1x32x256xf32>
    tpu.vector_store %arg6[%c0_18, %c0_19, %c0_20], %55 {strides = array<i32>} : memref<1x32x256xf32, #tpu.memory_space<vmem>>, vector<1x32x256xf32>,
    %c0_21 = arith.constant 0 : index
    %c0_22 = arith.constant 0 : index
    %56 = vector.load %arg4[%c0_21, %c0_22] : memref<32x128xbf16, #tpu.memory_space<vmem>>, vector<32x128xbf16>
    %c0_23 = arith.constant 0 : index
    %c0_24 = arith.constant 0 : index
    %c0_25 = arith.constant 0 : index
    %57 = vector.load %arg2[%c0_23, %c0_24, %c0_25] : memref<1x128x128xbf16, #tpu.memory_space<vmem>>, vector<1x128x128xbf16>
    %58 = vector.shape_cast %57 : vector<1x128x128xbf16> to vector<128x128xbf16>
    %cst_26 = arith.constant dense<0.000000e+00> : vector<32x128xf32>
    %59 = tpu.matmul %56, %58, %cst_26 {dimension_numbers = #tpu.dot_dimension_numbers<[1], [0], [0], [1], [0, 0, 1, 1], [], []>} : vector<32x128xbf16>, vector<128x128xbf16>, vector<32x128xf32> -> vector<32x128xf32>
    %c160 = arith.constant 160 : index
    %c0_27 = arith.constant 0 : index
    %60 = vector.load %arg5[%c160, %c0_27] : memref<800x1xf32, #tpu.memory_space<vmem>>, vector<32x1xf32>
    %61 = vector.broadcast %60 : vector<32x1xf32> to vector<32x128xf32>
    %62 = arith.addf %59, %61 : vector<32x128xf32>
    %c192 = arith.constant 192 : index
    %c0_28 = arith.constant 0 : index
    %63 = vector.load %arg5[%c192, %c0_28] : memref<800x1xf32, #tpu.memory_space<vmem>>, vector<32x1xf32>
    %c224 = arith.constant 224 : index
    %c0_29 = arith.constant 0 : index
    %64 = vector.load %arg5[%c224, %c0_29] : memref<800x1xf32, #tpu.memory_space<vmem>>, vector<32x1xf32>
    %cst_30 = arith.constant dense<0.000000e+00> : vector<128xf32>
    %65 = vector.multi_reduction <add>, %62, %cst_30 [0] : vector<32x128xf32> to vector<128xf32>
    %66 = vector.shape_cast %65 : vector<128xf32> to vector<1x128xf32>
    %cst_31 = arith.constant 3.200000e+01 : f32
    %67 = vector.broadcast %cst_31 : f32 to vector<1x128xf32>
    %68 = arith.divf %66, %67 : vector<1x128xf32>
    %69 = vector.broadcast %68 : vector<1x128xf32> to vector<32x128xf32>
    %70 = arith.subf %62, %69 : vector<32x128xf32>
    %71 = arith.mulf %70, %70 : vector<32x128xf32>
    %cst_32 = arith.constant dense<0.000000e+00> : vector<128xf32>
    %72 = vector.multi_reduction <add>, %71, %cst_32 [0] : vector<32x128xf32> to vector<128xf32>
    %73 = vector.shape_cast %72 : vector<128xf32> to vector<1x128xf32>
    %cst_33 = arith.constant 3.200000e+01 : f32
    %74 = vector.broadcast %cst_33 : f32 to vector<1x128xf32>
    %75 = arith.divf %73, %74 : vector<1x128xf32>
    %cst_34 = arith.constant 9.99999974E-6 : f32
    %76 = vector.broadcast %cst_34 : f32 to vector<1x128xf32>
    %77 = arith.addf %75, %76 : vector<1x128xf32>
    %78 = math.rsqrt %77 : vector<1x128xf32>
    %79 = vector.broadcast %78 : vector<1x128xf32> to vector<32x128xf32>
    %80 = arith.mulf %70, %79 : vector<32x128xf32>
    %81 = vector.broadcast %63 : vector<32x1xf32> to vector<32x128xf32>
    %82 = arith.mulf %80, %81 : vector<32x128xf32>
    %83 = vector.broadcast %64 : vector<32x1xf32> to vector<32x128xf32>
    %84 = arith.addf %82, %83 : vector<32x128xf32>
    %cst_35 = arith.constant 0.707106769 : f32
    %85 = vector.broadcast %cst_35 : f32 to vector<32x128xf32>
    %86 = arith.mulf %84, %85 : vector<32x128xf32>
    %87 = math.absf %86 : vector<32x128xf32>
    %cst_36 = arith.constant 0.327591091 : f32
    %88 = vector.broadcast %cst_36 : f32 to vector<32x128xf32>
    %89 = arith.mulf %88, %87 : vector<32x128xf32>
    %cst_37 = arith.constant 1.000000e+00 : f32
    %90 = vector.broadcast %cst_37 : f32 to vector<32x128xf32>
    %91 = arith.addf %90, %89 : vector<32x128xf32>
    %92 = tpu.reciprocal %91 {approx = true} : vector<32x128xf32> -> vector<32x128xf32>
    %cst_38 = arith.constant 1.06140542 : f32
    %93 = vector.broadcast %cst_38 : f32 to vector<32x128xf32>
    %94 = arith.mulf %92, %93 : vector<32x128xf32>
    %cst_39 = arith.constant -1.45315206 : f32
    %95 = vector.broadcast %cst_39 : f32 to vector<32x128xf32>
    %96 = arith.addf %95, %94 : vector<32x128xf32>
    %97 = arith.mulf %92, %96 : vector<32x128xf32>
    %cst_40 = arith.constant 1.42141378 : f32
    %98 = vector.broadcast %cst_40 : f32 to vector<32x128xf32>
    %99 = arith.addf %98, %97 : vector<32x128xf32>
    %100 = arith.mulf %92, %99 : vector<32x128xf32>
    %cst_41 = arith.constant -0.284496725 : f32
    %101 = vector.broadcast %cst_41 : f32 to vector<32x128xf32>
    %102 = arith.addf %101, %100 : vector<32x128xf32>
    %103 = arith.mulf %92, %102 : vector<32x128xf32>
    %cst_42 = arith.constant 0.254829586 : f32
    %104 = vector.broadcast %cst_42 : f32 to vector<32x128xf32>
    %105 = arith.addf %104, %103 : vector<32x128xf32>
    %106 = arith.mulf %92, %105 : vector<32x128xf32>
    %cst_43 = arith.constant 0.000000e+00 : f32
    %107 = vector.broadcast %cst_43 : f32 to vector<32x128xf32>
    %108 = arith.subf %107, %87 : vector<32x128xf32>
    %109 = arith.mulf %108, %87 : vector<32x128xf32>
    %110 = math.exp %109 : vector<32x128xf32>
    %111 = arith.mulf %106, %110 : vector<32x128xf32>
    %cst_44 = arith.constant 1.000000e+00 : f32
    %112 = vector.broadcast %cst_44 : f32 to vector<32x128xf32>
    %113 = arith.subf %112, %111 : vector<32x128xf32>
    %cst_45 = arith.constant 5.000000e-01 : f32
    %114 = vector.broadcast %cst_45 : f32 to vector<32x128xf32>
    %115 = arith.mulf %114, %84 : vector<32x128xf32>
    %cst_46 = arith.constant 0.000000e+00 : f32
    %116 = vector.broadcast %cst_46 : f32 to vector<32x128xf32>
    %117 = arith.cmpf oge, %86, %116 : vector<32x128xf32>
    %cst_47 = arith.constant 0.000000e+00 : f32
    %118 = vector.broadcast %cst_47 : f32 to vector<32x128xf32>
    %119 = arith.subf %118, %113 : vector<32x128xf32>
    %120 = arith.select %117, %113, %119 : vector<32x128xi1>, vector<32x128xf32>
    %cst_48 = arith.constant 1.000000e+00 : f32
    %121 = vector.broadcast %cst_48 : f32 to vector<32x128xf32>
    %122 = arith.addf %121, %120 : vector<32x128xf32>
    %123 = arith.mulf %115, %122 : vector<32x128xf32>
    %124 = vector.extract_strided_slice %24 {offsets = [0, 0], sizes = [16, 256], strides = [1, 1]} : vector<32x256xbf16> to vector<16x256xbf16>
    %125 = tpu.iota {dimensions = array<i32: 1>} : vector<1x128xi32>
    %c49_i32 = arith.constant 49 : i32
    %126 = vector.broadcast %c49_i32 : i32 to vector<1x128xi32>
    %127 = arith.cmpi slt, %125, %126 : vector<1x128xi32>
    %c160_49 = arith.constant 160 : index
    %c0_50 = arith.constant 0 : index
    %128 = vector.load %arg3[%c160_49, %c0_50] : memref<256x32xbf16, #tpu.memory_space<vmem>>, vector<32x32xbf16>
    %129 = arith.truncf %123 : vector<32x128xf32> to vector<32x128xbf16>
    %cst_51 = arith.constant dense<0.000000e+00> : vector<32x128xf32>
    %130 = tpu.matmul %128, %129, %cst_51 {dimension_numbers = #tpu.dot_dimension_numbers<[1], [0], [0], [1], [0, 0, 1, 1], [], []>} : vector<32x32xbf16>, vector<32x128xbf16>, vector<32x128xf32> -> vector<32x128xf32>
    %c320 = arith.constant 320 : index
    %c0_52 = arith.constant 0 : index
    %131 = vector.load %arg5[%c320, %c0_52] : memref<800x1xf32, #tpu.memory_space<vmem>>, vector<32x1xf32>
    %132 = vector.broadcast %131 : vector<32x1xf32> to vector<32x128xf32>
    %133 = arith.addf %130, %132 : vector<32x128xf32>
    %134 = vector.extract_strided_slice %133 {offsets = [0, 0], sizes = [16, 128], strides = [1, 1]} : vector<32x128xf32> to vector<16x128xf32>
    %cst_53 = arith.constant dense<0xFF800000> : vector<16xf32>
    %135 = vector.multi_reduction <maximumf>, %134, %cst_53 [1] : vector<16x128xf32> to vector<16xf32>
    %136 = vector.shape_cast %135 : vector<16xf32> to vector<16x1xf32>
    %137 = vector.broadcast %136 : vector<16x1xf32> to vector<16x128xf32>
    %138 = arith.subf %134, %137 : vector<16x128xf32>
    %139 = math.exp %138 : vector<16x128xf32>
    %cst_54 = arith.constant 0.000000e+00 : f32
    %140 = vector.shape_cast %127 : vector<1x128xi1> to vector<1x128xi1>
    %141 = vector.broadcast %140 : vector<1x128xi1> to vector<16x128xi1>
    %142 = vector.broadcast %cst_54 : f32 to vector<16x128xf32>
    %143 = arith.select %141, %139, %142 : vector<16x128xi1>, vector<16x128xf32>
    %cst_55 = arith.constant dense<0.000000e+00> : vector<16xf32>
    %144 = vector.multi_reduction <add>, %143, %cst_55 [1] : vector<16x128xf32> to vector<16xf32>
    %145 = vector.shape_cast %144 : vector<16xf32> to vector<16x1xf32>
    %146 = tpu.reciprocal %145 {approx = true} : vector<16x1xf32> -> vector<16x1xf32>
    %147 = vector.broadcast %146 : vector<16x1xf32> to vector<16x128xf32>
    %148 = arith.mulf %143, %147 : vector<16x128xf32>
    %149 = vector.extract_strided_slice %133 {offsets = [16, 0], sizes = [16, 128], strides = [1, 1]} : vector<32x128xf32> to vector<16x128xf32>
    %c384 = arith.constant 384 : index
    %c0_56 = arith.constant 0 : index
    %150 = vector.load %arg5[%c384, %c0_56] : memref<800x1xf32, #tpu.memory_space<vmem>>, vector<16x1xf32>
    %151 = vector.broadcast %150 : vector<16x1xf32> to vector<16x128xf32>
    %152 = arith.addf %149, %151 : vector<16x128xf32>
    %153 = tpu.iota {dimensions = array<i32: 1>} : vector<1x128xi32>
    %154 = arith.sitofp %153 : vector<1x128xi32> to vector<1x128xf32>
    %cst_57 = arith.constant 5.000000e-01 : f32
    %155 = vector.broadcast %cst_57 : f32 to vector<1x128xf32>
    %156 = arith.addf %154, %155 : vector<1x128xf32>
    %cst_58 = arith.constant 0.142857149 : f32
    %157 = vector.broadcast %cst_58 : f32 to vector<1x128xf32>
    %158 = arith.mulf %156, %157 : vector<1x128xf32>
    %159 = math.floor %158 : vector<1x128xf32>
    %cst_59 = arith.constant 7.000000e+00 : f32
    %160 = vector.broadcast %cst_59 : f32 to vector<1x128xf32>
    %161 = arith.mulf %160, %159 : vector<1x128xf32>
    %162 = arith.subf %154, %161 : vector<1x128xf32>
    %cst_60 = arith.constant 0.000000e+00 : f32
    %163 = vector.broadcast %cst_60 : f32 to vector<16x128xf32>
    %c8_i32 = arith.constant 8 : i32
    %164 = tpu.dynamic_rotate %149 by %c8_i32 dim 1 : vector<16x128xf32>, i32 -> vector<16x128xf32>
    %cst_61 = arith.constant 4.900000e+01 : f32
    %165 = vector.broadcast %cst_61 : f32 to vector<1x128xf32>
    %166 = arith.cmpf olt, %154, %165 : vector<1x128xf32>
    %cst_62 = arith.constant -1.000000e+00 : f32
    %167 = vector.broadcast %cst_62 : f32 to vector<1x128xf32>
    %168 = arith.addf %159, %167 : vector<1x128xf32>
    %cst_63 = arith.constant 0.000000e+00 : f32
    %169 = vector.broadcast %cst_63 : f32 to vector<1x128xf32>
    %170 = arith.cmpf oge, %168, %169 : vector<1x128xf32>
    %171 = arith.andi %166, %170 : vector<1x128xi1>
    %cst_64 = arith.constant -1.000000e+00 : f32
    %172 = vector.broadcast %cst_64 : f32 to vector<1x128xf32>
    %173 = arith.addf %159, %172 : vector<1x128xf32>
    %cst_65 = arith.constant 7.000000e+00 : f32
    %174 = vector.broadcast %cst_65 : f32 to vector<1x128xf32>
    %175 = arith.cmpf olt, %173, %174 : vector<1x128xf32>
    %176 = arith.andi %171, %175 : vector<1x128xi1>
    %cst_66 = arith.constant -1.000000e+00 : f32
    %177 = vector.broadcast %cst_66 : f32 to vector<1x128xf32>
    %178 = arith.addf %162, %177 : vector<1x128xf32>
    %cst_67 = arith.constant 0.000000e+00 : f32
    %179 = vector.broadcast %cst_67 : f32 to vector<1x128xf32>
    %180 = arith.cmpf oge, %178, %179 : vector<1x128xf32>
    %181 = arith.andi %176, %180 : vector<1x128xi1>
    %cst_68 = arith.constant -1.000000e+00 : f32
    %182 = vector.broadcast %cst_68 : f32 to vector<1x128xf32>
    %183 = arith.addf %162, %182 : vector<1x128xf32>
    %cst_69 = arith.constant 7.000000e+00 : f32
    %184 = vector.broadcast %cst_69 : f32 to vector<1x128xf32>
    %185 = arith.cmpf olt, %183, %184 : vector<1x128xf32>
    %186 = arith.andi %181, %185 : vector<1x128xi1>
    %c512 = arith.constant 512 : index
    %c0_70 = arith.constant 0 : index
    %187 = vector.load %arg5[%c512, %c0_70] : memref<800x1xf32, #tpu.memory_space<vmem>>, vector<16x1xf32>
    %cst_71 = arith.constant 0.000000e+00 : f32
    %188 = vector.shape_cast %186 : vector<1x128xi1> to vector<1x128xi1>
    %189 = vector.broadcast %188 : vector<1x128xi1> to vector<16x128xi1>
    %190 = vector.broadcast %cst_71 : f32 to vector<16x128xf32>
    %191 = arith.select %189, %164, %190 : vector<16x128xi1>, vector<16x128xf32>
    %192 = vector.broadcast %187 : vector<16x1xf32> to vector<16x128xf32>
    %193 = arith.mulf %191, %192 : vector<16x128xf32>
    %194 = arith.addf %163, %193 : vector<16x128xf32>
    %c7_i32 = arith.constant 7 : i32
    %195 = tpu.dynamic_rotate %149 by %c7_i32 dim 1 : vector<16x128xf32>, i32 -> vector<16x128xf32>
    %cst_72 = arith.constant 4.900000e+01 : f32
    %196 = vector.broadcast %cst_72 : f32 to vector<1x128xf32>
    %197 = arith.cmpf olt, %154, %196 : vector<1x128xf32>
    %cst_73 = arith.constant -1.000000e+00 : f32
    %198 = vector.broadcast %cst_73 : f32 to vector<1x128xf32>
    %199 = arith.addf %159, %198 : vector<1x128xf32>
    %cst_74 = arith.constant 0.000000e+00 : f32
    %200 = vector.broadcast %cst_74 : f32 to vector<1x128xf32>
    %201 = arith.cmpf oge, %199, %200 : vector<1x128xf32>
    %202 = arith.andi %197, %201 : vector<1x128xi1>
    %cst_75 = arith.constant -1.000000e+00 : f32
    %203 = vector.broadcast %cst_75 : f32 to vector<1x128xf32>
    %204 = arith.addf %159, %203 : vector<1x128xf32>
    %cst_76 = arith.constant 7.000000e+00 : f32
    %205 = vector.broadcast %cst_76 : f32 to vector<1x128xf32>
    %206 = arith.cmpf olt, %204, %205 : vector<1x128xf32>
    %207 = arith.andi %202, %206 : vector<1x128xi1>
    %cst_77 = arith.constant 0.000000e+00 : f32
    %208 = vector.broadcast %cst_77 : f32 to vector<1x128xf32>
    %209 = arith.addf %162, %208 : vector<1x128xf32>
    %cst_78 = arith.constant 0.000000e+00 : f32
    %210 = vector.broadcast %cst_78 : f32 to vector<1x128xf32>
    %211 = arith.cmpf oge, %209, %210 : vector<1x128xf32>
    %212 = arith.andi %207, %211 : vector<1x128xi1>
    %cst_79 = arith.constant 0.000000e+00 : f32
    %213 = vector.broadcast %cst_79 : f32 to vector<1x128xf32>
    %214 = arith.addf %162, %213 : vector<1x128xf32>
    %cst_80 = arith.constant 7.000000e+00 : f32
    %215 = vector.broadcast %cst_80 : f32 to vector<1x128xf32>
    %216 = arith.cmpf olt, %214, %215 : vector<1x128xf32>
    %217 = arith.andi %212, %216 : vector<1x128xi1>
    %c528 = arith.constant 528 : index
    %c0_81 = arith.constant 0 : index
    %218 = vector.load %arg5[%c528, %c0_81] : memref<800x1xf32, #tpu.memory_space<vmem>>, vector<16x1xf32>
    %cst_82 = arith.constant 0.000000e+00 : f32
    %219 = vector.shape_cast %217 : vector<1x128xi1> to vector<1x128xi1>
    %220 = vector.broadcast %219 : vector<1x128xi1> to vector<16x128xi1>
    %221 = vector.broadcast %cst_82 : f32 to vector<16x128xf32>
    %222 = arith.select %220, %195, %221 : vector<16x128xi1>, vector<16x128xf32>
    %223 = vector.broadcast %218 : vector<16x1xf32> to vector<16x128xf32>
    %224 = arith.mulf %222, %223 : vector<16x128xf32>
    %225 = arith.addf %194, %224 : vector<16x128xf32>
    %c6_i32 = arith.constant 6 : i32
    %226 = tpu.dynamic_rotate %149 by %c6_i32 dim 1 : vector<16x128xf32>, i32 -> vector<16x128xf32>
    %cst_83 = arith.constant 4.900000e+01 : f32
    %227 = vector.broadcast %cst_83 : f32 to vector<1x128xf32>
    %228 = arith.cmpf olt, %154, %227 : vector<1x128xf32>
    %cst_84 = arith.constant -1.000000e+00 : f32
    %229 = vector.broadcast %cst_84 : f32 to vector<1x128xf32>
    %230 = arith.addf %159, %229 : vector<1x128xf32>
    %cst_85 = arith.constant 0.000000e+00 : f32
    %231 = vector.broadcast %cst_85 : f32 to vector<1x128xf32>
    %232 = arith.cmpf oge, %230, %231 : vector<1x128xf32>
    %233 = arith.andi %228, %232 : vector<1x128xi1>
    %cst_86 = arith.constant -1.000000e+00 : f32
    %234 = vector.broadcast %cst_86 : f32 to vector<1x128xf32>
    %235 = arith.addf %159, %234 : vector<1x128xf32>
    %cst_87 = arith.constant 7.000000e+00 : f32
    %236 = vector.broadcast %cst_87 : f32 to vector<1x128xf32>
    %237 = arith.cmpf olt, %235, %236 : vector<1x128xf32>
    %238 = arith.andi %233, %237 : vector<1x128xi1>
    %cst_88 = arith.constant 1.000000e+00 : f32
    %239 = vector.broadcast %cst_88 : f32 to vector<1x128xf32>
    %240 = arith.addf %162, %239 : vector<1x128xf32>
    %cst_89 = arith.constant 0.000000e+00 : f32
    %241 = vector.broadcast %cst_89 : f32 to vector<1x128xf32>
    %242 = arith.cmpf oge, %240, %241 : vector<1x128xf32>
    %243 = arith.andi %238, %242 : vector<1x128xi1>
    %cst_90 = arith.constant 1.000000e+00 : f32
    %244 = vector.broadcast %cst_90 : f32 to vector<1x128xf32>
    %245 = arith.addf %162, %244 : vector<1x128xf32>
    %cst_91 = arith.constant 7.000000e+00 : f32
    %246 = vector.broadcast %cst_91 : f32 to vector<1x128xf32>
    %247 = arith.cmpf olt, %245, %246 : vector<1x128xf32>
    %248 = arith.andi %243, %247 : vector<1x128xi1>
    %c544 = arith.constant 544 : index
    %c0_92 = arith.constant 0 : index
    %249 = vector.load %arg5[%c544, %c0_92] : memref<800x1xf32, #tpu.memory_space<vmem>>, vector<16x1xf32>
    %cst_93 = arith.constant 0.000000e+00 : f32
    %250 = vector.shape_cast %248 : vector<1x128xi1> to vector<1x128xi1>
    %251 = vector.broadcast %250 : vector<1x128xi1> to vector<16x128xi1>
    %252 = vector.broadcast %cst_93 : f32 to vector<16x128xf32>
    %253 = arith.select %251, %226, %252 : vector<16x128xi1>, vector<16x128xf32>
    %254 = vector.broadcast %249 : vector<16x1xf32> to vector<16x128xf32>
    %255 = arith.mulf %253, %254 : vector<16x128xf32>
    %256 = arith.addf %225, %255 : vector<16x128xf32>
    %c1_i32 = arith.constant 1 : i32
    %257 = tpu.dynamic_rotate %149 by %c1_i32 dim 1 : vector<16x128xf32>, i32 -> vector<16x128xf32>
    %cst_94 = arith.constant 4.900000e+01 : f32
    %258 = vector.broadcast %cst_94 : f32 to vector<1x128xf32>
    %259 = arith.cmpf olt, %154, %258 : vector<1x128xf32>
    %cst_95 = arith.constant 0.000000e+00 : f32
    %260 = vector.broadcast %cst_95 : f32 to vector<1x128xf32>
    %261 = arith.addf %159, %260 : vector<1x128xf32>
    %cst_96 = arith.constant 0.000000e+00 : f32
    %262 = vector.broadcast %cst_96 : f32 to vector<1x128xf32>
    %263 = arith.cmpf oge, %261, %262 : vector<1x128xf32>
    %264 = arith.andi %259, %263 : vector<1x128xi1>
    %cst_97 = arith.constant 0.000000e+00 : f32
    %265 = vector.broadcast %cst_97 : f32 to vector<1x128xf32>
    %266 = arith.addf %159, %265 : vector<1x128xf32>
    %cst_98 = arith.constant 7.000000e+00 : f32
    %267 = vector.broadcast %cst_98 : f32 to vector<1x128xf32>
    %268 = arith.cmpf olt, %266, %267 : vector<1x128xf32>
    %269 = arith.andi %264, %268 : vector<1x128xi1>
    %cst_99 = arith.constant -1.000000e+00 : f32
    %270 = vector.broadcast %cst_99 : f32 to vector<1x128xf32>
    %271 = arith.addf %162, %270 : vector<1x128xf32>
    %cst_100 = arith.constant 0.000000e+00 : f32
    %272 = vector.broadcast %cst_100 : f32 to vector<1x128xf32>
    %273 = arith.cmpf oge, %271, %272 : vector<1x128xf32>
    %274 = arith.andi %269, %273 : vector<1x128xi1>
    %cst_101 = arith.constant -1.000000e+00 : f32
    %275 = vector.broadcast %cst_101 : f32 to vector<1x128xf32>
    %276 = arith.addf %162, %275 : vector<1x128xf32>
    %cst_102 = arith.constant 7.000000e+00 : f32
    %277 = vector.broadcast %cst_102 : f32 to vector<1x128xf32>
    %278 = arith.cmpf olt, %276, %277 : vector<1x128xf32>
    %279 = arith.andi %274, %278 : vector<1x128xi1>
    %c560 = arith.constant 560 : index
    %c0_103 = arith.constant 0 : index
    %280 = vector.load %arg5[%c560, %c0_103] : memref<800x1xf32, #tpu.memory_space<vmem>>, vector<16x1xf32>
    %cst_104 = arith.constant 0.000000e+00 : f32
    %281 = vector.shape_cast %279 : vector<1x128xi1> to vector<1x128xi1>
    %282 = vector.broadcast %281 : vector<1x128xi1> to vector<16x128xi1>
    %283 = vector.broadcast %cst_104 : f32 to vector<16x128xf32>
    %284 = arith.select %282, %257, %283 : vector<16x128xi1>, vector<16x128xf32>
    %285 = vector.broadcast %280 : vector<16x1xf32> to vector<16x128xf32>
    %286 = arith.mulf %284, %285 : vector<16x128xf32>
    %287 = arith.addf %256, %286 : vector<16x128xf32>
    %cst_105 = arith.constant 4.900000e+01 : f32
    %288 = vector.broadcast %cst_105 : f32 to vector<1x128xf32>
    %289 = arith.cmpf olt, %154, %288 : vector<1x128xf32>
    %cst_106 = arith.constant 0.000000e+00 : f32
    %290 = vector.broadcast %cst_106 : f32 to vector<1x128xf32>
    %291 = arith.addf %159, %290 : vector<1x128xf32>
    %cst_107 = arith.constant 0.000000e+00 : f32
    %292 = vector.broadcast %cst_107 : f32 to vector<1x128xf32>
    %293 = arith.cmpf oge, %291, %292 : vector<1x128xf32>
    %294 = arith.andi %289, %293 : vector<1x128xi1>
    %cst_108 = arith.constant 0.000000e+00 : f32
    %295 = vector.broadcast %cst_108 : f32 to vector<1x128xf32>
    %296 = arith.addf %159, %295 : vector<1x128xf32>
    %cst_109 = arith.constant 7.000000e+00 : f32
    %297 = vector.broadcast %cst_109 : f32 to vector<1x128xf32>
    %298 = arith.cmpf olt, %296, %297 : vector<1x128xf32>
    %299 = arith.andi %294, %298 : vector<1x128xi1>
    %cst_110 = arith.constant 0.000000e+00 : f32
    %300 = vector.broadcast %cst_110 : f32 to vector<1x128xf32>
    %301 = arith.addf %162, %300 : vector<1x128xf32>
    %cst_111 = arith.constant 0.000000e+00 : f32
    %302 = vector.broadcast %cst_111 : f32 to vector<1x128xf32>
    %303 = arith.cmpf oge, %301, %302 : vector<1x128xf32>
    %304 = arith.andi %299, %303 : vector<1x128xi1>
    %cst_112 = arith.constant 0.000000e+00 : f32
    %305 = vector.broadcast %cst_112 : f32 to vector<1x128xf32>
    %306 = arith.addf %162, %305 : vector<1x128xf32>
    %cst_113 = arith.constant 7.000000e+00 : f32
    %307 = vector.broadcast %cst_113 : f32 to vector<1x128xf32>
    %308 = arith.cmpf olt, %306, %307 : vector<1x128xf32>
    %309 = arith.andi %304, %308 : vector<1x128xi1>
    %c576 = arith.constant 576 : index
    %c0_114 = arith.constant 0 : index
    %310 = vector.load %arg5[%c576, %c0_114] : memref<800x1xf32, #tpu.memory_space<vmem>>, vector<16x1xf32>
    %cst_115 = arith.constant 0.000000e+00 : f32
    %311 = vector.shape_cast %309 : vector<1x128xi1> to vector<1x128xi1>
    %312 = vector.broadcast %311 : vector<1x128xi1> to vector<16x128xi1>
    %313 = vector.broadcast %cst_115 : f32 to vector<16x128xf32>
    %314 = arith.select %312, %149, %313 : vector<16x128xi1>, vector<16x128xf32>
    %315 = vector.broadcast %310 : vector<16x1xf32> to vector<16x128xf32>
    %316 = arith.mulf %314, %315 : vector<16x128xf32>
    %317 = arith.addf %287, %316 : vector<16x128xf32>
    %c127_i32 = arith.constant 127 : i32
    %318 = tpu.dynamic_rotate %149 by %c127_i32 dim 1 : vector<16x128xf32>, i32 -> vector<16x128xf32>
    %cst_116 = arith.constant 4.900000e+01 : f32
    %319 = vector.broadcast %cst_116 : f32 to vector<1x128xf32>
    %320 = arith.cmpf olt, %154, %319 : vector<1x128xf32>
    %cst_117 = arith.constant 0.000000e+00 : f32
    %321 = vector.broadcast %cst_117 : f32 to vector<1x128xf32>
    %322 = arith.addf %159, %321 : vector<1x128xf32>
    %cst_118 = arith.constant 0.000000e+00 : f32
    %323 = vector.broadcast %cst_118 : f32 to vector<1x128xf32>
    %324 = arith.cmpf oge, %322, %323 : vector<1x128xf32>
    %325 = arith.andi %320, %324 : vector<1x128xi1>
    %cst_119 = arith.constant 0.000000e+00 : f32
    %326 = vector.broadcast %cst_119 : f32 to vector<1x128xf32>
    %327 = arith.addf %159, %326 : vector<1x128xf32>
    %cst_120 = arith.constant 7.000000e+00 : f32
    %328 = vector.broadcast %cst_120 : f32 to vector<1x128xf32>
    %329 = arith.cmpf olt, %327, %328 : vector<1x128xf32>
    %330 = arith.andi %325, %329 : vector<1x128xi1>
    %cst_121 = arith.constant 1.000000e+00 : f32
    %331 = vector.broadcast %cst_121 : f32 to vector<1x128xf32>
    %332 = arith.addf %162, %331 : vector<1x128xf32>
    %cst_122 = arith.constant 0.000000e+00 : f32
    %333 = vector.broadcast %cst_122 : f32 to vector<1x128xf32>
    %334 = arith.cmpf oge, %332, %333 : vector<1x128xf32>
    %335 = arith.andi %330, %334 : vector<1x128xi1>
    %cst_123 = arith.constant 1.000000e+00 : f32
    %336 = vector.broadcast %cst_123 : f32 to vector<1x128xf32>
    %337 = arith.addf %162, %336 : vector<1x128xf32>
    %cst_124 = arith.constant 7.000000e+00 : f32
    %338 = vector.broadcast %cst_124 : f32 to vector<1x128xf32>
    %339 = arith.cmpf olt, %337, %338 : vector<1x128xf32>
    %340 = arith.andi %335, %339 : vector<1x128xi1>
    %c592 = arith.constant 592 : index
    %c0_125 = arith.constant 0 : index
    %341 = vector.load %arg5[%c592, %c0_125] : memref<800x1xf32, #tpu.memory_space<vmem>>, vector<16x1xf32>
    %cst_126 = arith.constant 0.000000e+00 : f32
    %342 = vector.shape_cast %340 : vector<1x128xi1> to vector<1x128xi1>
    %343 = vector.broadcast %342 : vector<1x128xi1> to vector<16x128xi1>
    %344 = vector.broadcast %cst_126 : f32 to vector<16x128xf32>
    %345 = arith.select %343, %318, %344 : vector<16x128xi1>, vector<16x128xf32>
    %346 = vector.broadcast %341 : vector<16x1xf32> to vector<16x128xf32>
    %347 = arith.mulf %345, %346 : vector<16x128xf32>
    %348 = arith.addf %317, %347 : vector<16x128xf32>
    %c122_i32 = arith.constant 122 : i32
    %349 = tpu.dynamic_rotate %149 by %c122_i32 dim 1 : vector<16x128xf32>, i32 -> vector<16x128xf32>
    %cst_127 = arith.constant 4.900000e+01 : f32
    %350 = vector.broadcast %cst_127 : f32 to vector<1x128xf32>
    %351 = arith.cmpf olt, %154, %350 : vector<1x128xf32>
    %cst_128 = arith.constant 1.000000e+00 : f32
    %352 = vector.broadcast %cst_128 : f32 to vector<1x128xf32>
    %353 = arith.addf %159, %352 : vector<1x128xf32>
    %cst_129 = arith.constant 0.000000e+00 : f32
    %354 = vector.broadcast %cst_129 : f32 to vector<1x128xf32>
    %355 = arith.cmpf oge, %353, %354 : vector<1x128xf32>
    %356 = arith.andi %351, %355 : vector<1x128xi1>
    %cst_130 = arith.constant 1.000000e+00 : f32
    %357 = vector.broadcast %cst_130 : f32 to vector<1x128xf32>
    %358 = arith.addf %159, %357 : vector<1x128xf32>
    %cst_131 = arith.constant 7.000000e+00 : f32
    %359 = vector.broadcast %cst_131 : f32 to vector<1x128xf32>
    %360 = arith.cmpf olt, %358, %359 : vector<1x128xf32>
    %361 = arith.andi %356, %360 : vector<1x128xi1>
    %cst_132 = arith.constant -1.000000e+00 : f32
    %362 = vector.broadcast %cst_132 : f32 to vector<1x128xf32>
    %363 = arith.addf %162, %362 : vector<1x128xf32>
    %cst_133 = arith.constant 0.000000e+00 : f32
    %364 = vector.broadcast %cst_133 : f32 to vector<1x128xf32>
    %365 = arith.cmpf oge, %363, %364 : vector<1x128xf32>
    %366 = arith.andi %361, %365 : vector<1x128xi1>
    %cst_134 = arith.constant -1.000000e+00 : f32
    %367 = vector.broadcast %cst_134 : f32 to vector<1x128xf32>
    %368 = arith.addf %162, %367 : vector<1x128xf32>
    %cst_135 = arith.constant 7.000000e+00 : f32
    %369 = vector.broadcast %cst_135 : f32 to vector<1x128xf32>
    %370 = arith.cmpf olt, %368, %369 : vector<1x128xf32>
    %371 = arith.andi %366, %370 : vector<1x128xi1>
    %c608 = arith.constant 608 : index
    %c0_136 = arith.constant 0 : index
    %372 = vector.load %arg5[%c608, %c0_136] : memref<800x1xf32, #tpu.memory_space<vmem>>, vector<16x1xf32>
    %cst_137 = arith.constant 0.000000e+00 : f32
    %373 = vector.shape_cast %371 : vector<1x128xi1> to vector<1x128xi1>
    %374 = vector.broadcast %373 : vector<1x128xi1> to vector<16x128xi1>
    %375 = vector.broadcast %cst_137 : f32 to vector<16x128xf32>
    %376 = arith.select %374, %349, %375 : vector<16x128xi1>, vector<16x128xf32>
    %377 = vector.broadcast %372 : vector<16x1xf32> to vector<16x128xf32>
    %378 = arith.mulf %376, %377 : vector<16x128xf32>
    %379 = arith.addf %348, %378 : vector<16x128xf32>
    %c121_i32 = arith.constant 121 : i32
    %380 = tpu.dynamic_rotate %149 by %c121_i32 dim 1 : vector<16x128xf32>, i32 -> vector<16x128xf32>
    %cst_138 = arith.constant 4.900000e+01 : f32
    %381 = vector.broadcast %cst_138 : f32 to vector<1x128xf32>
    %382 = arith.cmpf olt, %154, %381 : vector<1x128xf32>
    %cst_139 = arith.constant 1.000000e+00 : f32
    %383 = vector.broadcast %cst_139 : f32 to vector<1x128xf32>
    %384 = arith.addf %159, %383 : vector<1x128xf32>
    %cst_140 = arith.constant 0.000000e+00 : f32
    %385 = vector.broadcast %cst_140 : f32 to vector<1x128xf32>
    %386 = arith.cmpf oge, %384, %385 : vector<1x128xf32>
    %387 = arith.andi %382, %386 : vector<1x128xi1>
    %cst_141 = arith.constant 1.000000e+00 : f32
    %388 = vector.broadcast %cst_141 : f32 to vector<1x128xf32>
    %389 = arith.addf %159, %388 : vector<1x128xf32>
    %cst_142 = arith.constant 7.000000e+00 : f32
    %390 = vector.broadcast %cst_142 : f32 to vector<1x128xf32>
    %391 = arith.cmpf olt, %389, %390 : vector<1x128xf32>
    %392 = arith.andi %387, %391 : vector<1x128xi1>
    %cst_143 = arith.constant 0.000000e+00 : f32
    %393 = vector.broadcast %cst_143 : f32 to vector<1x128xf32>
    %394 = arith.addf %162, %393 : vector<1x128xf32>
    %cst_144 = arith.constant 0.000000e+00 : f32
    %395 = vector.broadcast %cst_144 : f32 to vector<1x128xf32>
    %396 = arith.cmpf oge, %394, %395 : vector<1x128xf32>
    %397 = arith.andi %392, %396 : vector<1x128xi1>
    %cst_145 = arith.constant 0.000000e+00 : f32
    %398 = vector.broadcast %cst_145 : f32 to vector<1x128xf32>
    %399 = arith.addf %162, %398 : vector<1x128xf32>
    %cst_146 = arith.constant 7.000000e+00 : f32
    %400 = vector.broadcast %cst_146 : f32 to vector<1x128xf32>
    %401 = arith.cmpf olt, %399, %400 : vector<1x128xf32>
    %402 = arith.andi %397, %401 : vector<1x128xi1>
    %c624 = arith.constant 624 : index
    %c0_147 = arith.constant 0 : index
    %403 = vector.load %arg5[%c624, %c0_147] : memref<800x1xf32, #tpu.memory_space<vmem>>, vector<16x1xf32>
    %cst_148 = arith.constant 0.000000e+00 : f32
    %404 = vector.shape_cast %402 : vector<1x128xi1> to vector<1x128xi1>
    %405 = vector.broadcast %404 : vector<1x128xi1> to vector<16x128xi1>
    %406 = vector.broadcast %cst_148 : f32 to vector<16x128xf32>
    %407 = arith.select %405, %380, %406 : vector<16x128xi1>, vector<16x128xf32>
    %408 = vector.broadcast %403 : vector<16x1xf32> to vector<16x128xf32>
    %409 = arith.mulf %407, %408 : vector<16x128xf32>
    %410 = arith.addf %379, %409 : vector<16x128xf32>
    %c120_i32 = arith.constant 120 : i32
    %411 = tpu.dynamic_rotate %149 by %c120_i32 dim 1 : vector<16x128xf32>, i32 -> vector<16x128xf32>
    %cst_149 = arith.constant 4.900000e+01 : f32
    %412 = vector.broadcast %cst_149 : f32 to vector<1x128xf32>
    %413 = arith.cmpf olt, %154, %412 : vector<1x128xf32>
    %cst_150 = arith.constant 1.000000e+00 : f32
    %414 = vector.broadcast %cst_150 : f32 to vector<1x128xf32>
    %415 = arith.addf %159, %414 : vector<1x128xf32>
    %cst_151 = arith.constant 0.000000e+00 : f32
    %416 = vector.broadcast %cst_151 : f32 to vector<1x128xf32>
    %417 = arith.cmpf oge, %415, %416 : vector<1x128xf32>
    %418 = arith.andi %413, %417 : vector<1x128xi1>
    %cst_152 = arith.constant 1.000000e+00 : f32
    %419 = vector.broadcast %cst_152 : f32 to vector<1x128xf32>
    %420 = arith.addf %159, %419 : vector<1x128xf32>
    %cst_153 = arith.constant 7.000000e+00 : f32
    %421 = vector.broadcast %cst_153 : f32 to vector<1x128xf32>
    %422 = arith.cmpf olt, %420, %421 : vector<1x128xf32>
    %423 = arith.andi %418, %422 : vector<1x128xi1>
    %cst_154 = arith.constant 1.000000e+00 : f32
    %424 = vector.broadcast %cst_154 : f32 to vector<1x128xf32>
    %425 = arith.addf %162, %424 : vector<1x128xf32>
    %cst_155 = arith.constant 0.000000e+00 : f32
    %426 = vector.broadcast %cst_155 : f32 to vector<1x128xf32>
    %427 = arith.cmpf oge, %425, %426 : vector<1x128xf32>
    %428 = arith.andi %423, %427 : vector<1x128xi1>
    %cst_156 = arith.constant 1.000000e+00 : f32
    %429 = vector.broadcast %cst_156 : f32 to vector<1x128xf32>
    %430 = arith.addf %162, %429 : vector<1x128xf32>
    %cst_157 = arith.constant 7.000000e+00 : f32
    %431 = vector.broadcast %cst_157 : f32 to vector<1x128xf32>
    %432 = arith.cmpf olt, %430, %431 : vector<1x128xf32>
    %433 = arith.andi %428, %432 : vector<1x128xi1>
    %c640 = arith.constant 640 : index
    %c0_158 = arith.constant 0 : index
    %434 = vector.load %arg5[%c640, %c0_158] : memref<800x1xf32, #tpu.memory_space<vmem>>, vector<16x1xf32>
    %cst_159 = arith.constant 0.000000e+00 : f32
    %435 = vector.shape_cast %433 : vector<1x128xi1> to vector<1x128xi1>
    %436 = vector.broadcast %435 : vector<1x128xi1> to vector<16x128xi1>
    %437 = vector.broadcast %cst_159 : f32 to vector<16x128xf32>
    %438 = arith.select %436, %411, %437 : vector<16x128xi1>, vector<16x128xf32>
    %439 = vector.broadcast %434 : vector<16x1xf32> to vector<16x128xf32>
    %440 = arith.mulf %438, %439 : vector<16x128xf32>
    %441 = arith.addf %410, %440 : vector<16x128xf32>
    %442 = arith.addf %152, %441 : vector<16x128xf32>
    %443 = arith.truncf %442 : vector<16x128xf32> to vector<16x128xbf16>
    %444 = arith.truncf %148 : vector<16x128xf32> to vector<16x128xbf16>
    %cst_160 = arith.constant dense<0.000000e+00> : vector<16x16xf32>
    %445 = tpu.matmul %443, %444, %cst_160 {dimension_numbers = #tpu.dot_dimension_numbers<[1], [1], [0], [0], [0, 0, 1, 0], [], []>} : vector<16x128xbf16>, vector<16x128xbf16>, vector<16x16xf32> -> vector<16x16xf32>
    %446 = arith.truncf %445 : vector<16x16xf32> to vector<16x16xbf16>
    %cst_161 = arith.constant dense<0.000000e+00> : vector<16x256xf32>
    %447 = tpu.matmul %446, %124, %cst_161 {dimension_numbers = #tpu.dot_dimension_numbers<[1], [0], [0], [1], [0, 0, 1, 1], [], []>} : vector<16x16xbf16>, vector<16x256xbf16>, vector<16x256xf32> -> vector<16x256xf32>
    %c256 = arith.constant 256 : index
    %c0_162 = arith.constant 0 : index
    %448 = vector.load %arg5[%c256, %c0_162] : memref<800x1xf32, #tpu.memory_space<vmem>>, vector<32x1xf32>
    %c288 = arith.constant 288 : index
    %c0_163 = arith.constant 0 : index
    %449 = vector.load %arg5[%c288, %c0_163] : memref<800x1xf32, #tpu.memory_space<vmem>>, vector<32x1xf32>
    %cst_164 = arith.constant dense<0.000000e+00> : vector<256xf32>
    %450 = vector.multi_reduction <add>, %13, %cst_164 [0] : vector<32x256xf32> to vector<256xf32>
    %451 = vector.shape_cast %450 : vector<256xf32> to vector<1x256xf32>
    %cst_165 = arith.constant 3.200000e+01 : f32
    %452 = vector.broadcast %cst_165 : f32 to vector<1x256xf32>
    %453 = arith.divf %451, %452 : vector<1x256xf32>
    %454 = vector.broadcast %453 : vector<1x256xf32> to vector<32x256xf32>
    %455 = arith.subf %13, %454 : vector<32x256xf32>
    %456 = arith.mulf %455, %455 : vector<32x256xf32>
    %cst_166 = arith.constant dense<0.000000e+00> : vector<256xf32>
    %457 = vector.multi_reduction <add>, %456, %cst_166 [0] : vector<32x256xf32> to vector<256xf32>
    %458 = vector.shape_cast %457 : vector<256xf32> to vector<1x256xf32>
    %cst_167 = arith.constant 3.200000e+01 : f32
    %459 = vector.broadcast %cst_167 : f32 to vector<1x256xf32>
    %460 = arith.divf %458, %459 : vector<1x256xf32>
    %cst_168 = arith.constant 9.99999974E-6 : f32
    %461 = vector.broadcast %cst_168 : f32 to vector<1x256xf32>
    %462 = arith.addf %460, %461 : vector<1x256xf32>
    %463 = math.rsqrt %462 : vector<1x256xf32>
    %464 = vector.broadcast %463 : vector<1x256xf32> to vector<32x256xf32>
    %465 = arith.mulf %455, %464 : vector<32x256xf32>
    %466 = vector.broadcast %448 : vector<32x1xf32> to vector<32x256xf32>
    %467 = arith.mulf %465, %466 : vector<32x256xf32>
    %468 = vector.broadcast %449 : vector<32x1xf32> to vector<32x256xf32>
    %469 = arith.addf %467, %468 : vector<32x256xf32>
    %cst_169 = arith.constant 0.707106769 : f32
    %470 = vector.broadcast %cst_169 : f32 to vector<32x256xf32>
    %471 = arith.mulf %469, %470 : vector<32x256xf32>
    %472 = math.absf %471 : vector<32x256xf32>
    %cst_170 = arith.constant 0.327591091 : f32
    %473 = vector.broadcast %cst_170 : f32 to vector<32x256xf32>
    %474 = arith.mulf %473, %472 : vector<32x256xf32>
    %cst_171 = arith.constant 1.000000e+00 : f32
    %475 = vector.broadcast %cst_171 : f32 to vector<32x256xf32>
    %476 = arith.addf %475, %474 : vector<32x256xf32>
    %477 = tpu.reciprocal %476 {approx = true} : vector<32x256xf32> -> vector<32x256xf32>
    %cst_172 = arith.constant 1.06140542 : f32
    %478 = vector.broadcast %cst_172 : f32 to vector<32x256xf32>
    %479 = arith.mulf %477, %478 : vector<32x256xf32>
    %cst_173 = arith.constant -1.45315206 : f32
    %480 = vector.broadcast %cst_173 : f32 to vector<32x256xf32>
    %481 = arith.addf %480, %479 : vector<32x256xf32>
    %482 = arith.mulf %477, %481 : vector<32x256xf32>
    %cst_174 = arith.constant 1.42141378 : f32
    %483 = vector.broadcast %cst_174 : f32 to vector<32x256xf32>
    %484 = arith.addf %483, %482 : vector<32x256xf32>
    %485 = arith.mulf %477, %484 : vector<32x256xf32>
    %cst_175 = arith.constant -0.284496725 : f32
    %486 = vector.broadcast %cst_175 : f32 to vector<32x256xf32>
    %487 = arith.addf %486, %485 : vector<32x256xf32>
    %488 = arith.mulf %477, %487 : vector<32x256xf32>
    %cst_176 = arith.constant 0.254829586 : f32
    %489 = vector.broadcast %cst_176 : f32 to vector<32x256xf32>
    %490 = arith.addf %489, %488 : vector<32x256xf32>
    %491 = arith.mulf %477, %490 : vector<32x256xf32>
    %cst_177 = arith.constant 0.000000e+00 : f32
    %492 = vector.broadcast %cst_177 : f32 to vector<32x256xf32>
    %493 = arith.subf %492, %472 : vector<32x256xf32>
    %494 = arith.mulf %493, %472 : vector<32x256xf32>
    %495 = math.exp %494 : vector<32x256xf32>
    %496 = arith.mulf %491, %495 : vector<32x256xf32>
    %cst_178 = arith.constant 1.000000e+00 : f32
    %497 = vector.broadcast %cst_178 : f32 to vector<32x256xf32>
    %498 = arith.subf %497, %496 : vector<32x256xf32>
    %cst_179 = arith.constant 5.000000e-01 : f32
    %499 = vector.broadcast %cst_179 : f32 to vector<32x256xf32>
    %500 = arith.mulf %499, %469 : vector<32x256xf32>
    %cst_180 = arith.constant 0.000000e+00 : f32
    %501 = vector.broadcast %cst_180 : f32 to vector<32x256xf32>
    %502 = arith.cmpf oge, %471, %501 : vector<32x256xf32>
    %cst_181 = arith.constant 0.000000e+00 : f32
    %503 = vector.broadcast %cst_181 : f32 to vector<32x256xf32>
    %504 = arith.subf %503, %498 : vector<32x256xf32>
    %505 = arith.select %502, %498, %504 : vector<32x256xi1>, vector<32x256xf32>
    %cst_182 = arith.constant 1.000000e+00 : f32
    %506 = vector.broadcast %cst_182 : f32 to vector<32x256xf32>
    %507 = arith.addf %506, %505 : vector<32x256xf32>
    %508 = arith.mulf %500, %507 : vector<32x256xf32>
    %509 = vector.extract_strided_slice %24 {offsets = [16, 0], sizes = [16, 256], strides = [1, 1]} : vector<32x256xbf16> to vector<16x256xbf16>
    %510 = tpu.iota {dimensions = array<i32: 1>} : vector<1x256xi32>
    %c196_i32_183 = arith.constant 196 : i32
    %511 = vector.broadcast %c196_i32_183 : i32 to vector<1x256xi32>
    %512 = arith.cmpi slt, %510, %511 : vector<1x256xi32>
    %c192_184 = arith.constant 192 : index
    %c0_185 = arith.constant 0 : index
    %513 = vector.load %arg3[%c192_184, %c0_185] : memref<256x32xbf16, #tpu.memory_space<vmem>>, vector<32x32xbf16>
    %514 = arith.truncf %508 : vector<32x256xf32> to vector<32x256xbf16>
    %cst_186 = arith.constant dense<0.000000e+00> : vector<32x256xf32>
    %515 = tpu.matmul %513, %514, %cst_186 {dimension_numbers = #tpu.dot_dimension_numbers<[1], [0], [0], [1], [0, 0, 1, 1], [], []>} : vector<32x32xbf16>, vector<32x256xbf16>, vector<32x256xf32> -> vector<32x256xf32>
    %c352 = arith.constant 352 : index
    %c0_187 = arith.constant 0 : index
    %516 = vector.load %arg5[%c352, %c0_187] : memref<800x1xf32, #tpu.memory_space<vmem>>, vector<32x1xf32>
    %517 = vector.broadcast %516 : vector<32x1xf32> to vector<32x256xf32>
    %518 = arith.addf %515, %517 : vector<32x256xf32>
    %519 = vector.extract_strided_slice %518 {offsets = [0, 0], sizes = [16, 256], strides = [1, 1]} : vector<32x256xf32> to vector<16x256xf32>
    %cst_188 = arith.constant dense<0xFF800000> : vector<16xf32>
    %520 = vector.multi_reduction <maximumf>, %519, %cst_188 [1] : vector<16x256xf32> to vector<16xf32>
    %521 = vector.shape_cast %520 : vector<16xf32> to vector<16x1xf32>
    %522 = vector.broadcast %521 : vector<16x1xf32> to vector<16x256xf32>
    %523 = arith.subf %519, %522 : vector<16x256xf32>
    %524 = math.exp %523 : vector<16x256xf32>
    %cst_189 = arith.constant 0.000000e+00 : f32
    %525 = vector.shape_cast %512 : vector<1x256xi1> to vector<1x256xi1>
    %526 = vector.broadcast %525 : vector<1x256xi1> to vector<16x256xi1>
    %527 = vector.broadcast %cst_189 : f32 to vector<16x256xf32>
    %528 = arith.select %526, %524, %527 : vector<16x256xi1>, vector<16x256xf32>
    %cst_190 = arith.constant dense<0.000000e+00> : vector<16xf32>
    %529 = vector.multi_reduction <add>, %528, %cst_190 [1] : vector<16x256xf32> to vector<16xf32>
    %530 = vector.shape_cast %529 : vector<16xf32> to vector<16x1xf32>
    %531 = tpu.reciprocal %530 {approx = true} : vector<16x1xf32> -> vector<16x1xf32>
    %532 = vector.broadcast %531 : vector<16x1xf32> to vector<16x256xf32>
    %533 = arith.mulf %528, %532 : vector<16x256xf32>
    %534 = vector.extract_strided_slice %518 {offsets = [16, 0], sizes = [16, 256], strides = [1, 1]} : vector<32x256xf32> to vector<16x256xf32>
    %c400 = arith.constant 400 : index
    %c0_191 = arith.constant 0 : index
    %535 = vector.load %arg5[%c400, %c0_191] : memref<800x1xf32, #tpu.memory_space<vmem>>, vector<16x1xf32>
    %536 = vector.broadcast %535 : vector<16x1xf32> to vector<16x256xf32>
    %537 = arith.addf %534, %536 : vector<16x256xf32>
    %538 = tpu.iota {dimensions = array<i32: 1>} : vector<1x256xi32>
    %539 = arith.sitofp %538 : vector<1x256xi32> to vector<1x256xf32>
    %cst_192 = arith.constant 5.000000e-01 : f32
    %540 = vector.broadcast %cst_192 : f32 to vector<1x256xf32>
    %541 = arith.addf %539, %540 : vector<1x256xf32>
    %cst_193 = arith.constant 0.0714285746 : f32
    %542 = vector.broadcast %cst_193 : f32 to vector<1x256xf32>
    %543 = arith.mulf %541, %542 : vector<1x256xf32>
    %544 = math.floor %543 : vector<1x256xf32>
    %cst_194 = arith.constant 1.400000e+01 : f32
    %545 = vector.broadcast %cst_194 : f32 to vector<1x256xf32>
    %546 = arith.mulf %545, %544 : vector<1x256xf32>
    %547 = arith.subf %539, %546 : vector<1x256xf32>
    %cst_195 = arith.constant 0.000000e+00 : f32
    %548 = vector.broadcast %cst_195 : f32 to vector<16x256xf32>
    %c15_i32 = arith.constant 15 : i32
    %549 = tpu.dynamic_rotate %534 by %c15_i32 dim 1 : vector<16x256xf32>, i32 -> vector<16x256xf32>
    %cst_196 = arith.constant 1.960000e+02 : f32
    %550 = vector.broadcast %cst_196 : f32 to vector<1x256xf32>
    %551 = arith.cmpf olt, %539, %550 : vector<1x256xf32>
    %cst_197 = arith.constant -1.000000e+00 : f32
    %552 = vector.broadcast %cst_197 : f32 to vector<1x256xf32>
    %553 = arith.addf %544, %552 : vector<1x256xf32>
    %cst_198 = arith.constant 0.000000e+00 : f32
    %554 = vector.broadcast %cst_198 : f32 to vector<1x256xf32>
    %555 = arith.cmpf oge, %553, %554 : vector<1x256xf32>
    %556 = arith.andi %551, %555 : vector<1x256xi1>
    %cst_199 = arith.constant -1.000000e+00 : f32
    %557 = vector.broadcast %cst_199 : f32 to vector<1x256xf32>
    %558 = arith.addf %544, %557 : vector<1x256xf32>
    %cst_200 = arith.constant 1.400000e+01 : f32
    %559 = vector.broadcast %cst_200 : f32 to vector<1x256xf32>
    %560 = arith.cmpf olt, %558, %559 : vector<1x256xf32>
    %561 = arith.andi %556, %560 : vector<1x256xi1>
    %cst_201 = arith.constant -1.000000e+00 : f32
    %562 = vector.broadcast %cst_201 : f32 to vector<1x256xf32>
    %563 = arith.addf %547, %562 : vector<1x256xf32>
    %cst_202 = arith.constant 0.000000e+00 : f32
    %564 = vector.broadcast %cst_202 : f32 to vector<1x256xf32>
    %565 = arith.cmpf oge, %563, %564 : vector<1x256xf32>
    %566 = arith.andi %561, %565 : vector<1x256xi1>
    %cst_203 = arith.constant -1.000000e+00 : f32
    %567 = vector.broadcast %cst_203 : f32 to vector<1x256xf32>
    %568 = arith.addf %547, %567 : vector<1x256xf32>
    %cst_204 = arith.constant 1.400000e+01 : f32
    %569 = vector.broadcast %cst_204 : f32 to vector<1x256xf32>
    %570 = arith.cmpf olt, %568, %569 : vector<1x256xf32>
    %571 = arith.andi %566, %570 : vector<1x256xi1>
    %c656 = arith.constant 656 : index
    %c0_205 = arith.constant 0 : index
    %572 = vector.load %arg5[%c656, %c0_205] : memref<800x1xf32, #tpu.memory_space<vmem>>, vector<16x1xf32>
    %cst_206 = arith.constant 0.000000e+00 : f32
    %573 = vector.shape_cast %571 : vector<1x256xi1> to vector<1x256xi1>
    %574 = vector.broadcast %573 : vector<1x256xi1> to vector<16x256xi1>
    %575 = vector.broadcast %cst_206 : f32 to vector<16x256xf32>
    %576 = arith.select %574, %549, %575 : vector<16x256xi1>, vector<16x256xf32>
    %577 = vector.broadcast %572 : vector<16x1xf32> to vector<16x256xf32>
    %578 = arith.mulf %576, %577 : vector<16x256xf32>
    %579 = arith.addf %548, %578 : vector<16x256xf32>
    %c14_i32 = arith.constant 14 : i32
    %580 = tpu.dynamic_rotate %534 by %c14_i32 dim 1 : vector<16x256xf32>, i32 -> vector<16x256xf32>
    %cst_207 = arith.constant 1.960000e+02 : f32
    %581 = vector.broadcast %cst_207 : f32 to vector<1x256xf32>
    %582 = arith.cmpf olt, %539, %581 : vector<1x256xf32>
    %cst_208 = arith.constant -1.000000e+00 : f32
    %583 = vector.broadcast %cst_208 : f32 to vector<1x256xf32>
    %584 = arith.addf %544, %583 : vector<1x256xf32>
    %cst_209 = arith.constant 0.000000e+00 : f32
    %585 = vector.broadcast %cst_209 : f32 to vector<1x256xf32>
    %586 = arith.cmpf oge, %584, %585 : vector<1x256xf32>
    %587 = arith.andi %582, %586 : vector<1x256xi1>
    %cst_210 = arith.constant -1.000000e+00 : f32
    %588 = vector.broadcast %cst_210 : f32 to vector<1x256xf32>
    %589 = arith.addf %544, %588 : vector<1x256xf32>
    %cst_211 = arith.constant 1.400000e+01 : f32
    %590 = vector.broadcast %cst_211 : f32 to vector<1x256xf32>
    %591 = arith.cmpf olt, %589, %590 : vector<1x256xf32>
    %592 = arith.andi %587, %591 : vector<1x256xi1>
    %cst_212 = arith.constant 0.000000e+00 : f32
    %593 = vector.broadcast %cst_212 : f32 to vector<1x256xf32>
    %594 = arith.addf %547, %593 : vector<1x256xf32>
    %cst_213 = arith.constant 0.000000e+00 : f32
    %595 = vector.broadcast %cst_213 : f32 to vector<1x256xf32>
    %596 = arith.cmpf oge, %594, %595 : vector<1x256xf32>
    %597 = arith.andi %592, %596 : vector<1x256xi1>
    %cst_214 = arith.constant 0.000000e+00 : f32
    %598 = vector.broadcast %cst_214 : f32 to vector<1x256xf32>
    %599 = arith.addf %547, %598 : vector<1x256xf32>
    %cst_215 = arith.constant 1.400000e+01 : f32
    %600 = vector.broadcast %cst_215 : f32 to vector<1x256xf32>
    %601 = arith.cmpf olt, %599, %600 : vector<1x256xf32>
    %602 = arith.andi %597, %601 : vector<1x256xi1>
    %c672 = arith.constant 672 : index
    %c0_216 = arith.constant 0 : index
    %603 = vector.load %arg5[%c672, %c0_216] : memref<800x1xf32, #tpu.memory_space<vmem>>, vector<16x1xf32>
    %cst_217 = arith.constant 0.000000e+00 : f32
    %604 = vector.shape_cast %602 : vector<1x256xi1> to vector<1x256xi1>
    %605 = vector.broadcast %604 : vector<1x256xi1> to vector<16x256xi1>
    %606 = vector.broadcast %cst_217 : f32 to vector<16x256xf32>
    %607 = arith.select %605, %580, %606 : vector<16x256xi1>, vector<16x256xf32>
    %608 = vector.broadcast %603 : vector<16x1xf32> to vector<16x256xf32>
    %609 = arith.mulf %607, %608 : vector<16x256xf32>
    %610 = arith.addf %579, %609 : vector<16x256xf32>
    %c13_i32 = arith.constant 13 : i32
    %611 = tpu.dynamic_rotate %534 by %c13_i32 dim 1 : vector<16x256xf32>, i32 -> vector<16x256xf32>
    %cst_218 = arith.constant 1.960000e+02 : f32
    %612 = vector.broadcast %cst_218 : f32 to vector<1x256xf32>
    %613 = arith.cmpf olt, %539, %612 : vector<1x256xf32>
    %cst_219 = arith.constant -1.000000e+00 : f32
    %614 = vector.broadcast %cst_219 : f32 to vector<1x256xf32>
    %615 = arith.addf %544, %614 : vector<1x256xf32>
    %cst_220 = arith.constant 0.000000e+00 : f32
    %616 = vector.broadcast %cst_220 : f32 to vector<1x256xf32>
    %617 = arith.cmpf oge, %615, %616 : vector<1x256xf32>
    %618 = arith.andi %613, %617 : vector<1x256xi1>
    %cst_221 = arith.constant -1.000000e+00 : f32
    %619 = vector.broadcast %cst_221 : f32 to vector<1x256xf32>
    %620 = arith.addf %544, %619 : vector<1x256xf32>
    %cst_222 = arith.constant 1.400000e+01 : f32
    %621 = vector.broadcast %cst_222 : f32 to vector<1x256xf32>
    %622 = arith.cmpf olt, %620, %621 : vector<1x256xf32>
    %623 = arith.andi %618, %622 : vector<1x256xi1>
    %cst_223 = arith.constant 1.000000e+00 : f32
    %624 = vector.broadcast %cst_223 : f32 to vector<1x256xf32>
    %625 = arith.addf %547, %624 : vector<1x256xf32>
    %cst_224 = arith.constant 0.000000e+00 : f32
    %626 = vector.broadcast %cst_224 : f32 to vector<1x256xf32>
    %627 = arith.cmpf oge, %625, %626 : vector<1x256xf32>
    %628 = arith.andi %623, %627 : vector<1x256xi1>
    %cst_225 = arith.constant 1.000000e+00 : f32
    %629 = vector.broadcast %cst_225 : f32 to vector<1x256xf32>
    %630 = arith.addf %547, %629 : vector<1x256xf32>
    %cst_226 = arith.constant 1.400000e+01 : f32
    %631 = vector.broadcast %cst_226 : f32 to vector<1x256xf32>
    %632 = arith.cmpf olt, %630, %631 : vector<1x256xf32>
    %633 = arith.andi %628, %632 : vector<1x256xi1>
    %c688 = arith.constant 688 : index
    %c0_227 = arith.constant 0 : index
    %634 = vector.load %arg5[%c688, %c0_227] : memref<800x1xf32, #tpu.memory_space<vmem>>, vector<16x1xf32>
    %cst_228 = arith.constant 0.000000e+00 : f32
    %635 = vector.shape_cast %633 : vector<1x256xi1> to vector<1x256xi1>
    %636 = vector.broadcast %635 : vector<1x256xi1> to vector<16x256xi1>
    %637 = vector.broadcast %cst_228 : f32 to vector<16x256xf32>
    %638 = arith.select %636, %611, %637 : vector<16x256xi1>, vector<16x256xf32>
    %639 = vector.broadcast %634 : vector<16x1xf32> to vector<16x256xf32>
    %640 = arith.mulf %638, %639 : vector<16x256xf32>
    %641 = arith.addf %610, %640 : vector<16x256xf32>
    %c1_i32_229 = arith.constant 1 : i32
    %642 = tpu.dynamic_rotate %534 by %c1_i32_229 dim 1 : vector<16x256xf32>, i32 -> vector<16x256xf32>
    %cst_230 = arith.constant 1.960000e+02 : f32
    %643 = vector.broadcast %cst_230 : f32 to vector<1x256xf32>
    %644 = arith.cmpf olt, %539, %643 : vector<1x256xf32>
    %cst_231 = arith.constant 0.000000e+00 : f32
    %645 = vector.broadcast %cst_231 : f32 to vector<1x256xf32>
    %646 = arith.addf %544, %645 : vector<1x256xf32>
    %cst_232 = arith.constant 0.000000e+00 : f32
    %647 = vector.broadcast %cst_232 : f32 to vector<1x256xf32>
    %648 = arith.cmpf oge, %646, %647 : vector<1x256xf32>
    %649 = arith.andi %644, %648 : vector<1x256xi1>
    %cst_233 = arith.constant 0.000000e+00 : f32
    %650 = vector.broadcast %cst_233 : f32 to vector<1x256xf32>
    %651 = arith.addf %544, %650 : vector<1x256xf32>
    %cst_234 = arith.constant 1.400000e+01 : f32
    %652 = vector.broadcast %cst_234 : f32 to vector<1x256xf32>
    %653 = arith.cmpf olt, %651, %652 : vector<1x256xf32>
    %654 = arith.andi %649, %653 : vector<1x256xi1>
    %cst_235 = arith.constant -1.000000e+00 : f32
    %655 = vector.broadcast %cst_235 : f32 to vector<1x256xf32>
    %656 = arith.addf %547, %655 : vector<1x256xf32>
    %cst_236 = arith.constant 0.000000e+00 : f32
    %657 = vector.broadcast %cst_236 : f32 to vector<1x256xf32>
    %658 = arith.cmpf oge, %656, %657 : vector<1x256xf32>
    %659 = arith.andi %654, %658 : vector<1x256xi1>
    %cst_237 = arith.constant -1.000000e+00 : f32
    %660 = vector.broadcast %cst_237 : f32 to vector<1x256xf32>
    %661 = arith.addf %547, %660 : vector<1x256xf32>
    %cst_238 = arith.constant 1.400000e+01 : f32
    %662 = vector.broadcast %cst_238 : f32 to vector<1x256xf32>
    %663 = arith.cmpf olt, %661, %662 : vector<1x256xf32>
    %664 = arith.andi %659, %663 : vector<1x256xi1>
    %c704 = arith.constant 704 : index
    %c0_239 = arith.constant 0 : index
    %665 = vector.load %arg5[%c704, %c0_239] : memref<800x1xf32, #tpu.memory_space<vmem>>, vector<16x1xf32>
    %cst_240 = arith.constant 0.000000e+00 : f32
    %666 = vector.shape_cast %664 : vector<1x256xi1> to vector<1x256xi1>
    %667 = vector.broadcast %666 : vector<1x256xi1> to vector<16x256xi1>
    %668 = vector.broadcast %cst_240 : f32 to vector<16x256xf32>
    %669 = arith.select %667, %642, %668 : vector<16x256xi1>, vector<16x256xf32>
    %670 = vector.broadcast %665 : vector<16x1xf32> to vector<16x256xf32>
    %671 = arith.mulf %669, %670 : vector<16x256xf32>
    %672 = arith.addf %641, %671 : vector<16x256xf32>
    %cst_241 = arith.constant 1.960000e+02 : f32
    %673 = vector.broadcast %cst_241 : f32 to vector<1x256xf32>
    %674 = arith.cmpf olt, %539, %673 : vector<1x256xf32>
    %cst_242 = arith.constant 0.000000e+00 : f32
    %675 = vector.broadcast %cst_242 : f32 to vector<1x256xf32>
    %676 = arith.addf %544, %675 : vector<1x256xf32>
    %cst_243 = arith.constant 0.000000e+00 : f32
    %677 = vector.broadcast %cst_243 : f32 to vector<1x256xf32>
    %678 = arith.cmpf oge, %676, %677 : vector<1x256xf32>
    %679 = arith.andi %674, %678 : vector<1x256xi1>
    %cst_244 = arith.constant 0.000000e+00 : f32
    %680 = vector.broadcast %cst_244 : f32 to vector<1x256xf32>
    %681 = arith.addf %544, %680 : vector<1x256xf32>
    %cst_245 = arith.constant 1.400000e+01 : f32
    %682 = vector.broadcast %cst_245 : f32 to vector<1x256xf32>
    %683 = arith.cmpf olt, %681, %682 : vector<1x256xf32>
    %684 = arith.andi %679, %683 : vector<1x256xi1>
    %cst_246 = arith.constant 0.000000e+00 : f32
    %685 = vector.broadcast %cst_246 : f32 to vector<1x256xf32>
    %686 = arith.addf %547, %685 : vector<1x256xf32>
    %cst_247 = arith.constant 0.000000e+00 : f32
    %687 = vector.broadcast %cst_247 : f32 to vector<1x256xf32>
    %688 = arith.cmpf oge, %686, %687 : vector<1x256xf32>
    %689 = arith.andi %684, %688 : vector<1x256xi1>
    %cst_248 = arith.constant 0.000000e+00 : f32
    %690 = vector.broadcast %cst_248 : f32 to vector<1x256xf32>
    %691 = arith.addf %547, %690 : vector<1x256xf32>
    %cst_249 = arith.constant 1.400000e+01 : f32
    %692 = vector.broadcast %cst_249 : f32 to vector<1x256xf32>
    %693 = arith.cmpf olt, %691, %692 : vector<1x256xf32>
    %694 = arith.andi %689, %693 : vector<1x256xi1>
    %c720 = arith.constant 720 : index
    %c0_250 = arith.constant 0 : index
    %695 = vector.load %arg5[%c720, %c0_250] : memref<800x1xf32, #tpu.memory_space<vmem>>, vector<16x1xf32>
    %cst_251 = arith.constant 0.000000e+00 : f32
    %696 = vector.shape_cast %694 : vector<1x256xi1> to vector<1x256xi1>
    %697 = vector.broadcast %696 : vector<1x256xi1> to vector<16x256xi1>
    %698 = vector.broadcast %cst_251 : f32 to vector<16x256xf32>
    %699 = arith.select %697, %534, %698 : vector<16x256xi1>, vector<16x256xf32>
    %700 = vector.broadcast %695 : vector<16x1xf32> to vector<16x256xf32>
    %701 = arith.mulf %699, %700 : vector<16x256xf32>
    %702 = arith.addf %672, %701 : vector<16x256xf32>
    %c255_i32 = arith.constant 255 : i32
    %703 = tpu.dynamic_rotate %534 by %c255_i32 dim 1 : vector<16x256xf32>, i32 -> vector<16x256xf32>
    %cst_252 = arith.constant 1.960000e+02 : f32
    %704 = vector.broadcast %cst_252 : f32 to vector<1x256xf32>
    %705 = arith.cmpf olt, %539, %704 : vector<1x256xf32>
    %cst_253 = arith.constant 0.000000e+00 : f32
    %706 = vector.broadcast %cst_253 : f32 to vector<1x256xf32>
    %707 = arith.addf %544, %706 : vector<1x256xf32>
    %cst_254 = arith.constant 0.000000e+00 : f32
    %708 = vector.broadcast %cst_254 : f32 to vector<1x256xf32>
    %709 = arith.cmpf oge, %707, %708 : vector<1x256xf32>
    %710 = arith.andi %705, %709 : vector<1x256xi1>
    %cst_255 = arith.constant 0.000000e+00 : f32
    %711 = vector.broadcast %cst_255 : f32 to vector<1x256xf32>
    %712 = arith.addf %544, %711 : vector<1x256xf32>
    %cst_256 = arith.constant 1.400000e+01 : f32
    %713 = vector.broadcast %cst_256 : f32 to vector<1x256xf32>
    %714 = arith.cmpf olt, %712, %713 : vector<1x256xf32>
    %715 = arith.andi %710, %714 : vector<1x256xi1>
    %cst_257 = arith.constant 1.000000e+00 : f32
    %716 = vector.broadcast %cst_257 : f32 to vector<1x256xf32>
    %717 = arith.addf %547, %716 : vector<1x256xf32>
    %cst_258 = arith.constant 0.000000e+00 : f32
    %718 = vector.broadcast %cst_258 : f32 to vector<1x256xf32>
    %719 = arith.cmpf oge, %717, %718 : vector<1x256xf32>
    %720 = arith.andi %715, %719 : vector<1x256xi1>
    %cst_259 = arith.constant 1.000000e+00 : f32
    %721 = vector.broadcast %cst_259 : f32 to vector<1x256xf32>
    %722 = arith.addf %547, %721 : vector<1x256xf32>
    %cst_260 = arith.constant 1.400000e+01 : f32
    %723 = vector.broadcast %cst_260 : f32 to vector<1x256xf32>
    %724 = arith.cmpf olt, %722, %723 : vector<1x256xf32>
    %725 = arith.andi %720, %724 : vector<1x256xi1>
    %c736 = arith.constant 736 : index
    %c0_261 = arith.constant 0 : index
    %726 = vector.load %arg5[%c736, %c0_261] : memref<800x1xf32, #tpu.memory_space<vmem>>, vector<16x1xf32>
    %cst_262 = arith.constant 0.000000e+00 : f32
    %727 = vector.shape_cast %725 : vector<1x256xi1> to vector<1x256xi1>
    %728 = vector.broadcast %727 : vector<1x256xi1> to vector<16x256xi1>
    %729 = vector.broadcast %cst_262 : f32 to vector<16x256xf32>
    %730 = arith.select %728, %703, %729 : vector<16x256xi1>, vector<16x256xf32>
    %731 = vector.broadcast %726 : vector<16x1xf32> to vector<16x256xf32>
    %732 = arith.mulf %730, %731 : vector<16x256xf32>
    %733 = arith.addf %702, %732 : vector<16x256xf32>
    %c243_i32 = arith.constant 243 : i32
    %734 = tpu.dynamic_rotate %534 by %c243_i32 dim 1 : vector<16x256xf32>, i32 -> vector<16x256xf32>
    %cst_263 = arith.constant 1.960000e+02 : f32
    %735 = vector.broadcast %cst_263 : f32 to vector<1x256xf32>
    %736 = arith.cmpf olt, %539, %735 : vector<1x256xf32>
    %cst_264 = arith.constant 1.000000e+00 : f32
    %737 = vector.broadcast %cst_264 : f32 to vector<1x256xf32>
    %738 = arith.addf %544, %737 : vector<1x256xf32>
    %cst_265 = arith.constant 0.000000e+00 : f32
    %739 = vector.broadcast %cst_265 : f32 to vector<1x256xf32>
    %740 = arith.cmpf oge, %738, %739 : vector<1x256xf32>
    %741 = arith.andi %736, %740 : vector<1x256xi1>
    %cst_266 = arith.constant 1.000000e+00 : f32
    %742 = vector.broadcast %cst_266 : f32 to vector<1x256xf32>
    %743 = arith.addf %544, %742 : vector<1x256xf32>
    %cst_267 = arith.constant 1.400000e+01 : f32
    %744 = vector.broadcast %cst_267 : f32 to vector<1x256xf32>
    %745 = arith.cmpf olt, %743, %744 : vector<1x256xf32>
    %746 = arith.andi %741, %745 : vector<1x256xi1>
    %cst_268 = arith.constant -1.000000e+00 : f32
    %747 = vector.broadcast %cst_268 : f32 to vector<1x256xf32>
    %748 = arith.addf %547, %747 : vector<1x256xf32>
    %cst_269 = arith.constant 0.000000e+00 : f32
    %749 = vector.broadcast %cst_269 : f32 to vector<1x256xf32>
    %750 = arith.cmpf oge, %748, %749 : vector<1x256xf32>
    %751 = arith.andi %746, %750 : vector<1x256xi1>
    %cst_270 = arith.constant -1.000000e+00 : f32
    %752 = vector.broadcast %cst_270 : f32 to vector<1x256xf32>
    %753 = arith.addf %547, %752 : vector<1x256xf32>
    %cst_271 = arith.constant 1.400000e+01 : f32
    %754 = vector.broadcast %cst_271 : f32 to vector<1x256xf32>
    %755 = arith.cmpf olt, %753, %754 : vector<1x256xf32>
    %756 = arith.andi %751, %755 : vector<1x256xi1>
    %c752 = arith.constant 752 : index
    %c0_272 = arith.constant 0 : index
    %757 = vector.load %arg5[%c752, %c0_272] : memref<800x1xf32, #tpu.memory_space<vmem>>, vector<16x1xf32>
    %cst_273 = arith.constant 0.000000e+00 : f32
    %758 = vector.shape_cast %756 : vector<1x256xi1> to vector<1x256xi1>
    %759 = vector.broadcast %758 : vector<1x256xi1> to vector<16x256xi1>
    %760 = vector.broadcast %cst_273 : f32 to vector<16x256xf32>
    %761 = arith.select %759, %734, %760 : vector<16x256xi1>, vector<16x256xf32>
    %762 = vector.broadcast %757 : vector<16x1xf32> to vector<16x256xf32>
    %763 = arith.mulf %761, %762 : vector<16x256xf32>
    %764 = arith.addf %733, %763 : vector<16x256xf32>
    %c242_i32 = arith.constant 242 : i32
    %765 = tpu.dynamic_rotate %534 by %c242_i32 dim 1 : vector<16x256xf32>, i32 -> vector<16x256xf32>
    %cst_274 = arith.constant 1.960000e+02 : f32
    %766 = vector.broadcast %cst_274 : f32 to vector<1x256xf32>
    %767 = arith.cmpf olt, %539, %766 : vector<1x256xf32>
    %cst_275 = arith.constant 1.000000e+00 : f32
    %768 = vector.broadcast %cst_275 : f32 to vector<1x256xf32>
    %769 = arith.addf %544, %768 : vector<1x256xf32>
    %cst_276 = arith.constant 0.000000e+00 : f32
    %770 = vector.broadcast %cst_276 : f32 to vector<1x256xf32>
    %771 = arith.cmpf oge, %769, %770 : vector<1x256xf32>
    %772 = arith.andi %767, %771 : vector<1x256xi1>
    %cst_277 = arith.constant 1.000000e+00 : f32
    %773 = vector.broadcast %cst_277 : f32 to vector<1x256xf32>
    %774 = arith.addf %544, %773 : vector<1x256xf32>
    %cst_278 = arith.constant 1.400000e+01 : f32
    %775 = vector.broadcast %cst_278 : f32 to vector<1x256xf32>
    %776 = arith.cmpf olt, %774, %775 : vector<1x256xf32>
    %777 = arith.andi %772, %776 : vector<1x256xi1>
    %cst_279 = arith.constant 0.000000e+00 : f32
    %778 = vector.broadcast %cst_279 : f32 to vector<1x256xf32>
    %779 = arith.addf %547, %778 : vector<1x256xf32>
    %cst_280 = arith.constant 0.000000e+00 : f32
    %780 = vector.broadcast %cst_280 : f32 to vector<1x256xf32>
    %781 = arith.cmpf oge, %779, %780 : vector<1x256xf32>
    %782 = arith.andi %777, %781 : vector<1x256xi1>
    %cst_281 = arith.constant 0.000000e+00 : f32
    %783 = vector.broadcast %cst_281 : f32 to vector<1x256xf32>
    %784 = arith.addf %547, %783 : vector<1x256xf32>
    %cst_282 = arith.constant 1.400000e+01 : f32
    %785 = vector.broadcast %cst_282 : f32 to vector<1x256xf32>
    %786 = arith.cmpf olt, %784, %785 : vector<1x256xf32>
    %787 = arith.andi %782, %786 : vector<1x256xi1>
    %c768 = arith.constant 768 : index
    %c0_283 = arith.constant 0 : index
    %788 = vector.load %arg5[%c768, %c0_283] : memref<800x1xf32, #tpu.memory_space<vmem>>, vector<16x1xf32>
    %cst_284 = arith.constant 0.000000e+00 : f32
    %789 = vector.shape_cast %787 : vector<1x256xi1> to vector<1x256xi1>
    %790 = vector.broadcast %789 : vector<1x256xi1> to vector<16x256xi1>
    %791 = vector.broadcast %cst_284 : f32 to vector<16x256xf32>
    %792 = arith.select %790, %765, %791 : vector<16x256xi1>, vector<16x256xf32>
    %793 = vector.broadcast %788 : vector<16x1xf32> to vector<16x256xf32>
    %794 = arith.mulf %792, %793 : vector<16x256xf32>
    %795 = arith.addf %764, %794 : vector<16x256xf32>
    %c241_i32 = arith.constant 241 : i32
    %796 = tpu.dynamic_rotate %534 by %c241_i32 dim 1 : vector<16x256xf32>, i32 -> vector<16x256xf32>
    %cst_285 = arith.constant 1.960000e+02 : f32
    %797 = vector.broadcast %cst_285 : f32 to vector<1x256xf32>
    %798 = arith.cmpf olt, %539, %797 : vector<1x256xf32>
    %cst_286 = arith.constant 1.000000e+00 : f32
    %799 = vector.broadcast %cst_286 : f32 to vector<1x256xf32>
    %800 = arith.addf %544, %799 : vector<1x256xf32>
    %cst_287 = arith.constant 0.000000e+00 : f32
    %801 = vector.broadcast %cst_287 : f32 to vector<1x256xf32>
    %802 = arith.cmpf oge, %800, %801 : vector<1x256xf32>
    %803 = arith.andi %798, %802 : vector<1x256xi1>
    %cst_288 = arith.constant 1.000000e+00 : f32
    %804 = vector.broadcast %cst_288 : f32 to vector<1x256xf32>
    %805 = arith.addf %544, %804 : vector<1x256xf32>
    %cst_289 = arith.constant 1.400000e+01 : f32
    %806 = vector.broadcast %cst_289 : f32 to vector<1x256xf32>
    %807 = arith.cmpf olt, %805, %806 : vector<1x256xf32>
    %808 = arith.andi %803, %807 : vector<1x256xi1>
    %cst_290 = arith.constant 1.000000e+00 : f32
    %809 = vector.broadcast %cst_290 : f32 to vector<1x256xf32>
    %810 = arith.addf %547, %809 : vector<1x256xf32>
    %cst_291 = arith.constant 0.000000e+00 : f32
    %811 = vector.broadcast %cst_291 : f32 to vector<1x256xf32>
    %812 = arith.cmpf oge, %810, %811 : vector<1x256xf32>
    %813 = arith.andi %808, %812 : vector<1x256xi1>
    %cst_292 = arith.constant 1.000000e+00 : f32
    %814 = vector.broadcast %cst_292 : f32 to vector<1x256xf32>
    %815 = arith.addf %547, %814 : vector<1x256xf32>
    %cst_293 = arith.constant 1.400000e+01 : f32
    %816 = vector.broadcast %cst_293 : f32 to vector<1x256xf32>
    %817 = arith.cmpf olt, %815, %816 : vector<1x256xf32>
    %818 = arith.andi %813, %817 : vector<1x256xi1>
    %c784 = arith.constant 784 : index
    %c0_294 = arith.constant 0 : index
    %819 = vector.load %arg5[%c784, %c0_294] : memref<800x1xf32, #tpu.memory_space<vmem>>, vector<16x1xf32>
    %cst_295 = arith.constant 0.000000e+00 : f32
    %820 = vector.shape_cast %818 : vector<1x256xi1> to vector<1x256xi1>
    %821 = vector.broadcast %820 : vector<1x256xi1> to vector<16x256xi1>
    %822 = vector.broadcast %cst_295 : f32 to vector<16x256xf32>
    %823 = arith.select %821, %796, %822 : vector<16x256xi1>, vector<16x256xf32>
    %824 = vector.broadcast %819 : vector<16x1xf32> to vector<16x256xf32>
    %825 = arith.mulf %823, %824 : vector<16x256xf32>
    %826 = arith.addf %795, %825 : vector<16x256xf32>
    %827 = arith.addf %537, %826 : vector<16x256xf32>
    %828 = arith.truncf %827 : vector<16x256xf32> to vector<16x256xbf16>
    %829 = arith.truncf %533 : vector<16x256xf32> to vector<16x256xbf16>
    %cst_296 = arith.constant dense<0.000000e+00> : vector<16x16xf32>
    %830 = tpu.matmul %828, %829, %cst_296 {dimension_numbers = #tpu.dot_dimension_numbers<[1], [1], [0], [0], [0, 0, 1, 0], [], []>} : vector<16x256xbf16>, vector<16x256xbf16>, vector<16x16xf32> -> vector<16x16xf32>
    %831 = arith.truncf %830 : vector<16x16xf32> to vector<16x16xbf16>
    %cst_297 = arith.constant dense<0.000000e+00> : vector<16x256xf32>
    %832 = tpu.matmul %831, %509, %cst_297 {dimension_numbers = #tpu.dot_dimension_numbers<[1], [0], [0], [1], [0, 0, 1, 1], [], []>} : vector<16x16xbf16>, vector<16x256xbf16>, vector<16x256xf32> -> vector<16x256xf32>
    %833 = tpu.concatenate %447, %832 in 0 : vector<16x256xf32>, vector<16x256xf32> -> vector<32x256xf32>
    %834 = arith.truncf %833 : vector<32x256xf32> to vector<32x256xbf16>
    %c224_298 = arith.constant 224 : index
    %c0_299 = arith.constant 0 : index
    %835 = vector.load %arg3[%c224_298, %c0_299] : memref<256x32xbf16, #tpu.memory_space<vmem>>, vector<32x32xbf16>
    %cst_300 = arith.constant dense<0.000000e+00> : vector<32x256xf32>
    %836 = tpu.matmul %835, %834, %cst_300 {dimension_numbers = #tpu.dot_dimension_numbers<[1], [0], [0], [1], [0, 0, 1, 1], [], []>} : vector<32x32xbf16>, vector<32x256xbf16>, vector<32x256xf32> -> vector<32x256xf32>
    %c416 = arith.constant 416 : index
    %c0_301 = arith.constant 0 : index
    %837 = vector.load %arg5[%c416, %c0_301] : memref<800x1xf32, #tpu.memory_space<vmem>>, vector<32x1xf32>
    %838 = vector.broadcast %837 : vector<32x1xf32> to vector<32x256xf32>
    %839 = arith.addf %836, %838 : vector<32x256xf32>
    %c0_302 = arith.constant 0 : index
    %c0_303 = arith.constant 0 : index
    %c0_304 = arith.constant 0 : index
    %840 = vector.load %arg6[%c0_302, %c0_303, %c0_304] : memref<1x32x256xf32, #tpu.memory_space<vmem>>, vector<1x32x256xf32>
    %841 = vector.shape_cast %840 : vector<1x32x256xf32> to vector<32x256xf32>
    %c480 = arith.constant 480 : index
    %c0_305 = arith.constant 0 : index
    %842 = vector.load %arg5[%c480, %c0_305] : memref<800x1xf32, #tpu.memory_space<vmem>>, vector<32x1xf32>
    %843 = vector.broadcast %842 : vector<32x1xf32> to vector<32x256xf32>
    %844 = arith.mulf %843, %839 : vector<32x256xf32>
    %845 = arith.addf %841, %844 : vector<32x256xf32>
    %c0_306 = arith.constant 0 : index
    %c0_307 = arith.constant 0 : index
    %c0_308 = arith.constant 0 : index
    %846 = vector.load %arg6[%c0_306, %c0_307, %c0_308] : memref<1x32x256xf32, #tpu.memory_space<vmem>>, vector<1x32x256xf32>
    %847 = vector.shape_cast %846 : vector<1x32x256xf32> to vector<32x256xf32>
    %848 = vector.shape_cast %845 : vector<32x256xf32> to vector<1x32x256xf32>
    tpu.vector_store %arg6[%c0_306, %c0_307, %c0_308], %848 {strides = array<i32>} : memref<1x32x256xf32, #tpu.memory_space<vmem>>, vector<1x32x256xf32>,
    return
  }
  func.func @transform_0(%arg0: i32) -> (i32, i32, i32) {
    %c0_i32 = arith.constant 0 : i32
    %c0_i32_0 = arith.constant 0 : i32
    %c0_i32_1 = arith.constant 0 : i32
    return %arg0, %c0_i32, %c0_i32_0 : i32, i32, i32
  }
  func.func @transform_1(%arg0: i32) -> (i32, i32, i32) {
    %c0_i32 = arith.constant 0 : i32
    %c0_i32_0 = arith.constant 0 : i32
    %c0_i32_1 = arith.constant 0 : i32
    return %arg0, %c0_i32, %c0_i32_0 : i32, i32, i32
  }
  func.func @transform_2(%arg0: i32) -> (i32, i32) {
    %c0_i32 = arith.constant 0 : i32
    %c0_i32_0 = arith.constant 0 : i32
    %c0_i32_1 = arith.constant 0 : i32
    return %c0_i32, %c0_i32_0 : i32, i32
  }
  func.func @transform_3(%arg0: i32) -> (i32, i32) {
    %c0_i32 = arith.constant 0 : i32
    %c0_i32_0 = arith.constant 0 : i32
    %c0_i32_1 = arith.constant 0 : i32
    return %c0_i32, %c0_i32_0 : i32, i32
  }
  func.func @transform_4(%arg0: i32) -> (i32, i32) {
    %c0_i32 = arith.constant 0 : i32
    %c0_i32_0 = arith.constant 0 : i32
    %c0_i32_1 = arith.constant 0 : i32
    return %c0_i32, %c0_i32_0 : i32, i32
  }
  func.func @transform_5(%arg0: i32) -> (i32, i32, i32) {
    %c0_i32 = arith.constant 0 : i32
    %c0_i32_0 = arith.constant 0 : i32
    %c0_i32_1 = arith.constant 0 : i32
    return %arg0, %c0_i32, %c0_i32_0 : i32, i32, i32
  }
}

</mosaic_0001>

<bundles_post_ra>
// kernel: me_attention_forward.1
= control target key start
LH: loop header
LB: loop body
LE: loop exit
PB: predicated region body
PF: predicated region fallthrough
CT: control target
= control target key end

     0   :  { %s3415_s18 = smov 0   ;;  %s5477_s0 = inlined_call_operand.vmem [shape: bf16[2,32,256], index: 0, kind: input, shape index: {}]   ;;  %s5478_s1 = inlined_call_operand.vmem [shape: bf16[2,128,128], index: 1, kind: input, shape index: {}]   ;;  %s5479_s2 = inlined_call_operand.vmem [shape: bf16[256,32], index: 2, kind: input, shape index: {}]   ;;  %s5480_s3 = inlined_call_operand.vmem [shape: bf16[32,128], index: 3, kind: input, shape index: {}]   ;;  %s5481_s4 = inlined_call_operand.vmem [shape: f32[800,1], index: 4, kind: input, shape index: {}]   ;;  %s5482_s5 = inlined_call_operand.vmem [shape: f32[2,32,256], index: 5, kind: output, shape index: {}]  }
   0x1 LB: > { %s3067_s19 = sadd.s32 4294967295, %s3366_s18   ;;  %p3071_p0 = scmp.ge.s32.totalorder %s3366_s18, 1  ;;  %s3366_s18 = sphi %s3415_s18, %s15_s18  }
   0x2   : > { %p197_p1 = scmp.lt.s32.totalorder %s3366_s18, 3 }
   0x4   : > { %p198_p2 = pnand %p3071_p0, %p197_p1 }
   0x6   : > { %201 = sbr.rel (%p198_p2) target bundleno = 2861 (0xb2d), region = 40 }
   0xd   : > { %p230_p3 = scmp.lt.s32.totalorder %s3067_s19, 1  ;;  %v5489_v0 = vmov 0   ;;  %v275_v1 = vld [vmem:[%s5481_s4 + $0x20] sm:$0xff]  ;;  %v276_v2 = vld [vmem:[%s5481_s4 + $0x28] sm:$0xff]  ;;  %v277_v3 = vld [vmem:[%s5481_s4 + $0x30] sm:$0xff]  ;;  %vm5484_vm0 = vcmask 261120  }
   0xe   : > { %484 = vmatprep.mubr.bf16.mxu0 %v5489_v0  ;;  %3208 = vset.pattern.permute.xlu0 %v5489_v0  ;;  %v278_v4 = vld [vmem:[%s5481_s4 + $0x38] sm:$0xff]  ;;  %v3216_v9 = vld [vmem:[%s5479_s2] sm:$0xff]   ;;  %v3217_v10 = vld [vmem:[%s5479_s2 + $0x8] sm:$0xff]   ;;  %s3369_s25 = smov 8   ;;  %s3370_s26 = smov 7   ;;  %vm3378_vm15 = vmmov 0  }
   0xf   : > { %s5717_s19 = smov (!%p230_p3, %s3067_s19), 1  ;;  %3209 = vset.pattern.permute.xlu1 %v5489_v0  ;;  %309 = vperm.xlu0 %3208, %v275_v1   ;;  %v3218_v11 = vld [vmem:[%s5479_s2 + $0x10] sm:$0xff]   ;;  %v3219_v12 = vld [vmem:[%s5479_s2 + $0x18] sm:$0xff]   ;;  %v3220_v13 = vld [vmem:[%s5479_s2 + $0x20] sm:$0xff]   ;;  %s3372_s6 = smov 1  }
  0x10   : > { %s3130_s20 = sshll.u32 %s5717_s19, 5  ;;  %s3131_s28 = sshll.u32 %s5717_s19, 6  ;;  %319 = vperm.xlu1 %3209, %v277_v3   ;;  %v3223_v16 = vld [vmem:[%s5479_s2 + $0x28] sm:$0xff]   ;;  %v3226_v18 = vld [vmem:[%s5479_s2 + $0x30] sm:$0xff]   ;;  %v3229_v21 = vld [vmem:[%s5479_s2 + $0x38] sm:$0xff]   ;;  %v250_v3 = vlaneseq }
  0x11   : > { %s234_s27 = scalar_lea.vmem %s5477_s0, %s3130_s20  ;;  %s3450_s10 = scalar_lea.vmem %s5478_s1, %s3131_s28  ;;  %v3232_v22 = vld [vmem:[%s5480_s3] sm:$0xff]   ;;  %v3233_v26 = vld [vmem:[%s5480_s3 + $0x8] sm:$0xff]  }
  0x12   : > { %v3210_v5 = vld [vmem:[%s234_s27 + $0x4] ss:$8 sps:$4 sm:$0xff]   ;;  %v3212_v6 = vld [vmem:[%s234_s27] ss:$8 sps:$4 sm:$0xff]   ;;  %v3213_v7 = vld [vmem:[%s234_s27 + $0x14] ss:$8 sps:$4 sm:$0xff]  }
  0x13   : > { %452 = vmatprep.subr.bf16.mxu0 %v3210_v5  ;;  %v3215_v8 = vld [vmem:[%s234_s27 + $0x10] ss:$8 sps:$4 sm:$0xff]   ;;  %314 = vperm.xlu0 %3208, %v276_v2   ;;  %v3221_v14 = vld [vmem:[%s3450_s10] sm:$0xff]   ;;  %v3222_v15 = vld [vmem:[%s3450_s10 + $0x8] sm:$0xff]   ;;  %s3371_s27 = smov 6   ;;  %s3373_s15 = smov 127  }
  0x14   : > { %453 = vmatpush1.bf16.msra.mxu0 %v3212_v6  ;;  %324 = vperm.xlu1 %3209, %v278_v4   ;;  %v3224_v17 = vld [vmem:[%s3450_s10 + $0x10] sm:$0xff]   ;;  %v3225_v19 = vld [vmem:[%s3450_s10 + $0x18] sm:$0xff]   ;;  %v3227_v20 = vld [vmem:[%s3450_s10 + $0x20] sm:$0xff]   ;;  %s3376_s29 = smov 120   ;;  %s3379_s21 = smov 15  }
  0x15   : > { %454 = vmatprep.subr.bf16.mxu0 %v3213_v7  ;;  %v3228_v23 = vld [vmem:[%s3450_s10 + $0x28] sm:$0xff]   ;;  %v3230_v24 = vld [vmem:[%s3450_s10 + $0x30] sm:$0xff]   ;;  %v3231_v25 = vld [vmem:[%s3450_s10 + $0x38] sm:$0xff]   ;;  %s3380_s22 = smov 14   ;;  %s3381_s23 = smov 13  }
  0x16   : > { %v279_v59 = vld [vmem:[%s5481_s4 + $0x40] sm:$0xff]  ;;  %s3382_s24 = smov 115  }
  0x18   : > { %455 = vmatpush1.bf16.msra.mxu0 %v3215_v8 }
  0x19   : > { %3149 = vmatprep.subr.bf16.mxu0 %v3221_v14 }
  0x1b   : > { %3090 = vmatmul.mubr.msk.bf16.vlgmr.msra.gmra.mrb[0].mxu0 %vm5484_vm0, %v3216_v9 }
  0x1c   : > { %494 = vmatprep.mubr.bf16.mxu0 %v5489_v0  ;;  %3150 = vmatpush3.bf16.msra.mxu0 %v3221_v14 }
  0x1d   : > { %3151 = vmatprep.subr.bf16.mxu0 %v3222_v15 }
  0x20   : > { %3152 = vmatpush3.bf16.msra.mxu0 %v3222_v15 }
  0x21   : > { %3153 = vmatprep.subr.bf16.mxu0 %v3224_v17 }
  0x23   : > { %3091 = vmatmul.mubr.msk.bf16.gmra.mrb[4].mxu0 %vm5484_vm0, %v3217_v10  ;;  %v3529_v10 = vand.u32 127, %v250_v3 }
  0x24   : > { %504 = vmatprep.mubr.bf16.mxu0 %v5489_v0  ;;  %3154 = vmatpush3.bf16.msra.mxu0 %v3224_v17 }
  0x25   : > { %3155 = vmatprep.subr.bf16.mxu0 %v3225_v19  ;;  %v3532_v14 = vadd.s32 128, %v3529_v10  ;;  %vm1318_vm14 = vcmp.lt.s32.totalorder %v3529_v10, 49 }
  0x27   : > { %vm5483_vm1 = vcmp.lt.s32.totalorder %v3532_v14, 196 }
  0x28   : > { %3156 = vmatpush3.bf16.msra.mxu0 %v3225_v19 }
  0x29   : > { %3157 = vmatprep.subr.bf16.mxu0 %v3227_v20 }
  0x2b   : > { %3092 = vmatmul.mubr.msk.bf16.gmra.mrb[8].mxu0 %vm5484_vm0, %v3218_v11 }
  0x2c   : > { %514 = vmatprep.mubr.bf16.mxu0 %v5489_v0  ;;  %3158 = vmatpush3.bf16.msra.mxu0 %v3227_v20 }
  0x2d   : > { %3159 = vmatprep.subr.bf16.mxu0 %v3228_v23 }
  0x30   : > { %3160 = vmatpush3.bf16.msra.mxu0 %v3228_v23 }
  0x31   : > { %3161 = vmatprep.subr.bf16.mxu0 %v3230_v24 }
  0x33   : > { %3093 = vmatmul.mubr.msk.bf16.gmra.mrb[12].mxu0 %vm5484_vm0, %v3219_v12 }
  0x34   : > { %524 = vmatprep.mubr.bf16.mxu0 %v5489_v0  ;;  %3162 = vmatpush3.bf16.msra.mxu0 %v3230_v24 }
  0x35   : > { %3163 = vmatprep.subr.bf16.mxu0 %v3231_v25 }
  0x38   : > { %3164 = vmatpush3.bf16.msra.mxu0 %v3231_v25 }
  0x3b   : > { %3094 = vmatmul.mubr.msk.bf16.gmra.mrb[16].mxu0 %vm5484_vm0, %v3220_v13 }
  0x3c   : > { %534 = vmatprep.mubr.bf16.mxu0 %v5489_v0 }
  0x43   : > { %3095 = vmatmul.mubr.msk.bf16.gmra.mrb[20].mxu0 %vm5484_vm0, %v3223_v16 }
  0x44   : > { %544 = vmatprep.mubr.bf16.mxu0 %v5489_v0 }
  0x4b   : > { %3096 = vmatmul.mubr.msk.bf16.gmra.mrb[24].mxu0 %vm5484_vm0, %v3226_v18 }
  0x4c   : > { %554 = vmatprep.mubr.bf16.mxu0 %v5489_v0 }
  0x53   : > { %3097 = vmatmul.mubr.msk.bf16.gmra.mrb[28].mxu0 %vm5484_vm0, %v3229_v21 }
  0x54   : > { %3165 = vmatprep.mubr.bf16.mxu0 %v3232_v22 }
  0x5b   : > { %3166 = vmatmul.mubr.bf16.vlgmr.msra.gmra.mrb[32].mxu0 %v3233_v26 }
  0x5c   : > { %1793 = vmatprep.mubr.bf16.mxu0 %v5489_v0 }
  0x8e   : > { %v310_v34 = vpop.permute.xlu0 %309 }
  0x8f   : > { %v320_v44 = vpop.permute.xlu1 %319 }
  0x92   : > { %v315_v37 = vpop.permute.xlu0 %314 }
  0x93   : > { %v325_v50 = vpop.permute.xlu1 %324 }
  0xee   : > { %v3506_v27 = vpop.f32.mrb[0].mxu0 }
  0xef   : > { %v3508_v28 = vpop.f32.mrb[1].mxu0 }
  0xf0   : > { %v3510_v29 = vpop.f32.mrb[2].mxu0 }
  0xf1   : > { %v3512_v30 = vpop.f32.mrb[3].mxu0 }
  0xf6   : > { %v3514_v31 = vpop.f32.mrb[4].mxu0 }
  0xf7   : > { %v3516_v32 = vpop.f32.mrb[5].mxu0 }
  0xf8   : > { %v3518_v33 = vpop.f32.mrb[6].mxu0 }
  0xf9   : > { %v3520_v35 = vpop.f32.mrb[7].mxu0 }
  0xfe   : > { %v506_v36 = vpop.f32.mrb[8].mxu0 }
  0xff   : > { %v507_v38 = vadd.f32 %v506_v36, %v310_v34  ;;  %v508_v39 = vpop.f32.mrb[9].mxu0 }
 0x100   : > { %v509_v40 = vadd.f32 %v508_v39, %v310_v34  ;;  %v510_v41 = vpop.f32.mrb[10].mxu0 }
 0x101   : > { %v511_v42 = vadd.f32 %v510_v41, %v315_v37  ;;  %v512_v43 = vpop.f32.mrb[11].mxu0 }
 0x102   : > { %v513_v45 = vadd.f32 %v512_v43, %v315_v37  ;;  %v639_v46 = vmax.f32 %v507_v38, %v509_v40 }
 0x104   : > { %640 = vmax.xlane.f32.xlu0 %v639_v46  ;;  %v642_v47 = vmax.f32 %v511_v42, %v513_v45  ;;  %v281_v46 = vld [vmem:[%s5481_s4 + $0x50] sm:$0xff] }
 0x106   : > { %v516_v48 = vpop.f32.mrb[12].mxu0  ;;  %643 = vmax.xlane.f32.xlu1 %v642_v47 }
 0x107   : > { %v517_v49 = vadd.f32 %v516_v48, %v320_v44  ;;  %v518_v51 = vpop.f32.mrb[13].mxu0 }
 0x108   : > { %v519_v52 = vadd.f32 %v518_v51, %v320_v44  ;;  %v520_v53 = vpop.f32.mrb[14].mxu0  ;;  %v282_v51 = vld [vmem:[%s5481_s4 + $0x58] sm:$0xff] }
 0x109   : > { %v522_v54 = vpop.f32.mrb[15].mxu0  ;;  %v521_v55 = vadd.f32 %v520_v53, %v325_v50 }
 0x10a   : > { %v523_v56 = vadd.f32 %v522_v54, %v325_v50  ;;  %v645_v57 = vmax.f32 %v517_v49, %v519_v52  ;;  %v272_v54 = vld [vmem:[%s5481_s4 + $0x8] sm:$0xff] }
 0x10c   : > { %646 = vmax.xlane.f32.xlu0 %v645_v57  ;;  %v648_v58 = vmax.f32 %v521_v55, %v523_v56 }
 0x10e   : > { %v3525_v60 = vpop.f32.mrb[16].mxu0 }
 0x10f   : > { %v3527_v61 = vpop.f32.mrb[17].mxu0 }
 0x110   : > { %649 = vmax.xlane.f32.xlu0 %v648_v58  ;;  %v3570_v47 = vpop.f32.mrb[18].mxu0 }
 0x111   : > { %v3572_v48 = vpop.f32.mrb[19].mxu0 }
 0x117   : > { %329 = vperm.xlu1 %3209, %v279_v59  }
 0x191   : > { %v641_v62 = vpop.xlane.xlu0 %640 }
 0x192   : > { %v651_v63 = vsub.f32 %v507_v38, %v641_v62  ;;  %v652_v1 = vsub.f32 %v509_v40, %v641_v62  ;;  %v274_v62 = vld [vmem:[%s5481_s4 + $0x18] sm:$0xff] }
 0x193   : > { %v644_v2 = vpop.xlane.xlu1 %643 }
 0x194   : > { %v659_v4 = vmul.f32 1.442695, %v651_v63  ;;  %v661_v5 = vmul.f32 1.442695, %v652_v1  ;;  %v653_v6 = vsub.f32 %v511_v42, %v644_v2  ;;  %v654_v7 = vsub.f32 %v513_v45, %v644_v2  ;;  %v271_v1 = vld [vmem:[%s5481_s4] sm:$0xff] }
 0x196   : > { %3242 = vpow2.f32 %v659_v4  ;;  %v663_v8 = vmul.f32 1.442695, %v653_v6  ;;  %v665_v9 = vmul.f32 1.442695, %v654_v7  ;;  %v273_v7 = vld [vmem:[%s5481_s4 + $0x10] sm:$0xff] }
 0x197   : > { %3244 = vpow2.f32 %v661_v5  ;;  %v991_v5 = vld [vmem:[%s5481_s4 + $0xa8] sm:$0xff] }
 0x198   : > { %3246 = vpow2.f32 %v663_v8 }
 0x199   : > { %3248 = vpow2.f32 %v665_v9  ;;  %v647_v11 = vpop.xlane.xlu0 %646 }
 0x19a   : > { %v655_v12 = vsub.f32 %v517_v49, %v647_v11  ;;  %v656_v13 = vsub.f32 %v519_v52, %v647_v11  ;;  %v3574_v49 = vpop.f32.mrb[20].mxu0 }
 0x19b   : > { %v3576_v50 = vpop.f32.mrb[21].mxu0 }
 0x19c   : > { %v667_v15 = vmul.f32 1.442695, %v655_v12  ;;  %v669_v16 = vmul.f32 1.442695, %v656_v13  ;;  %v3581_v52 = vpop.f32.mrb[22].mxu0  ;;  %v993_v12 = vld [vmem:[%s5481_s4 + $0xb8] sm:$0xff] }
 0x19d   : > { %v650_v17 = vpop.xlane.xlu0 %649  ;;  %v3583_v53 = vpop.f32.mrb[23].mxu0  ;;  %v990_v13 = vld [vmem:[%s5481_s4 + $0xa0] sm:$0xff] }
 0x19e   : > { %3250 = vpow2.f32 %v667_v15  ;;  %v657_v18 = vsub.f32 %v521_v55, %v650_v17  ;;  %v658_v19 = vsub.f32 %v523_v56, %v650_v17  ;;  %v3588_v55 = vpop.f32.mrb[24].mxu0  ;;  %v280_v56 = vld [vmem:[%s5481_s4 + $0x48] sm:$0xff] }
 0x19f   : > { %3252 = vpow2.f32 %v669_v16  ;;  %v3593_v57 = vpop.f32.mrb[25].mxu0  ;;  %v1124_v15 = vld [vmem:[%s5481_s4 + $0xc8] sm:$0xff]  ;;  %v992_v16 = vld [vmem:[%s5481_s4 + $0xb0] sm:$0xff] }
 0x1a0   : > { %v3535_v20 = vpop.eup %3242  ;;  %v671_v21 = vmul.f32 1.442695, %v657_v18  ;;  %v673_v22 = vmul.f32 1.442695, %v658_v19  ;;  %v3595_v58 = vpop.f32.mrb[26].mxu0  ;;  %v1128_v17 = vld [vmem:[%s5481_s4 + $0xe8] sm:$0xff] }
 0x1a1   : > { %v3245_v23 = vpop.eup %3244  ;;  %v3597_v59 = vpop.f32.mrb[27].mxu0  ;;  %v1123_v18 = vld [vmem:[%s5481_s4 + $0xc0] sm:$0xff]  ;;  %v1126_v19 = vld [vmem:[%s5481_s4 + $0xd8] sm:$0xff] }
 0x1a2   : > { %v3537_v24 = vpop.eup %3246  ;;  %3254 = vpow2.f32 %v671_v21  ;;  %v3541_v25 = vsel %vm5483_vm1, %v3245_v23, 0.0  ;;  %v3602_v63 = vpop.f32.mrb[28].mxu0  ;;  %v1127_v21 = vld [vmem:[%s5481_s4 + $0xe0] sm:$0xff]  ;;  %v1125_v23 = vld [vmem:[%s5481_s4 + $0xd0] sm:$0xff] }
 0x1a3   : > { %v3249_v26 = vpop.eup %3248  ;;  %3256 = vpow2.f32 %v673_v22  ;;  %v687_v34 = vadd.f32 %v3535_v20, %v3541_v25  ;;  %v3607_v2 = vpop.f32.mrb[29].mxu0  ;;  %v1130_v22 = vld [vmem:[%s5481_s4 + $0xf8] sm:$0xff] }
 0x1a4   : > { %v3547_v36 = vsel %vm5483_vm1, %v3249_v26, 0.0  ;;  %v3609_v3 = vpop.f32.mrb[30].mxu0  ;;  %v1326_v26 = vld [vmem:[%s5481_s4 + $0x148] sm:$0xff] }
 0x1a5   : > { %688 = vadd.xlane.f32.xlu1 %v687_v34  ;;  %v690_v37 = vadd.f32 %v3537_v24, %v3547_v36  ;;  %v3611_v4 = vpop.f32.mrb[31].mxu0  ;;  %v1129_v34 = vld [vmem:[%s5481_s4 + $0xf0] sm:$0xff] }
 0x1a6   : > { %v3616_v6 = vpop.f32.mrb[32].mxu0 }
 0x1a7   : > { %691 = vadd.xlane.f32.xlu0 %v690_v37  ;;  %v3621_v8 = vpop.f32.mrb[33].mxu0  ;;  %v284_v37 = vld [vmem:[%s5481_s4 + $0x68] sm:$0xff] }
 0x1a8   : > { %v3551_v38 = vpop.eup %3250  ;;  %v3623_v9 = vpop.f32.mrb[34].mxu0 }
 0x1a9   : > { %v3253_v39 = vpop.eup %3252  ;;  %v3625_v11 = vpop.f32.mrb[35].mxu0 }
 0x1aa   : > { %v3555_v40 = vsel %vm5483_vm1, %v3253_v39, 0.0  ;;  %v1325_v39 = vld [vmem:[%s5481_s4 + $0x140] sm:$0xff] }
 0x1ab   : > { %v693_v41 = vadd.f32 %v3551_v38, %v3555_v40 }
 0x1ac   : > { %v3559_v42 = vpop.eup %3254 }
 0x1ad   : > { %v3257_v43 = vpop.eup %3256  ;;  %694 = vadd.xlane.f32.xlu1 %v693_v41  ;;  %v286_v41 = vld [vmem:[%s5481_s4 + $0x78] sm:$0xff] }
 0x1ae   : > { %v3563_v44 = vsel %vm5483_vm1, %v3257_v43, 0.0  ;;  %v283_v43 = vld [vmem:[%s5481_s4 + $0x60] sm:$0xff] }
 0x1af   : > { %v696_v45 = vadd.f32 %v3559_v42, %v3563_v44 }
 0x1b1   : > { %697 = vadd.xlane.f32.xlu0 %v696_v45  ;;  %v1328_v45 = vld [vmem:[%s5481_s4 + $0x158] sm:$0xff] }
 0x1be   : > { %339 = vperm.xlu1 %3209, %v281_v46   ;;  %v285_v46 = vld [vmem:[%s5481_s4 + $0x70] sm:$0xff] }
 0x1c2   : > { %344 = vperm.xlu1 %3209, %v282_v51   ;;  %v1805_v51 = vld [vmem:[%s5481_s4 + $0x108] sm:$0xff] }
 0x1c6   : > { %294 = vperm.xlu1 %3209, %v272_v54   ;;  %v1327_v54 = vld [vmem:[%s5481_s4 + $0x150] sm:$0xff] }
 0x1c7   : > { %334 = vperm.xlu0 %3208, %v280_v56   ;;  %v1809_v56 = vld [vmem:[%s5481_s4 + $0x128] sm:$0xff] }
 0x1ca   : > { %304 = vperm.xlu1 %3209, %v274_v62   ;;  %v1804_v62 = vld [vmem:[%s5481_s4 + $0x100] sm:$0xff] }
 0x1cb   : > { %289 = vperm.xlu0 %3208, %v271_v1   ;;  %v1807_v1 = vld [vmem:[%s5481_s4 + $0x118] sm:$0xff] }
 0x1ce   : > { %1001 = vperm.xlu1 %3209, %v991_v5   ;;  %v1808_v5 = vld [vmem:[%s5481_s4 + $0x120] sm:$0xff] }
 0x1cf   : > { %299 = vperm.xlu0 %3208, %v273_v7   ;;  %v1811_v7 = vld [vmem:[%s5481_s4 + $0x138] sm:$0xff] }
 0x1d2   : > { %1011 = vperm.xlu1 %3209, %v993_v12   ;;  %v1806_v12 = vld [vmem:[%s5481_s4 + $0x110] sm:$0xff] }
 0x1d3   : > { %996 = vperm.xlu0 %3208, %v990_v13   ;;  %v1472_v13 = vld [vmem:[%s5481_s4 + $0x208] sm:$0xff] }
 0x1d6   : > { %1173 = vperm.xlu1 %3209, %v1124_v15   ;;  %v1810_v15 = vld [vmem:[%s5481_s4 + $0x130] sm:$0xff] }
 0x1d7   : > { %1006 = vperm.xlu0 %3208, %v992_v16   ;;  %v1501_v16 = vld [vmem:[%s5481_s4 + $0x218] sm:$0xff] }
 0x1da   : > { %1197 = vperm.xlu1 %3209, %v1128_v17   ;;  %v1471_v17 = vld [vmem:[%s5481_s4 + $0x200] sm:$0xff] }
 0x1db   : > { %1168 = vperm.xlu0 %3208, %v1123_v18   ;;  %v1530_v18 = vld [vmem:[%s5481_s4 + $0x228] sm:$0xff] }
 0x1de   : > { %1183 = vperm.xlu1 %3209, %v1126_v19   ;;  %v1500_v19 = vld [vmem:[%s5481_s4 + $0x210] sm:$0xff] }
 0x1df   : > { %1192 = vperm.xlu0 %3208, %v1127_v21   ;;  %v1561_v21 = vld [vmem:[%s5481_s4 + $0x238] sm:$0xff] }
 0x1e2   : > { %1207 = vperm.xlu1 %3209, %v1130_v22   ;;  %v1529_v22 = vld [vmem:[%s5481_s4 + $0x220] sm:$0xff] }
 0x1e3   : > { %1178 = vperm.xlu0 %3208, %v1125_v23   ;;  %v1583_v23 = vld [vmem:[%s5481_s4 + $0x248] sm:$0xff] }
 0x1e6   : > { %1336 = vperm.xlu1 %3209, %v1326_v26   ;;  %v1560_v26 = vld [vmem:[%s5481_s4 + $0x230] sm:$0xff] }
 0x1e7   : > { %1202 = vperm.xlu0 %3208, %v1129_v34   ;;  %v1609_v34 = vld [vmem:[%s5481_s4 + $0x258] sm:$0xff] }
 0x1ea   : > { %354 = vperm.xlu1 %3209, %v284_v37   ;;  %v1582_v37 = vld [vmem:[%s5481_s4 + $0x240] sm:$0xff] }
 0x1eb   : > { %1331 = vperm.xlu0 %3208, %v1325_v39   ;;  %v330_v39 = vpop.permute.xlu1 %329 }
 0x1ee   : > { %364 = vperm.xlu1 %3209, %v286_v41  }
 0x1ef   : > { %349 = vperm.xlu0 %3208, %v283_v43  }
 0x1f2   : > { %1346 = vperm.xlu1 %3209, %v1328_v45  }
 0x1f3   : > { %359 = vperm.xlu0 %3208, %v285_v46  }
 0x1f6   : > { %1887 = vperm.xlu1 %3209, %v1805_v51  }
 0x1f7   : > { %1341 = vperm.xlu0 %3208, %v1327_v54  }
 0x1fa   : > { %1915 = vperm.xlu1 %3209, %v1809_v56  }
 0x1fb   : > { %1882 = vperm.xlu0 %3208, %v1804_v62  }
 0x1fe   : > { %1897 = vperm.xlu1 %3209, %v1807_v1  }
 0x1ff   : > { %1910 = vperm.xlu0 %3208, %v1808_v5  }
 0x202   : > { %1925 = vperm.xlu1 %3209, %v1811_v7  }
 0x203   : > { %1892 = vperm.xlu0 %3208, %v1806_v12  }
 0x206   : > { %1484 = vperm.xlu1 %3209, %v1472_v13  }
 0x207   : > { %1920 = vperm.xlu0 %3208, %v1810_v15  }
 0x20a   : > { %1513 = vperm.xlu1 %3209, %v1501_v16  }
 0x20b   : > { %1479 = vperm.xlu0 %3208, %v1471_v17  }
 0x20e   : > { %1542 = vperm.xlu1 %3209, %v1530_v18  }
 0x20f   : > { %1508 = vperm.xlu0 %3208, %v1500_v19  }
 0x212   : > { %1573 = vperm.xlu1 %3209, %v1561_v21  }
 0x213   : > { %1537 = vperm.xlu0 %3208, %v1529_v22   ;;  %v527_v22 = vadd.f32 %v3525_v60, %v330_v39 }
 0x216   : > { %1595 = vperm.xlu1 %3209, %v1583_v23  }
 0x217   : > { %1568 = vperm.xlu0 %3208, %v1560_v26  }
 0x21a   : > { %1621 = vperm.xlu1 %3209, %v1609_v34  }
 0x21b   : > { %1590 = vperm.xlu0 %3208, %v1582_v37  }
 0x232   : > { %v689_v41 = vpop.xlane.xlu1 %688 }
 0x233   : > { %3258 = vrcp.f32 %v689_v41 }
 0x234   : > { %v692_v43 = vpop.xlane.xlu0 %691 }
 0x235   : > { %3260 = vrcp.f32 %v692_v43 }
 0x23a   : > { %v695_v45 = vpop.xlane.xlu1 %694 }
 0x23b   : > { %3262 = vrcp.f32 %v695_v45 }
 0x23d   : > { %v3259_v46 = vpop.eup %3258 }
 0x23e   : > { %v340_v51 = vpop.permute.xlu1 %339  ;;  %v698_v54 = vpop.xlane.xlu0 %697  ;;  %v704_v62 = vmul.f32 %v3259_v46, %v3541_v25  ;;  %v703_v5 = vmul.f32 %v3259_v46, %v3535_v20 }
 0x23f   : > { %v3261_v56 = vpop.eup %3260  ;;  %3264 = vrcp.f32 %v698_v54  ;;  %v3746_v16 = vadd.f32 %v3574_v49, %v340_v51  ;;  %v539_v17 = vadd.f32 %v3576_v50, %v340_v51  ;;  %v529_v50 = vadd.f32 %v3527_v61, %v330_v39 }
 0x240   : > { %v706_v1 = vmul.f32 %v3261_v56, %v3547_v36  ;;  %v705_v7 = vmul.f32 %v3261_v56, %v3537_v24 }
 0x242   : > { %v345_v12 = vpop.permute.xlu1 %344  ;;  %v716_v13 = vpack.c.bf16 %v706_v1, %v704_v62  ;;  %v715_v15 = vpack.c.bf16 %v705_v7, %v703_v5 }
 0x243   : > { %v3750_v18 = vadd.f32 %v3581_v52, %v345_v12  ;;  %v543_v19 = vadd.f32 %v3583_v53, %v345_v12 }
 0x244   : > { %719 = vmatprep.subr.bf16.mxu1 %v716_v13 }
 0x245   : > { %720 = vmatpush1.bf16.xpose.msra.mxu1 %v715_v15  ;;  %v714_v25 = vpack.c.bf16 %v543_v19, %v539_v17  ;;  %v713_v20 = vpack.c.bf16 %v3750_v18, %v3746_v16  ;;  %v3263_v21 = vpop.eup %3262 }
 0x246   : > { %v295_v24 = vpop.permute.xlu1 %294  ;;  %v335_v36 = vpop.permute.xlu0 %334  ;;  %v708_v41 = vmul.f32 %v3263_v21, %v3555_v40  ;;  %v707_v45 = vmul.f32 %v3263_v21, %v3551_v38 }
 0x247   : > { %v531_v49 = vadd.f32 %v3570_v47, %v335_v36  ;;  %v533_v52 = vadd.f32 %v3572_v48, %v335_v36  ;;  %v3764_v60 = vadd.f32 %v3510_v29, %v295_v24  ;;  %v3767_v61 = vadd.f32 %v3512_v30, %v295_v24 }
 0x249   : > { %v3265_v23 = vpop.eup %3264  ;;  %v712_v26 = vpack.c.bf16 %v533_v52, %v529_v50  ;;  %v711_v53 = vpack.c.bf16 %v531_v49, %v527_v22 }
 0x24a   : > { %v305_v34 = vpop.permute.xlu1 %304  ;;  %v290_v37 = vpop.permute.xlu0 %289  ;;  %v710_v43 = vmul.f32 %v3265_v23, %v3563_v44  ;;  %v709_v46 = vmul.f32 %v3265_v23, %v3559_v42 }
 0x24b   : > { %v3770_v47 = vadd.f32 %v3518_v33, %v305_v34  ;;  %v3773_v48 = vadd.f32 %v3520_v35, %v305_v34  ;;  %751 = vmatprep.mubr.bf16.mxu1 %v712_v26  ;;  %v487_v30 = vadd.f32 %v3506_v27, %v290_v37  ;;  %v489_v33 = vadd.f32 %v3508_v28, %v290_v37 }
 0x24c   : > { %v718_v40 = vpack.c.bf16 %v710_v43, %v708_v41  ;;  %v717_v39 = vpack.c.bf16 %v709_v46, %v707_v45 }
 0x24d   : > { %v566_v38 = vmax.f32 %v3764_v60, %v3770_v47  ;;  %v575_v42 = vmax.f32 %v3767_v61, %v3773_v48 }
 0x24e   : > { %v1002_v29 = vpop.permute.xlu1 %1001  ;;  %721 = vmatprep.subr.bf16.mxu1 %v718_v40  ;;  %v300_v44 = vpop.permute.xlu0 %299 }
 0x24f   : > { %v497_v51 = vadd.f32 %v3514_v31, %v300_v44  ;;  %v3783_v35 = vadd.f32 %v3516_v32, %v300_v44  ;;  %722 = vmatpush1.bf16.xpose.msra.mxu1 %v717_v39  ;;  %v3787_v5 = vadd.f32 %v3625_v11, %v1002_v29 }
 0x251   : > { %v565_v54 = vmax.f32 %v487_v30, %v497_v51  ;;  %v574_v56 = vmax.f32 %v489_v33, %v3783_v35 }
 0x252   : > { %v1012_v62 = vpop.permute.xlu1 %1011  ;;  %v997_v1 = vpop.permute.xlu0 %996 }
 0x253   : > { %v567_v7 = vmax.f32 %v565_v54, %v566_v38  ;;  %v576_v12 = vmax.f32 %v574_v56, %v575_v42  ;;  %v1109_v27 = vadd.f32 %v3621_v8, %v997_v1  ;;  %v1120_v21 = vadd.f32 %v3623_v9, %v1012_v62 }
 0x255   : > { %v568_v13 = vrot.slane %v567_v7, 4  ;;  %v577_v28 = vrot.slane %v576_v12, 4  ;;  %v1131_v31 = vadd.f32 %v3787_v5, %v1109_v27 }
 0x256   : > { %v3791_v15 = vpop.permute.xlu1 %1173  ;;  %752 = vmatmul.mubr.bf16.vlgmr.msra.gmra.mrb[0].mxu1 %v711_v53  ;;  %v1007_v32 = vpop.permute.xlu0 %1006 }
 0x257   : > { %v569_v17 = vmax.f32 %v567_v7, %v568_v13  ;;  %v578_v19 = vmax.f32 %v576_v12, %v577_v28  ;;  %v1117_v24 = vadd.f32 %v3616_v6, %v1007_v32  ;;  %759 = vmatprep.mubr.bf16.mxu1 %v714_v25 }
 0x259   : > { %v570_v36 = vrot.slane %v569_v17, 2  ;;  %v579_v11 = vrot.slane %v578_v19, 2  ;;  %v1132_v22 = vadd.f32 %v1131_v31, %v1117_v24 }
 0x25a   : > { %v3795_v49 = vpop.permute.xlu1 %1197  ;;  %v3797_v8 = vpop.permute.xlu0 %1168 }
 0x25b   : > { %v571_v50 = vmax.f32 %v569_v17, %v570_v36  ;;  %v580_v52 = vmax.f32 %v578_v19, %v579_v11  ;;  %v1133_v23 = vadd.f32 %v1132_v22, %v1120_v21 }
 0x25d   : > { %v572_v26 = vrot.slane %v571_v50, 1  ;;  %v581_v53 = vrot.slane %v580_v52, 1  ;;  %v1134_v34 = vrot.slane %v1133_v23, 4 }
 0x25e   : > { %v3799_v37 = vpop.permute.xlu1 %1183  ;;  %760 = vmatmul.mubr.bf16.gmra.mrb[4].mxu1 %v713_v20  ;;  %v3804_v6 = vpop.permute.xlu0 %1192 }
 0x25f   : > { %v573_v9 = vmax.f32 %v571_v50, %v572_v26  ;;  %v582_v25 = vmax.f32 %v580_v52, %v581_v53  ;;  %v1135_v41 = vadd.f32 %v1134_v34, %v1133_v23  ;;  %808 = vmatprep.mubr.bf16.mxu1 %v5489_v0 }
 0x261   : > { %v583_v43 = vsub.f32 %v487_v30, %v573_v9  ;;  %v585_v45 = vsub.f32 %v3764_v60, %v573_v9  ;;  %v587_v46 = vsub.f32 %v497_v51, %v573_v9  ;;  %v588_v40 = vsub.f32 %v3783_v35, %v582_v25 }
 0x262   : > { %v589_v39 = vsub.f32 %v3770_v47, %v573_v9  ;;  %v590_v38 = vsub.f32 %v3773_v48, %v582_v25  ;;  %v1136_v42 = vrot.slane %v1135_v41, 2  ;;  %v3811_v16 = vpop.permute.xlu1 %1207  ;;  %v3813_v18 = vpop.permute.xlu0 %1178  ;;  %v584_v20 = vsub.f32 %v489_v33, %v582_v25 }
 0x263   : > { %v591_v29 = vmul.f32 1.442695, %v583_v43  ;;  %v595_v44 = vmul.f32 1.442695, %v585_v45  ;;  %v586_v54 = vsub.f32 %v3767_v61, %v582_v25  ;;  %v599_v30 = vmul.f32 1.442695, %v587_v46 }
 0x264   : > { %v1137_v56 = vadd.f32 %v1136_v42, %v1135_v41  ;;  %v603_v60 = vmul.f32 1.442695, %v589_v39  ;;  %v593_v48 = vmul.f32 1.442695, %v584_v20  ;;  %v601_v7 = vmul.f32 1.442695, %v588_v40 }
 0x265   : > { %3266 = vpow2.f32 %v591_v29  ;;  %v597_v1 = vmul.f32 1.442695, %v586_v54  ;;  %v605_v17 = vmul.f32 1.442695, %v590_v38 }
 0x266   : > { %3268 = vpow2.f32 %v595_v44  ;;  %v1138_v51 = vrot.slane %v1137_v56, 1  ;;  %v3816_v35 = vpop.permute.xlu1 %1336  ;;  %v3818_v47 = vpop.permute.xlu0 %1202 }
 0x267   : > { %3270 = vpow2.f32 %v599_v30 }
 0x268   : > { %v1139_v62 = vadd.f32 %v1138_v51, %v1137_v56  ;;  %3272 = vpow2.f32 %v603_v60 }
 0x269   : > { %3274 = vpow2.f32 %v593_v48 }
 0x26a   : > { %v1141_v33 = vmul.f32 0.03125, %v1139_v62  ;;  %v3820_v12 = vpop.permute.xlu0 %1331  ;;  %v355_v61 = vpop.permute.xlu1 %354  ;;  %3276 = vpow2.f32 %v597_v1 }
 0x26b   : > { %3278 = vpow2.f32 %v601_v7 }
 0x26c   : > { %v3822_v13 = vsub.f32 %v1109_v27, %v1141_v33  ;;  %v3825_v28 = vsub.f32 %v3787_v5, %v1141_v33  ;;  %v3827_v31 = vsub.f32 %v1117_v24, %v1141_v33  ;;  %v3829_v32 = vsub.f32 %v1120_v21, %v1141_v33 }
 0x26d   : > { %v3838_v27 = vadd.f32 %v3595_v58, %v355_v61  ;;  %v3841_v5 = vadd.f32 %v3597_v59, %v355_v61  ;;  %3280 = vpow2.f32 %v605_v17 }
 0x26e   : > { %v1146_v19 = vmul.f32 %v3822_v13, %v3822_v13  ;;  %v1147_v36 = vmul.f32 %v3825_v28, %v3825_v28  ;;  %v350_v11 = vpop.permute.xlu0 %349  ;;  %v1148_v52 = vmul.f32 %v3827_v31, %v3827_v31  ;;  %v365_v26 = vpop.permute.xlu1 %364 }
 0x26f   : > { %v3835_v22 = vpop.eup %3266  ;;  %v3844_v24 = vadd.f32 %v3588_v55, %v350_v11  ;;  %v3847_v21 = vadd.f32 %v3593_v57, %v350_v11  ;;  %v1149_v57 = vmul.f32 %v3829_v32, %v3829_v32  ;;  %v561_v40 = vadd.f32 %v3609_v3, %v365_v26 }
 0x270   : > { %v3849_v50 = vpop.eup %3268  ;;  %v1150_v23 = vadd.f32 %v1147_v36, %v1146_v19  ;;  %v563_v42 = vadd.f32 %v3611_v4, %v365_v26 }
 0x271   : > { %v607_v58 = vadd.f32 %v3849_v50, %v3835_v22  ;;  %v1812_v59 = vadd.f32 %v3838_v27, %v3844_v24  ;;  %v1821_v55 = vadd.f32 %v3841_v5, %v3847_v21  ;;  %v3859_v53 = vpop.eup %3270 }
 0x272   : > { %v1151_v34 = vadd.f32 %v1150_v23, %v1148_v52  ;;  %v360_v9 = vpop.permute.xlu0 %359  ;;  %v3866_v45 = vpop.eup %3272 }
 0x273   : > { %v608_v25 = vadd.f32 %v3859_v53, %v607_v58  ;;  %v557_v41 = vadd.f32 %v3602_v63, %v360_v9  ;;  %v559_v43 = vadd.f32 %v3607_v2, %v360_v9  ;;  %v3869_v39 = vpop.eup %3274 }
 0x274   : > { %v1152_v46 = vadd.f32 %v1151_v34, %v1149_v57  ;;  %v3873_v54 = vpop.eup %3276 }
 0x275   : > { %v609_v38 = vadd.f32 %v3866_v45, %v608_v25  ;;  %v1813_v20 = vadd.f32 %v1812_v59, %v557_v41  ;;  %v1822_v29 = vadd.f32 %v1821_v55, %v559_v43  ;;  %v3875_v2 = vpop.eup %3278  ;;  %v616_v3 = vadd.f32 %v3873_v54, %v3869_v39 }
 0x276   : > { %v1153_v44 = vrot.slane %v1152_v46, 4 }
 0x277   : > { %v610_v30 = vrot.slane %v609_v38, 4  ;;  %v1814_v63 = vadd.f32 %v1813_v20, %v561_v40  ;;  %v1823_v56 = vadd.f32 %v1822_v29, %v563_v42  ;;  %v617_v4 = vadd.f32 %v3875_v2, %v616_v3  ;;  %v3880_v7 = vpop.eup %3280 }
 0x278   : > { %v1154_v60 = vadd.f32 %v1153_v44, %v1152_v46 }
 0x279   : > { %v611_v51 = vadd.f32 %v610_v30, %v609_v38  ;;  %v1815_v48 = vrot.slane %v1814_v63, 4  ;;  %v1824_v62 = vrot.slane %v1823_v56, 4  ;;  %v618_v36 = vadd.f32 %v3880_v7, %v617_v4 }
 0x27a   : > { %v1155_v1 = vrot.slane %v1154_v60, 2 }
 0x27b   : > { %v612_v33 = vrot.slane %v611_v51, 2  ;;  %v1816_v61 = vadd.f32 %v1815_v48, %v1814_v63  ;;  %v1825_v17 = vadd.f32 %v1824_v62, %v1823_v56  ;;  %v619_v26 = vrot.slane %v618_v36, 4 }
 0x27c   : > { %v1156_v19 = vadd.f32 %v1155_v1, %v1154_v60 }
 0x27d   : > { %v613_v11 = vadd.f32 %v612_v33, %v611_v51  ;;  %v1817_v52 = vrot.slane %v1816_v61, 2  ;;  %v1826_v23 = vrot.slane %v1825_v17, 2  ;;  %v620_v9 = vadd.f32 %v619_v26, %v618_v36 }
 0x27e   : > { %v1157_v58 = vrot.slane %v1156_v19, 1 }
 0x27f   : > { %v614_v59 = vrot.slane %v613_v11, 1  ;;  %v1818_v55 = vadd.f32 %v1817_v52, %v1816_v61  ;;  %v1827_v57 = vadd.f32 %v1826_v23, %v1825_v17  ;;  %v621_v29 = vrot.slane %v620_v9, 2 }
 0x280   : > { %v1158_v34 = vadd.f32 %v1157_v58, %v1156_v19 }
 0x281   : > { %v615_v25 = vadd.f32 %v614_v59, %v613_v11  ;;  %v1819_v46 = vrot.slane %v1818_v55, 1  ;;  %v1828_v38 = vrot.slane %v1827_v57, 1  ;;  %v622_v3 = vadd.f32 %v621_v29, %v620_v9 }
 0x282   : > { %v1159_v20 = vmul.f32 0.03125, %v1158_v34 }
 0x283   : > { %3282 = vrcp.f32 %v615_v25  ;;  %v1820_v44 = vadd.f32 %v1819_v46, %v1818_v55  ;;  %v1829_v30 = vadd.f32 %v1828_v38, %v1827_v57 }
 0x284   : > { %v1160_v63 = vadd.f32 1e-05, %v1159_v20 }
 0x285   : > { %v1830_v56 = vmul.f32 0.03125, %v1820_v44  ;;  %v1831_v60 = vmul.f32 0.03125, %v1829_v30 }
 0x286   : > { %3284 = vrsqrt.f32 %v1160_v63 }
 0x287   : > { %v3883_v51 = vsub.f32 %v557_v41, %v1830_v56  ;;  %v3885_v48 = vsub.f32 %v559_v43, %v1831_v60  ;;  %v3887_v62 = vsub.f32 %v561_v40, %v1830_v56  ;;  %v3889_v1 = vsub.f32 %v563_v42, %v1831_v60 }
 0x288   : > { %v3892_v4 = vsub.f32 %v3844_v24, %v1830_v56  ;;  %v3895_v33 = vsub.f32 %v3847_v21, %v1831_v60  ;;  %v3898_v61 = vsub.f32 %v3838_v27, %v1830_v56  ;;  %v3901_v17 = vsub.f32 %v3841_v5, %v1831_v60 }
 0x289   : > { %v623_v21 = vrot.slane %v622_v3, 1  ;;  %v1844_v27 = vmul.f32 %v3883_v51, %v3883_v51  ;;  %v1845_v5 = vmul.f32 %v3885_v48, %v3885_v48  ;;  %v1846_v11 = vmul.f32 %v3887_v62, %v3887_v62 }
 0x28a   : > { %v1840_v41 = vmul.f32 %v3892_v4, %v3892_v4  ;;  %v1841_v43 = vmul.f32 %v3895_v33, %v3895_v33  ;;  %v1842_v40 = vmul.f32 %v3898_v61, %v3898_v61  ;;  %v1843_v24 = vmul.f32 %v3901_v17, %v3901_v17 }
 0x28b   : > { %v1847_v52 = vmul.f32 %v3889_v1, %v3889_v1  ;;  %v624_v46 = vadd.f32 %v623_v21, %v622_v3 }
 0x28c   : > { %v1848_v42 = vadd.f32 %v1842_v40, %v1840_v41  ;;  %v1857_v19 = vadd.f32 %v1843_v24, %v1841_v43 }
 0x28d   : > { %v3283_v36 = vpop.eup %3282  ;;  %3286 = vrcp.f32 %v624_v46 }
 0x28e   : > { %v1849_v23 = vadd.f32 %v1848_v42, %v1844_v27  ;;  %v1858_v58 = vadd.f32 %v1857_v19, %v1845_v5  ;;  %v627_v26 = vmul.f32 %v3283_v36, %v3835_v22  ;;  %v629_v59 = vmul.f32 %v3283_v36, %v3849_v50 }
 0x28f   : > { %v631_v55 = vmul.f32 %v3283_v36, %v3859_v53  ;;  %v633_v57 = vmul.f32 %v3283_v36, %v3866_v45 }
 0x290   : > { %v3285_v34 = vpop.eup %3284  ;;  %v1850_v9 = vadd.f32 %v1849_v23, %v1846_v11  ;;  %v1859_v25 = vadd.f32 %v1858_v58, %v1847_v52  ;;  %v635_v38 = vpack.c.bf16 %v629_v59, %v627_v26 }
 0x291   : > { %v1163_v20 = vmul.f32 %v3285_v34, %v3825_v28  ;;  %v1162_v29 = vmul.f32 %v3285_v34, %v3822_v13  ;;  %v1165_v44 = vmul.f32 %v3285_v34, %v3829_v32  ;;  %v1164_v30 = vmul.f32 %v3285_v34, %v3827_v31 }
 0x292   : > { %v1851_v22 = vrot.slane %v1850_v9, 4  ;;  %v3927_v63 = vpack.c.bf16 %v633_v57, %v631_v55  ;;  %v1860_v60 = vrot.slane %v1859_v25, 4 }
 0x293   : > { %v1187_v50 = vmul.f32 %v3791_v15, %v1163_v20  ;;  %v1186_v53 = vmul.f32 %v3797_v8, %v1162_v29  ;;  %v1189_v45 = vmul.f32 %v3799_v37, %v1165_v44  ;;  %v1188_v56 = vmul.f32 %v3813_v18, %v1164_v30 }
 0x294   : > { %5525 = vst [vmem:[#allocation2_spill] sm:$0xff] %v3927_v63  ;;  %v1852_v37 = vadd.f32 %v1851_v22, %v1850_v9 }
 0x295   : > { %v3934_v28 = vadd.f32 %v3795_v49, %v1187_v50  ;;  %v3937_v13 = vadd.f32 %v3804_v6, %v1186_v53  ;;  %v3940_v31 = vadd.f32 %v3811_v16, %v1189_v45  ;;  %v3943_v32 = vadd.f32 %v3818_v47, %v1188_v56 }
 0x296   : > { %v1861_v6 = vadd.f32 %v1860_v60, %v1859_v25  ;;  %v1853_v24 = vrot.slane %v1852_v37, 2 }
 0x297   : > { %v3946_v15 = vmul.f32 0.70710677, %v3934_v28  ;;  %v3949_v8 = vmul.f32 0.70710677, %v3937_v13  ;;  %v3952_v18 = vmul.f32 0.70710677, %v3940_v31  ;;  %v3287_v36 = vpop.eup %3286 }
 0x298   : > { %v3955_v49 = vmul.f32 0.70710677, %v3943_v32  ;;  %v1862_v27 = vrot.slane %v1861_v6, 2  ;;  %v1854_v52 = vadd.f32 %v1853_v24, %v1852_v37  ;;  %v628_v59 = vmul.f32 %v3287_v36, %v3869_v39 }
 0x299   : > { %v1219_v16 = vand.u32 2147483647, %v3946_v15  ;;  %v1218_v3 = vand.u32 2147483647, %v3949_v8  ;;  %v1221_v47 = vand.u32 2147483647, %v3952_v18  ;;  %v630_v55 = vmul.f32 %v3287_v36, %v3873_v54 }
 0x29a   : > { %v1220_v41 = vand.u32 2147483647, %v3955_v49  ;;  %v1863_v23 = vadd.f32 %v1862_v27, %v1861_v6  ;;  %v1855_v26 = vrot.slane %v1854_v52, 1  ;;  %v632_v34 = vmul.f32 %v3287_v36, %v3875_v2 }
 0x29b   : > { %v1223_v43 = vmul.f32 0.3275911, %v1219_v16  ;;  %v1222_v40 = vmul.f32 0.3275911, %v1218_v3  ;;  %v1225_v21 = vmul.f32 0.3275911, %v1221_v47  ;;  %v634_v9 = vmul.f32 %v3287_v36, %v3880_v7 }
 0x29c   : > { %v1224_v19 = vmul.f32 0.3275911, %v1220_v41  ;;  %v1864_v57 = vrot.slane %v1863_v23, 1  ;;  %v1856_v25 = vadd.f32 %v1855_v26, %v1854_v52  ;;  %v636_v46 = vpack.c.bf16 %v630_v55, %v628_v59 }
 0x29d   : > { %v1227_v5 = vadd.f32 1.0, %v1223_v43  ;;  %v1226_v42 = vadd.f32 1.0, %v1222_v40  ;;  %v1229_v11 = vadd.f32 1.0, %v1225_v21  ;;  %v3965_v29 = vpack.c.bf16 %v634_v9, %v632_v34 }
 0x29e   : > { %v1228_v58 = vadd.f32 1.0, %v1224_v19  ;;  %v1865_v20 = vadd.f32 %v1864_v57, %v1863_v23  ;;  %v1271_v44 = vsub.f32 0.0, %v1219_v16  ;;  %v1866_v30 = vmul.f32 0.03125, %v1856_v25  ;;  %776 = vmatprep.subr.bf16.mxu1 %v636_v46  ;;  %1761 = vmatprep.subr.bf16.mxu0 %v636_v46 }
 0x29f   : > { %3288 = vrcp.f32 %v1227_v5  ;;  %5526 = vst [vmem:[#allocation3_spill] sm:$0xff] %v3965_v29  ;;  %v1270_v22 = vsub.f32 0.0, %v1218_v3  ;;  %777 = vmatpush1.bf16.msra.mxu1 %v635_v38  ;;  %1762 = vmatpush1.bf16.msra.mxu0 %v635_v38  ;;  %v1273_v54 = vsub.f32 0.0, %v1221_v47  ;;  %v1272_v43 = vsub.f32 0.0, %v1220_v41  ;;  %v3972_v38 = vpop.permute.xlu1 %1346 }
 0x2a0   : > { %3290 = vrcp.f32 %v1226_v42  ;;  %v1867_v39 = vmul.f32 0.03125, %v1865_v20  ;;  %v1868_v50 = vadd.f32 1e-05, %v1866_v30  ;;  %778 = vmatprep.subr.bf16.mxu1 %v3965_v29  ;;  %v1275_v53 = vmul.f32 %v1271_v44, %v1219_v16 }
 0x2a1   : > { %3292 = vrcp.f32 %v1229_v11  ;;  %v1274_v60 = vmul.f32 %v1270_v22, %v1218_v3  ;;  %v1277_v6 = vmul.f32 %v1273_v54, %v1221_v47  ;;  %v1276_v11 = vmul.f32 %v1272_v43, %v1220_v41 }
 0x2a2   : > { %3294 = vrcp.f32 %v1228_v58  ;;  %v1869_v2 = vadd.f32 1e-05, %v1867_v39  ;;  %v1280_v21 = vmul.f32 1.442695, %v1275_v53  ;;  %vm1299_vm2 = vcmp.ge.f32.partialorder %v3946_v15, 0.0 }
 0x2a3   : > { %3296 = vrsqrt.f32 %v1868_v50  ;;  %779 = vmatpush1.bf16.msra.mxu1 %v3927_v63  ;;  %v1278_v5 = vmul.f32 1.442695, %v1274_v60  ;;  %v1284_v36 = vmul.f32 1.442695, %v1277_v6  ;;  %v1888_v26 = vpop.permute.xlu1 %1887  ;;  %v1282_v25 = vmul.f32 1.442695, %v1276_v11 }
 0x2a4   : > { %3298 = vrsqrt.f32 %v1869_v2  ;;  %vm1298_vm3 = vcmp.ge.f32.partialorder %v3949_v8, 0.0  ;;  %vm1301_vm4 = vcmp.ge.f32.partialorder %v3952_v18, 0.0  ;;  %vm1300_vm5 = vcmp.ge.f32.partialorder %v3955_v49, 0.0 }
 0x2a5   : > { %3300 = vpow2.f32 %v1280_v21 }
 0x2a6   : > { %3302 = vpow2.f32 %v1278_v5 }
 0x2a7   : > { %3304 = vpow2.f32 %v1284_v36  ;;  %v4008_v36 = vpop.permute.xlu0 %1341 }
 0x2a8   : > { %3306 = vpow2.f32 %v1282_v25 }
 0x2a9   : > { %v3289_v7 = vpop.eup %3288 }
 0x2aa   : > { %v3968_v45 = vpop.eup %3290  ;;  %v1235_v56 = vmul.f32 1.0614054, %v3289_v7 }
 0x2ab   : > { %v1234_v37 = vmul.f32 1.0614054, %v3968_v45  ;;  %v3974_v24 = vpop.eup %3292 }
 0x2ac   : > { %v1239_v40 = vadd.f32 -1.4531521, %v1235_v56  ;;  %v1237_v42 = vmul.f32 1.0614054, %v3974_v24  ;;  %v3977_v19 = vpop.eup %3294 }
 0x2ad   : > { %v1238_v27 = vadd.f32 -1.4531521, %v1234_v37  ;;  %v1236_v23 = vmul.f32 1.0614054, %v3977_v19  ;;  %v3982_v34 = vpop.eup %3296 }
 0x2ae   : > { %v1243_v16 = vmul.f32 %v3289_v7, %v1239_v40  ;;  %v1241_v47 = vadd.f32 -1.4531521, %v1237_v42  ;;  %v3985_v46 = vpop.eup %3298  ;;  %v1874_v30 = vmul.f32 %v3982_v34, %v3898_v61  ;;  %v1872_v54 = vmul.f32 %v3982_v34, %v3892_v4  ;;  %v1916_v61 = vpop.permute.xlu1 %1915 }
 0x2af   : > { %v1242_v3 = vmul.f32 %v3968_v45, %v1238_v27  ;;  %v1240_v57 = vadd.f32 -1.4531521, %v1236_v23  ;;  %v1875_v39 = vmul.f32 %v3985_v46, %v3901_v17  ;;  %v1873_v50 = vmul.f32 %v3985_v46, %v3895_v33 }
 0x2b0   : > { %v1247_v52 = vadd.f32 1.4214138, %v1243_v16  ;;  %v1245_v55 = vmul.f32 %v3974_v24, %v1241_v47  ;;  %v1902_v60 = vmul.f32 %v1888_v26, %v1874_v30  ;;  %v1878_v33 = vmul.f32 %v3982_v34, %v3887_v62  ;;  %v1883_v30 = vpop.permute.xlu0 %1882 }
 0x2b1   : > { %v1246_v58 = vadd.f32 1.4214138, %v1242_v3  ;;  %v1244_v44 = vmul.f32 %v3977_v19, %v1240_v57  ;;  %v1903_v6 = vmul.f32 %v1888_v26, %v1875_v39  ;;  %v1879_v16 = vmul.f32 %v3985_v46, %v3889_v1 }
 0x2b2   : > { %v1251_v59 = vmul.f32 %v3289_v7, %v1247_v52  ;;  %v1249_v20 = vadd.f32 1.4214138, %v1245_v55  ;;  %v3999_v21 = vadd.f32 %v1916_v61, %v1902_v60  ;;  %v3301_v52 = vpop.eup %3300 }
 0x2b3   : > { %v1250_v9 = vmul.f32 %v3968_v45, %v1246_v58  ;;  %v1248_v56 = vadd.f32 1.4214138, %v1244_v44  ;;  %v4001_v27 = vadd.f32 %v1916_v61, %v1903_v6  ;;  %v3303_v58 = vpop.eup %3302  ;;  %v1294_v6 = vmul.f32 0.5, %v3937_v13 }
 0x2b4   : > { %v1255_v41 = vadd.f32 -0.28449672, %v1251_v59  ;;  %v1253_v53 = vmul.f32 %v3974_v24, %v1249_v20  ;;  %v4011_v11 = vmul.f32 0.70710677, %v3999_v21  ;;  %v1900_v61 = vmul.f32 %v1883_v30, %v1872_v54 }
 0x2b5   : > { %v1254_v22 = vadd.f32 -0.28449672, %v1250_v9  ;;  %v1252_v17 = vmul.f32 %v3977_v19, %v1248_v56  ;;  %v4015_v23 = vmul.f32 0.70710677, %v4001_v27 }
 0x2b6   : > { %v1259_v2 = vmul.f32 %v3289_v7, %v1255_v41  ;;  %v1257_v40 = vadd.f32 -0.28449672, %v1253_v53  ;;  %v1946_v1 = vand.u32 2147483647, %v4011_v11  ;;  %vm2106_vm6 = vcmp.ge.f32.partialorder %v4011_v11, 0.0 }
 0x2b7   : > { %v1258_v37 = vmul.f32 %v3968_v45, %v1254_v22  ;;  %v1256_v3 = vadd.f32 -0.28449672, %v1252_v17  ;;  %v4021_v25 = vand.u32 2147483647, %v4015_v23  ;;  %v1898_v22 = vpop.permute.xlu1 %1897  ;;  %vm2107_vm7 = vcmp.ge.f32.partialorder %v4015_v23, 0.0 }
 0x2b8   : > { %v1263_v43 = vadd.f32 0.2548296, %v1259_v2  ;;  %v1261_v42 = vmul.f32 %v3974_v24, %v1257_v40  ;;  %v1954_v41 = vmul.f32 0.3275911, %v1946_v1 }
 0x2b9   : > { %v1262_v4 = vadd.f32 0.2548296, %v1258_v37  ;;  %v1260_v26 = vmul.f32 %v3977_v19, %v1256_v3  ;;  %v1955_v37 = vmul.f32 0.3275911, %v4021_v25 }
 0x2ba   : > { %v1267_v5 = vmul.f32 %v3289_v7, %v1263_v43  ;;  %v1265_v62 = vadd.f32 0.2548296, %v1261_v42  ;;  %v3305_v7 = vpop.eup %3304  ;;  %v1962_v44 = vadd.f32 1.0, %v1954_v41  ;;  %v1901_v43 = vmul.f32 %v1883_v30, %v1873_v50 }
 0x2bb   : > { %v1266_v47 = vmul.f32 %v3968_v45, %v1262_v4  ;;  %v1264_v9 = vadd.f32 0.2548296, %v1260_v26  ;;  %v3307_v39 = vpop.eup %3306  ;;  %v1907_v42 = vmul.f32 %v1898_v22, %v1879_v16  ;;  %v1926_v13 = vpop.permute.xlu1 %1925  ;;  %v1877_v16 = vmul.f32 %v3985_v46, %v3885_v48 }
 0x2bc   : > { %v1287_v59 = vmul.f32 %v3301_v52, %v1267_v5  ;;  %v1269_v57 = vmul.f32 %v3974_v24, %v1265_v62  ;;  %3308 = vrcp.f32 %v1962_v44  ;;  %v1295_v24 = vmul.f32 0.5, %v3934_v28 }
 0x2bd   : > { %v1286_v55 = vmul.f32 %v3303_v58, %v1266_v47  ;;  %v1268_v20 = vmul.f32 %v3977_v19, %v1264_v9  ;;  %v1297_v19 = vmul.f32 0.5, %v3940_v31  ;;  %v1906_v5 = vmul.f32 %v1898_v22, %v1878_v33  ;;  %v1911_v47 = vpop.permute.xlu0 %1910 }
 0x2be   : > { %v1289_v45 = vmul.f32 %v3305_v7, %v1269_v57  ;;  %v1291_v2 = vsub.f32 1.0, %v1287_v59  ;;  %v1963_v52 = vadd.f32 1.0, %v1955_v37  ;;  %v2050_v28 = vsub.f32 0.0, %v1946_v1 }
 0x2bf   : > { %v1290_v53 = vsub.f32 1.0, %v1286_v55  ;;  %v1288_v60 = vmul.f32 %v3307_v39, %v1268_v20  ;;  %v4031_v50 = vadd.f32 %v1911_v47, %v1900_v61  ;;  %v4033_v58 = vadd.f32 %v1911_v47, %v1901_v43 }
 0x2c0   : > { %v1293_v56 = vsub.f32 1.0, %v1289_v45  ;;  %v1303_v17 = vsub.f32 0.0, %v1291_v2  ;;  %v4035_v62 = vadd.f32 %v1926_v13, %v1906_v5  ;;  %v4038_v31 = vadd.f32 %v1926_v13, %v1907_v42 }
 0x2c1   : > { %v1292_v40 = vsub.f32 1.0, %v1288_v60  ;;  %v1302_v4 = vsub.f32 0.0, %v1290_v53  ;;  %v1876_v33 = vmul.f32 %v3982_v34, %v3883_v51  ;;  %v4049_v59 = vmul.f32 0.70710677, %v4031_v50 }
 0x2c2   : > { %v1305_v3 = vsub.f32 0.0, %v1293_v56  ;;  %v1307_v26 = vsel %vm1299_vm2, %v1291_v2, %v1303_v17  ;;  %v4052_v55 = vmul.f32 0.70710677, %v4033_v58  ;;  %3310 = vrcp.f32 %v1963_v52 }
 0x2c3   : > { %v1304_v54 = vsub.f32 0.0, %v1292_v40  ;;  %v1306_v7 = vsel %vm1298_vm3, %v1290_v53, %v1302_v4  ;;  %v2058_v49 = vmul.f32 %v2050_v28, %v1946_v1  ;;  %v4055_v57 = vmul.f32 0.70710677, %v4035_v62  ;;  %v1893_v53 = vpop.permute.xlu0 %1892 }
 0x2c4   : > { %v4058_v51 = vmul.f32 0.70710677, %v4038_v31  ;;  %v1309_v48 = vsel %vm1301_vm4, %v1293_v56, %v1305_v3  ;;  %v1944_v8 = vand.u32 2147483647, %v4049_v59  ;;  %v1945_v34 = vand.u32 2147483647, %v4052_v55 }
 0x2c5   : > { %v1308_v15 = vsel %vm1300_vm5, %v1292_v40, %v1304_v54  ;;  %v1311_v9 = vadd.f32 1.0, %v1307_v26  ;;  %v1310_v41 = vadd.f32 1.0, %v1306_v7  ;;  %v4067_v1 = vand.u32 2147483647, %v4055_v57 }
 0x2c6   : > { %v4064_v46 = vpop.eup %3308  ;;  %v4070_v45 = vand.u32 2147483647, %v4058_v51  ;;  %v1952_v44 = vmul.f32 0.3275911, %v1944_v8  ;;  %v1953_v18 = vmul.f32 0.3275911, %v1945_v34  ;;  %v1904_v3 = vmul.f32 %v1893_v53, %v1876_v33 }
 0x2c7   : > { %v1978_v20 = vmul.f32 1.0614054, %v4064_v46  ;;  %v1313_v30 = vadd.f32 1.0, %v1309_v48  ;;  %v1312_v22 = vadd.f32 1.0, %v1308_v15  ;;  %v1958_v39 = vmul.f32 0.3275911, %v4067_v1  ;;  %v1921_v7 = vpop.permute.xlu0 %1920 }
 0x2c8   : > { %v1959_v2 = vmul.f32 0.3275911, %v4070_v45  ;;  %v1296_v56 = vmul.f32 0.5, %v3943_v32  ;;  %v1960_v37 = vadd.f32 1.0, %v1952_v44  ;;  %v1961_v61 = vadd.f32 1.0, %v1953_v18 }
 0x2c9   : > { %v1986_v60 = vadd.f32 -1.4531521, %v1978_v20  ;;  %v1315_v43 = vmul.f32 %v1311_v9, %v1295_v24  ;;  %v2051_v40 = vsub.f32 0.0, %v4021_v25  ;;  %v2068_v17 = vmul.f32 1.442695, %v2058_v49 }
 0x2ca   : > { %v1966_v4 = vadd.f32 1.0, %v1958_v39  ;;  %v1314_v5 = vmul.f32 %v1310_v41, %v1294_v6  ;;  %3312 = vrcp.f32 %v1960_v37  ;;  %v1317_v52 = vmul.f32 %v1313_v30, %v1297_v19 }
 0x2cb   : > { %v1994_v42 = vmul.f32 %v4064_v46, %v1986_v60  ;;  %v1316_v28 = vmul.f32 %v1312_v22, %v1296_v56  ;;  %3314 = vrcp.f32 %v1961_v61  ;;  %v1967_v47 = vadd.f32 1.0, %v1959_v2 }
 0x2cc   : > { %v2048_v54 = vsub.f32 0.0, %v1944_v8  ;;  %3316 = vrcp.f32 %v1966_v4  ;;  %v4078_v32 = vpop.eup %3310  ;;  %v2049_v24 = vsub.f32 0.0, %v1945_v34  ;;  %v1905_v26 = vmul.f32 %v1893_v53, %v1877_v16 }
 0x2cd   : > { %v2002_v13 = vadd.f32 1.4214138, %v1994_v42  ;;  %3318 = vpow2.f32 %v2068_v17  ;;  %v2059_v6 = vmul.f32 %v2051_v40, %v4021_v25  ;;  %v4082_v48 = vadd.f32 %v1921_v7, %v1904_v3 }
 0x2ce   : > { %3320 = vrcp.f32 %v1967_v47  ;;  %v4084_v19 = vadd.f32 %v1921_v7, %v1905_v26  ;;  %v4086_v33 = vpack.c.bf16 %v1315_v43, %v1314_v5  ;;  %v4088_v15 = vpack.c.bf16 %v1317_v52, %v1316_v28 }
 0x2cf   : > { %v2010_v49 = vmul.f32 %v4064_v46, %v2002_v13  ;;  %v2056_v41 = vmul.f32 %v2048_v54, %v1944_v8  ;;  %v4091_v20 = vmul.f32 0.70710677, %v4082_v48  ;;  %v2057_v16 = vmul.f32 %v2049_v24, %v1945_v34 }
 0x2d0   : > { %v2054_v44 = vsub.f32 0.0, %v4067_v1  ;;  %v4095_v18 = vmul.f32 0.70710677, %v4084_v19  ;;  %v1979_v25 = vmul.f32 1.0614054, %v4078_v32  ;;  %v4100_v39 = vmul.f32 0.5, %v3999_v21 }
 0x2d1   : > { %v2018_v9 = vadd.f32 -0.28449672, %v2010_v49  ;;  %v2070_v22 = vmul.f32 1.442695, %v2059_v6  ;;  %v1948_v2 = vand.u32 2147483647, %v4091_v20 }
 0x2d2   : > { %v4104_v8 = vmul.f32 0.5, %v4001_v27  ;;  %v2055_v34 = vsub.f32 0.0, %v4070_v45  ;;  %v4108_v53 = vand.u32 2147483647, %v4095_v18  ;;  %v1987_v56 = vadd.f32 -1.4531521, %v1979_v25 }
 0x2d3   : > { %v2026_v30 = vmul.f32 %v4064_v46, %v2018_v9  ;;  %v2064_v61 = vmul.f32 1.442695, %v2056_v41  ;;  %v1956_v43 = vmul.f32 0.3275911, %v1948_v2  ;;  %v2066_v17 = vmul.f32 1.442695, %v2057_v16 }
 0x2d4   : > { %v4110_v60 = vpop.eup %3312  ;;  %v2062_v4 = vmul.f32 %v2054_v44, %v4067_v1  ;;  %v1957_v27 = vmul.f32 0.3275911, %v4108_v53  ;;  %v1995_v28 = vmul.f32 %v4078_v32, %v1987_v56  ;;  %3322 = vpow2.f32 %v2070_v22 }
 0x2d5   : > { %v2034_v37 = vadd.f32 0.2548296, %v2026_v30  ;;  %v4112_v40 = vpop.eup %3314  ;;  %v1976_v21 = vmul.f32 1.0614054, %v4110_v60  ;;  %v1964_v3 = vadd.f32 1.0, %v1956_v43  ;;  %v2063_v1 = vmul.f32 %v2055_v34, %v4070_v45 }
 0x2d6   : > { %v4117_v5 = vpop.eup %3316  ;;  %v1977_v52 = vmul.f32 1.0614054, %v4112_v40  ;;  %v1965_v24 = vadd.f32 1.0, %v1957_v27  ;;  %v2076_v9 = vmul.f32 1.442695, %v2062_v4  ;;  %v2052_v41 = vsub.f32 0.0, %v1948_v2 }
 0x2d7   : > { %v2042_v42 = vmul.f32 %v4064_v46, %v2034_v37  ;;  %v3319_v47 = vpop.eup %3318  ;;  %v1984_v13 = vadd.f32 -1.4531521, %v1976_v21  ;;  %v1982_v54 = vmul.f32 1.0614054, %v4117_v5  ;;  %3324 = vrcp.f32 %v1964_v3 }
 0x2d8   : > { %v1985_v7 = vadd.f32 -1.4531521, %v1977_v52  ;;  %v4124_v49 = vpop.eup %3320  ;;  %3326 = vrcp.f32 %v1965_v24  ;;  %v2003_v44 = vadd.f32 1.4214138, %v1995_v28  ;;  %v2078_v34 = vmul.f32 1.442695, %v2063_v1 }
 0x2d9   : > { %v2082_v26 = vmul.f32 %v3319_v47, %v2042_v42  ;;  %v1992_v46 = vmul.f32 %v4110_v60, %v1984_v13  ;;  %v1990_v6 = vadd.f32 -1.4531521, %v1982_v54  ;;  %3328 = vpow2.f32 %v2064_v61 }
 0x2da   : > { %v1993_v16 = vmul.f32 %v4112_v40, %v1985_v7  ;;  %3330 = vpow2.f32 %v2066_v17  ;;  %v1983_v45 = vmul.f32 1.0614054, %v4124_v49  ;;  %v2011_v37 = vmul.f32 %v4078_v32, %v2003_v44 }
 0x2db   : > { %v2000_v25 = vadd.f32 1.4214138, %v1992_v46  ;;  %v1998_v30 = vmul.f32 %v4117_v5, %v1990_v6  ;;  %v2090_v22 = vsub.f32 1.0, %v2082_v26  ;;  %3332 = vpow2.f32 %v2076_v9 }
 0x2dc   : > { %v2001_v56 = vadd.f32 1.4214138, %v1993_v16  ;;  %v1991_v61 = vadd.f32 -1.4531521, %v1983_v45  ;;  %v2053_v4 = vsub.f32 0.0, %v4108_v53  ;;  %v2060_v27 = vmul.f32 %v2052_v41, %v1948_v2 }
 0x2dd   : > { %v2008_v43 = vmul.f32 %v4110_v60, %v2000_v25  ;;  %v2006_v21 = vadd.f32 1.4214138, %v1998_v30  ;;  %v2019_v17 = vadd.f32 -0.28449672, %v2011_v37  ;;  %v2114_v47 = vsub.f32 0.0, %v2090_v22 }
 0x2de   : > { %v2009_v42 = vmul.f32 %v4112_v40, %v2001_v56  ;;  %v1999_v28 = vmul.f32 %v4124_v49, %v1991_v61  ;;  %v4138_v13 = vmul.f32 0.5, %v4031_v50  ;;  %v3323_v26 = vpop.eup %3322  ;;  %3334 = vpow2.f32 %v2078_v34 }
 0x2df   : > { %v2016_v3 = vadd.f32 -0.28449672, %v2008_v43  ;;  %v2014_v52 = vmul.f32 %v4117_v5, %v2006_v21  ;;  %v2027_v24 = vmul.f32 %v4078_v32, %v2019_v17  ;;  %v2061_v6 = vmul.f32 %v2053_v4, %v4108_v53 }
 0x2e0   : > { %v2017_v54 = vadd.f32 -0.28449672, %v2009_v42  ;;  %v2007_v7 = vadd.f32 1.4214138, %v1999_v28  ;;  %v2072_v9 = vmul.f32 1.442695, %v2060_v27  ;;  %v2122_v56 = vsel %vm2106_vm6, %v2090_v22, %v2114_v47 }
 0x2e1   : > { %v2024_v2 = vmul.f32 %v4110_v60, %v2016_v3  ;;  %v2022_v1 = vadd.f32 -0.28449672, %v2014_v52  ;;  %v4142_v46 = vpop.eup %3324  ;;  %v2035_v16 = vadd.f32 0.2548296, %v2027_v24  ;;  %vm2104_vm8 = vcmp.ge.f32.partialorder %v4049_v59, 0.0 }
 0x2e2   : > { %v2025_v41 = vmul.f32 %v4112_v40, %v2017_v54  ;;  %v4146_v44 = vpop.eup %3326  ;;  %v1980_v30 = vmul.f32 1.0614054, %v4142_v46  ;;  %v2015_v45 = vmul.f32 %v4124_v49, %v2007_v7  ;;  %vm2105_vm9 = vcmp.ge.f32.partialorder %v4052_v55, 0.0 }
 0x2e3   : > { %v2032_v50 = vadd.f32 0.2548296, %v2024_v2  ;;  %v2030_v25 = vmul.f32 %v4117_v5, %v2022_v1  ;;  %v3329_v34 = vpop.eup %3328  ;;  %v2043_v37 = vmul.f32 %v4078_v32, %v2035_v16  ;;  %v1981_v43 = vmul.f32 1.0614054, %v4146_v44 }
 0x2e4   : > { %v2033_v53 = vadd.f32 0.2548296, %v2025_v41  ;;  %v3331_v21 = vpop.eup %3330  ;;  %v1988_v27 = vadd.f32 -1.4531521, %v1980_v30  ;;  %v2023_v42 = vadd.f32 -0.28449672, %v2015_v45  ;;  %3336 = vpow2.f32 %v2072_v9 }
 0x2e5   : > { %v2040_v61 = vmul.f32 %v4110_v60, %v2032_v50  ;;  %v2038_v4 = vadd.f32 0.2548296, %v2030_v25  ;;  %v2074_v17 = vmul.f32 1.442695, %v2061_v6  ;;  %v2083_v11 = vmul.f32 %v3323_v26, %v2043_v37  ;;  %v3333_v52 = vpop.eup %3332 }
 0x2e6   : > { %v2041_v3 = vmul.f32 %v4112_v40, %v2033_v53  ;;  %v1989_v22 = vadd.f32 -1.4531521, %v1981_v43  ;;  %v1996_v32 = vmul.f32 %v4142_v46, %v1988_v27  ;;  %v2031_v54 = vmul.f32 %v4124_v49, %v2023_v42 }
 0x2e7   : > { %v2080_v28 = vmul.f32 %v3329_v34, %v2040_v61  ;;  %v2046_v47 = vmul.f32 %v4117_v5, %v2038_v4  ;;  %v2130_v24 = vadd.f32 1.0, %v2122_v56  ;;  %v2091_v2 = vsub.f32 1.0, %v2083_v11 }
 0x2e8   : > { %v2081_v60 = vmul.f32 %v3331_v21, %v2041_v3  ;;  %v1997_v1 = vmul.f32 %v4146_v44, %v1989_v22  ;;  %v2004_v6 = vadd.f32 1.4214138, %v1996_v32  ;;  %v2039_v16 = vadd.f32 0.2548296, %v2031_v54  ;;  %v3335_v25 = vpop.eup %3334 }
 0x2e9   : > { %v2088_v7 = vsub.f32 1.0, %v2080_v28  ;;  %v2086_v41 = vmul.f32 %v3333_v52, %v2046_v47  ;;  %v2115_v26 = vsub.f32 0.0, %v2091_v2  ;;  %3338 = vpow2.f32 %v2074_v17 }
 0x2ea   : > { %v2089_v40 = vsub.f32 1.0, %v2081_v60  ;;  %v2005_v50 = vadd.f32 1.4214138, %v1997_v1  ;;  %v2012_v5 = vmul.f32 %v4142_v46, %v2004_v6  ;;  %v2047_v45 = vmul.f32 %v4124_v49, %v2039_v16 }
 0x2eb   : > { %v2112_v30 = vsub.f32 0.0, %v2088_v7  ;;  %v4167_v34 = vmul.f32 %v2130_v24, %v4100_v39  ;;  %v2123_v53 = vsel %vm2107_vm7, %v2091_v2, %v2115_v26  ;;  %v2094_v43 = vsub.f32 1.0, %v2086_v41 }
 0x2ec   : > { %v2113_v56 = vsub.f32 0.0, %v2089_v40  ;;  %v2013_v37 = vmul.f32 %v4146_v44, %v2005_v50  ;;  %v2020_v21 = vadd.f32 -0.28449672, %v2012_v5  ;;  %v2131_v61 = vadd.f32 1.0, %v2123_v53 }
 0x2ed   : > { %v2120_v9 = vsel %vm2104_vm8, %v2088_v7, %v2112_v30  ;;  %v2087_v42 = vmul.f32 %v3335_v25, %v2047_v45  ;;  %v2097_v39 = vmul.f32 0.5, %v4033_v58  ;;  %v2118_v52 = vsub.f32 0.0, %v2094_v43 }
 0x2ee   : > { %v2128_v4 = vadd.f32 1.0, %v2120_v9  ;;  %v2121_v27 = vsel %vm2105_vm9, %v2089_v40, %v2113_v56  ;;  %v2021_v49 = vadd.f32 -0.28449672, %v2013_v37  ;;  %v2028_v17 = vmul.f32 %v4142_v46, %v2020_v21  ;;  %v3337_v24 = vpop.eup %3336 }
 0x2ef   : > { %v2129_v23 = vadd.f32 1.0, %v2121_v27  ;;  %v4179_v3 = vmul.f32 %v2131_v61, %v4104_v8  ;;  %v2095_v22 = vsub.f32 1.0, %v2087_v42  ;;  %vm2110_vm10 = vcmp.ge.f32.partialorder %v4055_v57, 0.0 }
 0x2f0   : > { %v4182_v59 = vmul.f32 %v2128_v4, %v4138_v13  ;;  %v2029_v11 = vmul.f32 %v4146_v44, %v2021_v49  ;;  %v2036_v28 = vadd.f32 0.2548296, %v2028_v17  ;;  %vm2111_vm11 = vcmp.ge.f32.partialorder %v4058_v51, 0.0 }
 0x2f1   : > { %v4185_v55 = vmul.f32 %v2129_v23, %v2097_v39  ;;  %v2119_v32 = vsub.f32 0.0, %v2095_v22  ;;  %v2126_v2 = vsel %vm2110_vm10, %v2094_v43, %v2118_v52  ;;  %v2102_v50 = vmul.f32 0.5, %v4035_v62 }
 0x2f2   : > { %v2037_v58 = vadd.f32 0.2548296, %v2029_v11  ;;  %v2044_v54 = vmul.f32 %v4142_v46, %v2036_v28  ;;  %v2134_v16 = vadd.f32 1.0, %v2126_v2  ;;  %vm2108_vm12 = vcmp.ge.f32.partialorder %v4091_v20, 0.0  ;;  %v3235_v2 = vld [vmem:[%s5479_s2 + $0x48] sm:$0xff]  }
 0x2f3   : > { %v3339_v60 = vpop.eup %3338  ;;  %v2127_v41 = vsel %vm2111_vm11, %v2095_v22, %v2119_v32  ;;  %v2103_v57 = vmul.f32 0.5, %v4038_v31  ;;  %vm2109_vm13 = vcmp.ge.f32.partialorder %v4095_v18, 0.0  ;;  %v2100_v30 = vmul.f32 0.5, %v4082_v48 }
 0x2f4   : > { %v2045_v13 = vmul.f32 %v4146_v44, %v2037_v58  ;;  %v2084_v1 = vmul.f32 %v3337_v24, %v2044_v54  ;;  %v2135_v46 = vadd.f32 1.0, %v2127_v41  ;;  %v4199_v51 = vmul.f32 %v2134_v16, %v2102_v50 }
 0x2f5   : > { %v2101_v56 = vmul.f32 0.5, %v4084_v19 }
 0x2f6   : > { %v2085_v7 = vmul.f32 %v3339_v60, %v2045_v13  ;;  %v2092_v6 = vsub.f32 1.0, %v2084_v1  ;;  %v4203_v37 = vmul.f32 %v2135_v46, %v2103_v57  ;;  %v3234_v60 = vld [vmem:[%s5479_s2 + $0x40] sm:$0xff]   ;;  %v3236_v1 = vld [vmem:[%s5479_s2 + $0x50] sm:$0xff]  }
 0x2f8   : > { %v2093_v40 = vsub.f32 1.0, %v2085_v7  ;;  %v2116_v26 = vsub.f32 0.0, %v2092_v6 }
 0x2fa   : > { %v2117_v25 = vsub.f32 0.0, %v2093_v40  ;;  %v2124_v44 = vsel %vm2108_vm12, %v2092_v6, %v2116_v26 }
 0x2fb   : > { %v2132_v5 = vadd.f32 1.0, %v2124_v44 }
 0x2fc   : > { %v2125_v45 = vsel %vm2109_vm13, %v2093_v40, %v2117_v25 }
 0x2fd   : > { %v2133_v53 = vadd.f32 1.0, %v2125_v45  ;;  %v4205_v62 = vmul.f32 %v2132_v5, %v2100_v30  ;;  %v1608_v45 = vld [vmem:[%s5481_s4 + $0x250] sm:$0xff] }
 0x2ff   : > { %v4207_v20 = vmul.f32 %v2133_v53, %v2101_v56  ;;  %v1640_v56 = vld [vmem:[%s5481_s4 + $0x268] sm:$0xff]  ;;  %v1665_v53 = vld [vmem:[%s5481_s4 + $0x270] sm:$0xff] }
 0x329   : > { %v753_v9 = vpop.f32.mrb[0].mxu1 }
 0x32a   : > { %v755_v43 = vpop.f32.mrb[1].mxu1 }
 0x32b   : > { %v756_v48 = vpop.f32.mrb[2].mxu1  ;;  %v1691_v43 = vld [vmem:[%s5481_s4 + $0x280] sm:$0xff] }
 0x32c   : > { %v768_v21 = vpack.c.bf16 %v756_v48, %v753_v9  ;;  %v758_v61 = vpop.f32.mrb[3].mxu1  ;;  %v1692_v9 = vld [vmem:[%s5481_s4 + $0x288] sm:$0xff] }
 0x32d   : > { %v1437_v48 = vld [vmem:[%s5481_s4 + $0x188] sm:$0xff]  ;;  %v4307_v61 = vpop.permute.xlu0 %1479 }
 0x32e   : > { %3098 = vmatmul.mubr.msk.bf16.vlgmr.msra.gmra.mrb[8].mxu1 %vm5484_vm0, %v768_v21  ;;  %v1436_v21 = vld [vmem:[%s5481_s4 + $0x180] sm:$0xff] }
 0x32f   : > { %818 = vmatprep.mubr.bf16.mxu1 %v5489_v0 }
 0x331   : > { %v761_v19 = vpop.f32.mrb[4].mxu1 }
 0x332   : > { %v763_v4 = vpop.f32.mrb[5].mxu1 }
 0x333   : > { %v764_v27 = vpop.f32.mrb[6].mxu1  ;;  %v4311_v4 = vpop.permute.xlu0 %1508 }
 0x334   : > { %v769_v49 = vpack.c.bf16 %v764_v27, %v761_v19  ;;  %v766_v42 = vpop.f32.mrb[7].mxu1  ;;  %v4309_v19 = vpop.permute.xlu1 %1484 }
 0x336   : > { %3099 = vmatmul.mubr.msk.bf16.gmra.mrb[12].mxu1 %vm5484_vm0, %v769_v49 }
 0x337   : > { %909 = vmatprep.mubr.bf16.mxu1 %v5489_v0  ;;  %v4315_v49 = vpop.permute.xlu0 %1537 }
 0x338   : > { %v4313_v27 = vpop.permute.xlu1 %1513 }
 0x33c   : > { %v4317_v42 = vpop.permute.xlu1 %1542 }
 0x401   : > { %v810_v39 = vpop.f32.mrb[8].mxu1 }
 0x402   : > { %v812_v17 = vpop.f32.mrb[9].mxu1 }
 0x403   : > { %v814_v23 = vpop.f32.mrb[10].mxu1 }
 0x404   : > { %v833_v11 = vpack.c.bf16 %v814_v23, %v810_v39  ;;  %v816_v22 = vpop.f32.mrb[11].mxu1  ;;  %v4319_v39 = vpop.permute.xlu0 %1568 }
 0x405   : > { %v834_v52 = vpack.c.bf16 %v816_v22, %v812_v17  ;;  %v4321_v17 = vpop.permute.xlu1 %1573 }
 0x407   : > { %877 = vmatprep.subr.bf16.mxu1 %v834_v52 }
 0x408   : > { %878 = vmatpush1.bf16.msra.mxu1 %v833_v11  ;;  %v4323_v23 = vpop.permute.xlu0 %1590 }
 0x409   : > { %v820_v28 = vpop.f32.mrb[12].mxu1  ;;  %v4325_v11 = vpop.permute.xlu1 %1595 }
 0x40a   : > { %v822_v58 = vpop.f32.mrb[13].mxu1 }
 0x40b   : > { %v824_v32 = vpop.f32.mrb[14].mxu1 }
 0x40c   : > { %v835_v54 = vpack.c.bf16 %v824_v32, %v820_v28  ;;  %v826_v24 = vpop.f32.mrb[15].mxu1 }
 0x40d   : > { %v836_v13 = vpack.c.bf16 %v826_v24, %v822_v58  ;;  %v4329_v52 = vpop.permute.xlu1 %1621 }
 0x40f   : > { %879 = vmatprep.subr.bf16.mxu1 %v836_v13 }
 0x410   : > { %880 = vmatpush1.bf16.msra.mxu1 %v835_v54 }
 0x411   : > { %3169 = vmatprep.subr.bf16.mxu1 %v4086_v33 }
 0x413   : > { %3102 = vmatmul.mubr.msk.bf16.vlgmr.msra.gmra.mrb[16].mxu1 %vm5484_vm0, %v3234_v60 }
 0x414   : > { %3170 = vmatpush3.bf16.msra.mxu1 %v4086_v33  ;;  %919 = vmatprep.mubr.bf16.mxu1 %v5489_v0  ;;  %v3237_v33 = vld [vmem:[%s5479_s2 + $0x58] sm:$0xff]  }
 0x415   : > { %3171 = vmatprep.subr.bf16.mxu1 %v4088_v15 }
 0x418   : > { %3172 = vmatpush3.bf16.msra.mxu1 %v4088_v15 }
 0x41b   : > { %3103 = vmatmul.mubr.msk.bf16.gmra.mrb[20].mxu1 %vm5484_vm0, %v3235_v2 }
 0x41c   : > { %3173 = vmatprep.mubr.msk.bf16.mxu1 %vm5484_vm0, %v3236_v1 }
 0x423   : > { %3174 = vmatmul.mubr.msk.bf16.vlgmr.msra.gmra.mrb[24].mxu1 %vm5484_vm0, %v3237_v33 }
 0x4e6   : > { %v4238_v7 = vpop.f32.mrb[16].mxu1 }
 0x4e7   : > { %5527 = vst [vmem:[#allocation4_spill] sm:$0xff] %v4238_v7  ;;  %v4240_v41 = vpop.f32.mrb[17].mxu1 }
 0x4e8   : > { %5528 = vst [vmem:[#allocation5_spill] sm:$0xff] %v4240_v41  ;;  %v4242_v6 = vpop.f32.mrb[18].mxu1  ;;  %v5548_v41 = vmov 0  }
 0x4e9   : > { %5529 = vst [vmem:[#allocation6_spill] sm:$0xff] %v4242_v6  ;;  %v4244_v15 = vpop.f32.mrb[19].mxu1 }
 0x4ea   : > { %5530 = vst [vmem:[#allocation7_spill] sm:$0xff] %v4244_v15 }
 0x4ee   : > { %v4246_v16 = vpop.f32.mrb[20].mxu1 }
 0x4ef   : > { %5531 = vst [vmem:[#allocation8_spill] sm:$0xff] %v4246_v16  ;;  %v4248_v40 = vpop.f32.mrb[21].mxu1 }
 0x4f0   : > { %5532 = vst [vmem:[#allocation9_spill] sm:$0xff] %v4248_v40  ;;  %v4250_v26 = vpop.f32.mrb[22].mxu1 }
 0x4f1   : > { %5533 = vst [vmem:[#allocation10_spill] sm:$0xff] %v4250_v26  ;;  %v4252_v46 = vpop.f32.mrb[23].mxu1 }
 0x4f2   : > { %5534 = vst [vmem:[#allocation11_spill] sm:$0xff] %v4252_v46 }
 0x4f6   : > { %v3175_v50 = vpop.f32.mrb[24].mxu1 }
 0x4f7   : > { %v4255_v25 = vadd.f32 %v3175_v50, %v4008_v36  ;;  %v1399_v57 = vpop.f32.mrb[25].mxu1 }
 0x4f8   : > { %v3176_v44 = vpop.f32.mrb[26].mxu1  ;;  %v1400_v36 = vadd.f32 %v1399_v57, %v3820_v12  ;;  %v1666_v12 = vld [vmem:[%s5481_s4 + $0x278] sm:$0xff] }
 0x4f9   : > { %v4258_v30 = vadd.f32 %v3176_v44, %v3972_v38  ;;  %v1402_v5 = vpop.f32.mrb[27].mxu1  ;;  %1456 = vrot.lane.b32.xlu0 %v4255_v25, %s3369_s25 }
 0x4fa   : > { %v1403_v38 = vadd.f32 %v1402_v5, %v3816_v35  ;;  %v1639_v35 = vld [vmem:[%s5481_s4 + $0x260] sm:$0xff] }
 0x4fb   : > { %1458 = vrot.lane.b32.xlu1 %v4258_v30, %s3369_s25  ;;  %s3383_s25 = smov 114  }
 0x4fd   : > { %1491 = vrot.lane.b32.xlu0 %v4255_v25, %s3370_s26 }
 0x4ff   : > { %1493 = vrot.lane.b32.xlu1 %v4258_v30, %s3370_s26  ;;  %s3374_s26 = smov 122  }
 0x501   : > { %1520 = vrot.lane.b32.xlu0 %v4255_v25, %s3371_s27 }
 0x503   : > { %1522 = vrot.lane.b32.xlu1 %v4258_v30, %s3371_s27  ;;  %s3375_s27 = smov 121  }
 0x520   : > { %1414 = vmax.xlane.f32.xlu0 %v1400_v36 }
 0x527   : > { %1416 = vmax.xlane.f32.xlu1 %v1403_v38 }
 0x536   : > { %1616 = vperm.xlu0 %3208, %v1608_v45  }
 0x538   : > { %1551 = vrot.lane.b32.xlu1 %v4258_v30, %s3372_s6 }
 0x53a   : > { %1549 = vrot.lane.b32.xlu0 %v4255_v25, %s3372_s6 }
 0x53c   : > { %1652 = vperm.xlu1 %3209, %v1640_v56   ;;  %v2154_v56 = vld [vmem:[%s5481_s4 + $0x170] sm:$0xff] }
 0x53e   : > { %1647 = vperm.xlu0 %3208, %v1639_v35   ;;  %v2155_v35 = vld [vmem:[%s5481_s4 + $0x178] sm:$0xff] }
 0x540   : > { %1678 = vperm.xlu1 %3209, %v1666_v12   ;;  %v2340_v12 = vld [vmem:[%s5481_s4 + $0x290] sm:$0xff] }
 0x542   : > { %1673 = vperm.xlu0 %3208, %v1665_v53   ;;  %v2341_v53 = vld [vmem:[%s5481_s4 + $0x298] sm:$0xff] }
 0x544   : > { %1604 = vrot.lane.b32.xlu1 %v4258_v30, %s3373_s15 }
 0x546   : > { %1602 = vrot.lane.b32.xlu0 %v4255_v25, %s3373_s15 }
 0x548   : > { %1704 = vperm.xlu1 %3209, %v1692_v9   ;;  %v3377_v9 = vmov 0.0  }
 0x549   : > { %3177 = vmatprep.subr.bf16.mxu1 %v3377_v9  ;;  %3179 = vmatprep.mubr.msk.bf16.mxu1 %vm3378_vm15, %v3377_v9  ;;  %v2280_v9 = vld [vmem:[%s5481_s4 + $0x198] sm:$0xff] }
 0x54a   : > { %1699 = vperm.xlu0 %3208, %v1691_v43   ;;  %v2391_v43 = vld [vmem:[%s5481_s4 + $0x2a0] sm:$0xff] }
 0x54c   : > { %1445 = vperm.xlu1 %3209, %v1437_v48   ;;  %v2392_v48 = vld [vmem:[%s5481_s4 + $0x2a8] sm:$0xff] }
 0x54e   : > { %1440 = vperm.xlu0 %3208, %v1436_v21   ;;  %v2442_v21 = vld [vmem:[%s5481_s4 + $0x2b0] sm:$0xff] }
 0x550   : > { %1630 = vrot.lane.b32.xlu1 %v4258_v30, %s3374_s26 }
 0x552   : > { %1628 = vrot.lane.b32.xlu0 %v4255_v25, %s3374_s26  ;;  %s3384_s26 = smov 113  }
 0x554   : > { %1661 = vrot.lane.b32.xlu1 %v4258_v30, %s3375_s27 }
 0x556   : > { %1659 = vrot.lane.b32.xlu0 %v4255_v25, %s3375_s27 }
 0x56b   : > { %v4327_v22 = vpop.permute.xlu0 %1456 }
 0x56d   : > { %v4333_v58 = vpop.permute.xlu1 %1458 }
 0x56f   : > { %v4331_v28 = vpop.permute.xlu0 %1491 }
 0x571   : > { %v4337_v54 = vpop.permute.xlu1 %1493 }
 0x573   : > { %v4335_v32 = vpop.permute.xlu0 %1520 }
 0x575   : > { %v4339_v60 = vpop.permute.xlu1 %1522 }
 0x5ad   : > { %v1415_v24 = vpop.xlane.xlu0 %1414 }
 0x5ae   : > { %v1418_v13 = vsub.f32 %v1400_v36, %v1415_v24  ;;  %v2152_v36 = vld [vmem:[%s5481_s4 + $0x160] sm:$0xff]  ;;  %v2443_v24 = vld [vmem:[%s5481_s4 + $0x2b8] sm:$0xff] }
 0x5b0   : > { %v1420_v2 = vmul.f32 1.442695, %v1418_v13  ;;  %v2497_v13 = vld [vmem:[%s5481_s4 + $0x2c0] sm:$0xff] }
 0x5b2   : > { %3340 = vpow2.f32 %v1420_v2  ;;  %v2498_v2 = vld [vmem:[%s5481_s4 + $0x2c8] sm:$0xff] }
 0x5b4   : > { %v1417_v1 = vpop.xlane.xlu1 %1416 }
 0x5b5   : > { %v1419_v33 = vsub.f32 %v1403_v38, %v1417_v1  ;;  %v2153_v38 = vld [vmem:[%s5481_s4 + $0x168] sm:$0xff]  ;;  %v2529_v1 = vld [vmem:[%s5481_s4 + $0x2d0] sm:$0xff] }
 0x5b7   : > { %v1422_v50 = vmul.f32 1.442695, %v1419_v33  ;;  %v2530_v33 = vld [vmem:[%s5481_s4 + $0x2d8] sm:$0xff] }
 0x5b9   : > { %3342 = vpow2.f32 %v1422_v50  ;;  %v2574_v50 = vld [vmem:[%s5481_s4 + $0x2e0] sm:$0xff] }
 0x5bc   : > { %v3341_v57 = vpop.eup %3340 }
 0x5bd   : > { %v4342_v44 = vsel %vm1318_vm14, %v3341_v57, 0.0  ;;  %v2575_v57 = vld [vmem:[%s5481_s4 + $0x2e8] sm:$0xff] }
 0x5be   : > { %1428 = vadd.xlane.f32.xlu0 %v4342_v44 }
 0x5c3   : > { %v3343_v5 = vpop.eup %3342 }
 0x5c4   : > { %v4345_v45 = vsel %vm1318_vm14, %v3343_v5, 0.0  ;;  %v2629_v5 = vld [vmem:[%s5481_s4 + $0x2f0] sm:$0xff] }
 0x5c5   : > { %1430 = vadd.xlane.f32.xlu1 %v4345_v45 }
 0x5d4   : > { %1685 = vrot.lane.b32.xlu0 %v4255_v25, %s3376_s29 }
 0x5d6   : > { %1687 = vrot.lane.b32.xlu1 %v4258_v30, %s3376_s29 }
 0x5d8   : > { %2158 = vperm.xlu0 %3208, %v2152_v36   ;;  %v2630_v36 = vld [vmem:[%s5481_s4 + $0x2f8] sm:$0xff] }
 0x5da   : > { %2163 = vperm.xlu1 %3209, %v2153_v38   ;;  %v2674_v38 = vld [vmem:[%s5481_s4 + $0x300] sm:$0xff] }
 0x5dc   : > { %2168 = vperm.xlu0 %3208, %v2154_v56   ;;  %v2675_v56 = vld [vmem:[%s5481_s4 + $0x308] sm:$0xff] }
 0x5de   : > { %2173 = vperm.xlu1 %3209, %v2155_v35   ;;  %v2719_v35 = vld [vmem:[%s5481_s4 + $0x310] sm:$0xff] }
 0x5e0   : > { %2352 = vperm.xlu0 %3208, %v2340_v12   ;;  %v2720_v12 = vld [vmem:[%s5481_s4 + $0x318] sm:$0xff] }
 0x5e2   : > { %2357 = vperm.xlu1 %3209, %v2341_v53   ;;  %v2279_v53 = vld [vmem:[%s5481_s4 + $0x190] sm:$0xff] }
 0x5e4   : > { %2403 = vperm.xlu0 %3208, %v2391_v43   ;;  %v4422_v43 = vpop.permute.xlu0 %1616 }
 0x5e6   : > { %2408 = vperm.xlu1 %3209, %v2392_v48   ;;  %v4425_v48 = vcvt.s32.f32 %v3529_v10 }
 0x5e8   : > { %2454 = vperm.xlu0 %3208, %v2442_v21   ;;  %v4428_v21 = vadd.f32 0.5, %v4425_v48  ;;  %vm1460_vm3 = vcmp.lt.f32.partialorder %v4425_v48, 49.0 }
 0x5ea   : > { %2459 = vperm.xlu1 %3209, %v2443_v24   ;;  %v4430_v24 = vpop.permute.xlu0 %1549 }
 0x5ec   : > { %2509 = vperm.xlu0 %3208, %v2497_v13   ;;  %v1452_v13 = vmul.f32 0.14285715, %v4428_v21 }
 0x5ee   : > { %2514 = vperm.xlu1 %3209, %v2498_v2   ;;  %v4433_v2 = vpop.permute.xlu1 %1551 }
 0x5f0   : > { %2541 = vperm.xlu0 %3208, %v2529_v1   ;;  %v4435_v1 = vpop.permute.xlu0 %1647 }
 0x5f2   : > { %2546 = vperm.xlu1 %3209, %v2530_v33   ;;  %v1453_v33 = vfloor.f32 %v1452_v13 }
 0x5f4   : > { %2586 = vperm.xlu0 %3208, %v2574_v50   ;;  %v4437_v50 = vpop.permute.xlu1 %1652  ;;  %vm1554_vm6 = vcmp.ge.f32.partialorder %v1453_v33, 0.0  ;;  %vm1556_vm10 = vcmp.lt.f32.partialorder %v1453_v33, 7.0 }
 0x5f5   : > { %vm1555_vm9 = vmand %vm1460_vm3, %vm1554_vm6 }
 0x5f6   : > { %2591 = vperm.xlu1 %3209, %v2575_v57   ;;  %v1454_v57 = vmul.f32 7.0, %v1453_v33 }
 0x5f8   : > { %2641 = vperm.xlu0 %3208, %v2629_v5   ;;  %v1461_v5 = vadd.f32 -1.0, %v1453_v33 }
 0x5fa   : > { %2646 = vperm.xlu1 %3209, %v2630_v36   ;;  %v4439_v36 = vpop.permute.xlu0 %1673  ;;  %vm1462_vm2 = vcmp.ge.f32.partialorder %v1461_v5, 0.0  ;;  %vm1464_vm5 = vcmp.lt.f32.partialorder %v1461_v5, 7.0  ;;  %v1632_v5 = vadd.f32 1.0, %v1453_v33 }
 0x5fb   : > { %vm1463_vm4 = vmand %vm1460_vm3, %vm1462_vm2 }
 0x5fc   : > { %2686 = vperm.xlu0 %3208, %v2674_v38   ;;  %v4442_v38 = vsub.f32 %v4425_v48, %v1454_v57  ;;  %vm4452_vm7 = vmand %vm1463_vm4, %vm1464_vm5  ;;  %vm1633_vm1 = vcmp.ge.f32.partialorder %v1632_v5, 0.0 }
 0x5fd   : > { %vm4474_vm2 = vmand %vm1555_vm9, %vm1556_vm10 }
 0x5fe   : > { %2691 = vperm.xlu1 %3209, %v2675_v56   ;;  %v4444_v56 = vpop.permute.xlu1 %1678  ;;  %v4459_v13 = vadd.f32 1.0, %v4442_v38  ;;  %vm5485_vm13 = vcmp.ge.f32.partialorder %v4442_v38, 0.0  ;;  %vm5486_vm5 = vcmp.lt.f32.partialorder %v4442_v38, 7.0  ;;  %vm1634_vm0 = vmand %vm1460_vm3, %vm1633_vm1 }
 0x5ff   : > { %vm1497_vm14 = vmand %vm4452_vm7, %vm5485_vm13  ;;  %vm1635_vm13 = vcmp.lt.f32.partialorder %v1632_v5, 7.0 }
 0x600   : > { %2731 = vperm.xlu0 %3208, %v2719_v35   ;;  %v1466_v35 = vadd.f32 -1.0, %v4442_v38  ;;  %vm5487_vm15 = vcmp.ge.f32.partialorder %v4459_v13, 0.0  ;;  %vm1499_vm6 = vmand %vm1497_vm14, %vm5486_vm5  ;;  %vm1527_vm10 = vcmp.lt.f32.partialorder %v4459_v13, 7.0  ;;  %vm5544_vm1 = vcmp.ge.f32.partialorder %v4459_v13, 0.0 }
 0x601   : > { %vm1526_vm9 = vmand %vm4452_vm7, %vm5487_vm15  ;;  %v1502_v46 = vsel %vm1499_vm6, 1, %v5489_v0  ;;  %vm5543_vm15 = vcmp.ge.f32.partialorder %v4442_v38, 0.0  ;;  %vm5546_vm6 = vcmp.lt.f32.partialorder %v4442_v38, 7.0 }
 0x602   : > { %2736 = vperm.xlu1 %3209, %v2720_v12   ;;  %v4448_v12 = vpop.permute.xlu0 %1602  ;;  %vm5488_vm8 = vcmp.ge.f32.partialorder %v1466_v35, 0.0  ;;  %vm1469_vm12 = vcmp.lt.f32.partialorder %v1466_v35, 7.0  ;;  %vm1528_vm14 = vmand %vm1526_vm9, %vm1527_vm10 }
 0x603   : > { %vm1468_vm11 = vmand %vm4452_vm7, %vm5488_vm8  ;;  %v1531_v40 = vsel %vm1528_vm14, 1, %v5489_v0 }
 0x604   : > { %2283 = vperm.xlu0 %3208, %v2279_v53   ;;  %vm4479_vm4 = vmand %vm1468_vm11, %vm1469_vm12 }
 0x605   : > { %vm1558_vm11 = vmand %vm4474_vm2, %vm5488_vm8  ;;  %v1473_v5 = vsel %vm4479_vm4, 1, %v5489_v0  ;;  %vm1532_vm4 = vcmp.eq.s32.totalorder %v1531_v40, 1 }
 0x606   : > { %2288 = vperm.xlu1 %3209, %v2280_v9   ;;  %v4456_v9 = vpop.permute.xlu1 %1604  ;;  %v4463_v57 = vpop.permute.xlu0 %1699  ;;  %vm1559_vm5 = vmand %vm1558_vm11, %vm1469_vm12  ;;  %vm1474_vm11 = vcmp.eq.s32.totalorder %v1473_v5, 1 }
 0x607   : > { %vm4505_vm7 = vmand %vm1634_vm0, %vm1635_vm13  ;;  %v1562_v16 = vsel %vm1559_vm5, 1, %v5489_v0  ;;  %vm5545_vm0 = vcmp.ge.f32.partialorder %v1466_v35, 0.0  ;;  %v1476_v18 = vsel %vm1474_vm11, %v4333_v58, 0.0  ;;  %vm5547_vm5 = vcmp.ge.f32.partialorder %v4442_v38, 0.0 }
 0x608   : > { %vm1580_vm8 = vmand %vm4474_vm2, %vm5543_vm15  ;;  %vm1503_vm15 = vcmp.eq.s32.totalorder %v1502_v46, 1  ;;  %v1534_v46 = vsel %vm1532_vm4, %v4339_v60, 0.0  ;;  %v1475_v35 = vsel %vm1474_vm11, %v4327_v22, 0.0  ;;  %v1533_v58 = vsel %vm1532_vm4, %v4335_v32, 0.0 }
 0x609   : > { %vm1606_vm3 = vmand %vm4474_vm2, %vm5544_vm1  ;;  %v1505_v15 = vsel %vm1503_vm15, %v4337_v54, 0.0  ;;  %vm1563_vm1 = vcmp.eq.s32.totalorder %v1562_v16, 1  ;;  %v1504_v0 = vsel %vm1503_vm15, %v4331_v28, 0.0  ;;  %v1488_v60 = vmul.f32 %v4309_v19, %v1476_v18 }
 0x60a   : > { %v4484_v47 = vpop.permute.xlu1 %1704  ;;  %v4493_v33 = vpop.permute.xlu0 %1440  ;;  %vm1637_vm13 = vmand %vm4505_vm7, %vm5545_vm0  ;;  %v1517_v6 = vmul.f32 %v4313_v27, %v1505_v15  ;;  %v1565_v28 = vsel %vm1563_vm1, %v4433_v2, 0.0  ;;  %v1516_v7 = vmul.f32 %v4311_v4, %v1504_v0  ;;  %v1546_v63 = vmul.f32 %v4317_v42, %v1534_v46 }
 0x60b   : > { %vm1581_vm9 = vmand %vm1580_vm8, %vm5546_vm6  ;;  %v1564_v15 = vsel %vm1563_vm1, %v4430_v24, 0.0  ;;  %vm5550_vm15 = vcmp.ge.f32.partialorder %v4459_v13, 0.0  ;;  %v1487_v0 = vmul.f32 %v4307_v61, %v1475_v35  ;;  %v1545_v4 = vmul.f32 %v4315_v49, %v1533_v58 }
 0x60c   : > { %vm1607_vm2 = vmand %vm1606_vm3, %vm1527_vm10  ;;  %v1584_v5 = vsel %vm1581_vm9, 1, %v5548_v41  ;;  %v1519_v19 = vadd.f32 %v1517_v6, %v1488_v60  ;;  %v1577_v42 = vmul.f32 %v4321_v17, %v1565_v28  ;;  %v1576_v2 = vmul.f32 %v4319_v39, %v1564_v15 }
 0x60d   : > { %vm1638_vm14 = vmand %vm1637_vm13, %vm1469_vm12  ;;  %v1610_v40 = vsel %vm1607_vm2, 1, %v5548_v41  ;;  %vm1585_vm0 = vcmp.eq.s32.totalorder %v1584_v5, 1  ;;  %v1518_v32 = vadd.f32 %v1516_v7, %v1487_v0  ;;  %vm5555_vm11 = vcmask 261120  }
 0x60e   : > { %v4503_v8 = vpop.permute.xlu1 %1445  ;;  %v4514_v26 = vpop.permute.xlu0 %1628  ;;  %vm1663_vm8 = vmand %vm4505_vm7, %vm5547_vm5  ;;  %v1641_v29 = vsel %vm1638_vm14, 1, %v5548_v41  ;;  %vm1611_vm13 = vcmp.eq.s32.totalorder %v1610_v40, 1  ;;  %v1548_v24 = vadd.f32 %v1546_v63, %v1519_v19  ;;  %v1587_v38 = vsel %vm1585_vm0, %v4258_v30, 0.0 }
 0x60f   : > { %vm5549_vm12 = vmmov %vm5546_vm6  ;;  %vm1642_vm9 = vcmp.eq.s32.totalorder %v1641_v29, 1  ;;  %v1613_v6 = vsel %vm1611_vm13, %v4456_v9, 0.0  ;;  %v1586_v61 = vsel %vm1585_vm0, %v4255_v25, 0.0  ;;  %v1547_v17 = vadd.f32 %v1545_v4, %v1518_v32 }
 0x610   : > { %vm1664_vm3 = vmand %vm1663_vm8, %vm5549_vm12  ;;  %v1579_v53 = vadd.f32 %v1577_v42, %v1548_v24  ;;  %v1612_v63 = vsel %vm1611_vm13, %v4448_v12, 0.0  ;;  %v1599_v18 = vmul.f32 %v4325_v11, %v1587_v38  ;;  %v1625_v9 = vmul.f32 %v4329_v52, %v1613_v6 }
 0x611   : > { %vm1689_vm6 = vmand %vm4505_vm7, %vm5550_vm15  ;;  %v1667_v16 = vsel %vm1664_vm3, 1, %v5548_v41  ;;  %v1578_v13 = vadd.f32 %v1576_v2, %v1547_v17  ;;  %v1598_v46 = vmul.f32 %v4323_v23, %v1586_v61  ;;  %v1643_v5 = vsel %vm1642_vm9, %v4514_v26, 0.0 }
 0x612   : > { %v1631_v31 = vpop.permute.xlu1 %1630  ;;  %v1660_v54 = vpop.permute.xlu0 %1659  ;;  %vm1690_vm2 = vmand %vm1689_vm6, %vm1527_vm10  ;;  %vm1668_vm7 = vcmp.eq.s32.totalorder %v1667_v16, 1  ;;  %v1601_v28 = vadd.f32 %v1599_v18, %v1579_v53  ;;  %v1624_v12 = vmul.f32 %v4422_v43, %v1612_v63  ;;  %v1655_v23 = vmul.f32 %v4435_v1, %v1643_v5 }
 0x613   : > { %v1644_v7 = vsel %vm1642_vm9, %v1631_v31, 0.0  ;;  %v1693_v39 = vsel %vm1690_vm2, 1, %v5548_v41  ;;  %v1669_v60 = vsel %vm1668_vm7, %v1660_v54, 0.0  ;;  %v1600_v52 = vadd.f32 %v1598_v46, %v1578_v13  ;;  %vm5556_vm4 = vmmov %vm5555_vm11 }
 0x614   : > { %v1656_v31 = vmul.f32 %v4437_v50, %v1644_v7  ;;  %vm1694_vm10 = vcmp.eq.s32.totalorder %v1693_v39, 1  ;;  %v1627_v15 = vadd.f32 %v1625_v9, %v1601_v28  ;;  %v1681_v19 = vmul.f32 %v4439_v36, %v1669_v60 }
 0x615   : > { %v1449_v2 = vadd.f32 %v4503_v8, %v4258_v30  ;;  %v5551_v6 = vpack.c.bf16 %v4179_v3, %v4185_v55  ;;  %v5553_v8 = vpack.c.bf16 %v4203_v37, %v4207_v20  ;;  %v5554_v3 = vpack.c.bf16 %v4199_v51, %v4205_v62 }
 0x616   : > { %v1662_v27 = vpop.permute.xlu1 %1661  ;;  %v1658_v0 = vadd.f32 %v1656_v31, %v1627_v15  ;;  %vm5493_vm1 = vcmask 130048   ;;  %vm5570_vm14 = vcmp.lt.s32.totalorder %v3532_v14, 196  ;;  %vm5497_vm8 = vcmp.lt.f32.partialorder %v4425_v48, 196.0 }
 0x617   : > { %v1670_v35 = vsel %vm1668_vm7, %v1662_v27, 0.0  ;;  %v1626_v27 = vadd.f32 %v1624_v12, %v1600_v52  ;;  %vm5572_vm5 = vmmov %vm5570_vm14 }
 0x618   : > { %v1682_v29 = vmul.f32 %v4444_v56, %v1670_v35 }
 0x619   : > { %v1657_v4 = vadd.f32 %v1655_v23, %v1626_v27 }
 0x61a   : > { %v1684_v42 = vadd.f32 %v1682_v29, %v1658_v0 }
 0x61b   : > { %v1683_v1 = vadd.f32 %v1681_v19, %v1657_v4 }
 0x64b   : > { %v1429_v22 = vpop.xlane.xlu0 %1428 }
 0x64c   : > { %3344 = vrcp.f32 %v1429_v22 }
 0x64f   : > { %v1686_v40 = vpop.permute.xlu0 %1685 }
 0x650   : > { %v1695_v26 = vsel %vm1694_vm10, %v1686_v40, 0.0 }
 0x651   : > { %v1707_v54 = vmul.f32 %v4463_v57, %v1695_v26 }
 0x652   : > { %v1431_v49 = vpop.xlane.xlu1 %1430 }
 0x653   : > { %3346 = vrcp.f32 %v1431_v49  ;;  %v1709_v38 = vadd.f32 %v1707_v54, %v1683_v1 }
 0x656   : > { %v1688_v58 = vpop.permute.xlu1 %1687  ;;  %v3345_v22 = vpop.eup %3344 }
 0x657   : > { %v1696_v11 = vsel %vm1694_vm10, %v1688_v58, 0.0  ;;  %v1434_v16 = vmul.f32 %v3345_v22, %v4342_v44  ;;  %v2159_v51 = vpop.permute.xlu0 %2158 }
 0x658   : > { %v1708_v43 = vmul.f32 %v4484_v47, %v1696_v11  ;;  %v1448_v47 = vadd.f32 %v4493_v33, %v4255_v25  ;;  %v3238_v25 = vld [vmem:[%s5479_s2 + $0x60] sm:$0xff]  }
 0x65a   : > { %v1710_v24 = vadd.f32 %v1708_v43, %v1684_v42  ;;  %v1711_v57 = vadd.f32 %v1709_v38, %v1448_v47  ;;  %v2164_v49 = vpop.permute.xlu1 %2163 }
 0x65b   : > { %v2169_v12 = vpop.permute.xlu0 %2168 }
 0x65c   : > { %v1712_v36 = vadd.f32 %v1710_v24, %v1449_v2 }
 0x65d   : > { %v3347_v50 = vpop.eup %3346 }
 0x65e   : > { %v1435_v32 = vmul.f32 %v3347_v50, %v4345_v45  ;;  %v1713_v44 = vpack.c.bf16 %v1712_v36, %v1711_v57  ;;  %v5552_v45 = vpack.c.bf16 %v4167_v34, %v4182_v59  ;;  %v3239_v34 = vld [vmem:[%s5479_s2 + $0x68] sm:$0xff]   ;;  %v2174_v58 = vpop.permute.xlu1 %2173 }
 0x65f   : > { %v4681_v11 = vpop.permute.xlu0 %2352 }
 0x660   : > { %v1714_v56 = vpack.c.bf16 %v1435_v32, %v1434_v16 }
 0x662   : > { %3178 = vmatpush3.bf16.xpose.msra.mxu1 %v1714_v56  ;;  %v4683_v15 = vpop.permute.xlu1 %2357 }
 0x663   : > { %2192 = vmatprep.subr.bf16.mxu1 %v5551_v6  ;;  %v4685_v52 = vpop.permute.xlu0 %2403 }
 0x666   : > { %v4687_v23 = vpop.permute.xlu1 %2408 }
 0x667   : > { %v4689_v29 = vpop.permute.xlu0 %2454 }
 0x669   : > { %3180 = vmatmul.mubr.bf16.vlgmr.msra.gmra.mrb[28].mxu1 %v1713_v44 }
 0x66a   : > { %2193 = vmatpush1.bf16.msra.mxu1 %v5552_v45  ;;  %2224 = vmatprep.mubr.bf16.mxu1 %v5548_v41  ;;  %v4691_v26 = vpop.permute.xlu1 %2459 }
 0x66b   : > { %2194 = vmatprep.subr.bf16.mxu1 %v5553_v8  ;;  %v4693_v22 = vpop.permute.xlu0 %2509 }
 0x66e   : > { %2195 = vmatpush1.bf16.msra.mxu1 %v5554_v3  ;;  %v4695_v27 = vpop.permute.xlu1 %2514 }
 0x66f   : > { %v4697_v0 = vpop.permute.xlu0 %2541 }
 0x671   : > { %3121 = vmatmul.mubr.msk.bf16.vlgmr.msra.gmra.mrb[32].mxu1 %vm5555_vm11, %v3238_v25 }
 0x672   : > { %2234 = vmatprep.mubr.bf16.mxu1 %v5548_v41  ;;  %v4699_v19 = vpop.permute.xlu1 %2546 }
 0x673   : > { %v4701_v43 = vpop.permute.xlu0 %2586 }
 0x676   : > { %v4703_v50 = vpop.permute.xlu1 %2591 }
 0x677   : > { %v4705_v4 = vpop.permute.xlu0 %2641 }
 0x679   : > { %3122 = vmatmul.mubr.msk.bf16.gmra.mrb[36].mxu1 %vm5556_vm4, %v3239_v34 }
 0x67a   : > { %2923 = vmatprep.mubr.bf16.mxu1 %v5548_v41  ;;  %v4707_v42 = vpop.permute.xlu1 %2646 }
 0x67b   : > { %5561 = vst [vmem:[#allocation16_spill] sm:$0xff] %v4707_v42  ;;  %v4709_v54 = vpop.permute.xlu0 %2686 }
 0x67c   : > { %5562 = vst [vmem:[#allocation17_spill] sm:$0xff] %v4709_v54 }
 0x67e   : > { %v4711_v16 = vpop.permute.xlu1 %2691 }
 0x67f   : > { %5563 = vst [vmem:[#allocation18_spill] sm:$0xff] %v4711_v16  ;;  %v4713_v32 = vpop.permute.xlu0 %2731 }
 0x680   : > { %5564 = vst [vmem:[#allocation19_spill] sm:$0xff] %v4713_v32 }
 0x682   : > { %v4715_v1 = vpop.permute.xlu1 %2736 }
 0x683   : > { %5565 = vst [vmem:[#allocation20_spill] sm:$0xff] %v4715_v1  ;;  %v4717_v24 = vpop.permute.xlu0 %2283 }
 0x684   : > { %5566 = vst [vmem:[#allocation21_spill] sm:$0xff] %v4717_v24 }
 0x686   : > { %v4719_v56 = vpop.permute.xlu1 %2288 }
 0x687   : > { %5567 = vst [vmem:[#allocation22_spill] sm:$0xff] %v4719_v56  ;;  %v5606_v56 = vmov 0 }
 0x73c   : > { %v1749_v59 = vpop.f32.mrb[28].mxu1 }
 0x73d   : > { %v3181_v55 = vpop.f32.mrb[29].mxu1 }
 0x73e   : > { %v1752_v37 = vpop.f32.mrb[30].mxu1 }
 0x73f   : > { %v1756_v20 = vpack.c.bf16 %v1752_v37, %v1749_v59  ;;  %v3182_v30 = vpop.f32.mrb[31].mxu1 }
 0x741   : > { %3118 = vmatmul.mubr.msk.bf16.vlgmr.msra.gmra.mrb[36].mxu0 %vm5493_vm1, %v1756_v20 }
 0x744   : > { %v2226_v62 = vpop.f32.mrb[32].mxu1 }
 0x745   : > { %v4621_v33 = vadd.f32 %v2226_v62, %v2159_v51  ;;  %v2228_v61 = vpop.f32.mrb[33].mxu1  ;;  %v838_v62 = vld [vmem:[%s5481_s4 + $0x88] sm:$0xff] }
 0x746   : > { %v4623_v17 = vadd.f32 %v2228_v61, %v2159_v51  ;;  %v2230_v53 = vpop.f32.mrb[34].mxu1  ;;  %v840_v61 = vld [vmem:[%s5481_s4 + $0x98] sm:$0xff] }
 0x747   : > { %v4625_v63 = vadd.f32 %v2230_v53, %v2164_v49  ;;  %v2232_v7 = vpop.f32.mrb[35].mxu1  ;;  %v930_v53 = vld [vmem:[%s5481_s4 + $0x1c0] sm:$0xff] }
 0x748   : > { %v2245_v39 = vmax.f32 %v4621_v33, %v4623_v17  ;;  %v4629_v13 = vadd.f32 %v2232_v7, %v2164_v49  ;;  %v839_v49 = vld [vmem:[%s5481_s4 + $0x90] sm:$0xff] }
 0x749   : > { %v932_v7 = vld [vmem:[%s5481_s4 + $0x1d0] sm:$0xff] }
 0x74a   : > { %v2248_v18 = vmax.f32 %v4625_v63, %v4629_v13  ;;  %2246 = vmax.xlane.f32.xlu0 %v2245_v39  ;;  %v2852_v39 = vld [vmem:[%s5481_s4 + $0x1a8] sm:$0xff] }
 0x74c   : > { %v2236_v9 = vpop.f32.mrb[36].mxu1  ;;  %2249 = vmax.xlane.f32.xlu1 %v2248_v18  ;;  %v2854_v18 = vld [vmem:[%s5481_s4 + $0x1b8] sm:$0xff] }
 0x74d   : > { %v2238_v46 = vpop.f32.mrb[37].mxu1  ;;  %v4636_v31 = vadd.f32 %v2236_v9, %v2169_v12 }
 0x74e   : > { %v2240_v5 = vpop.f32.mrb[38].mxu1  ;;  %v4662_v60 = vadd.f32 %v2238_v46, %v2169_v12  ;;  %v2953_v12 = vld [vmem:[%s5481_s4 + $0x1e8] sm:$0xff] }
 0x74f   : > { %v2242_v35 = vpop.f32.mrb[39].mxu1  ;;  %v4633_v28 = vadd.f32 %v2240_v5, %v2174_v58  ;;  %5558 = vst [vmem:[#allocation13_spill] sm:$0xff] %v4636_v31 }
 0x750   : > { %v4657_v40 = vadd.f32 %v2242_v35, %v2174_v58  ;;  %5560 = vst [vmem:[#allocation15_spill] sm:$0xff] %v4662_v60  ;;  %v2853_v35 = vld [vmem:[%s5481_s4 + $0x1b0] sm:$0xff] }
 0x751   : > { %5557 = vst [vmem:[#allocation12_spill] sm:$0xff] %v4633_v28 }
 0x752   : > { %5559 = vst [vmem:[#allocation14_spill] sm:$0xff] %v4657_v40 }
 0x75d   : > { %2307 = vrot.lane.b32.xlu1 %v4633_v28, %s3379_s21 }
 0x760   : > { %2305 = vrot.lane.b32.xlu0 %v4636_v31, %s3379_s21 }
 0x761   : > { %2370 = vrot.lane.b32.xlu1 %v4633_v28, %s3380_s22 }
 0x764   : > { %2368 = vrot.lane.b32.xlu0 %v4636_v31, %s3380_s22 }
 0x765   : > { %2421 = vrot.lane.b32.xlu1 %v4633_v28, %s3381_s23 }
 0x768   : > { %2419 = vrot.lane.b32.xlu0 %v4636_v31, %s3381_s23 }
 0x769   : > { %2472 = vrot.lane.b32.xlu1 %v4633_v28, %s3372_s6 }
 0x76c   : > { %2470 = vrot.lane.b32.xlu0 %v4636_v31, %s3372_s6 }
 0x76d   : > { %2559 = vrot.lane.b32.xlu1 %v4633_v28, %s3373_s15 }
 0x770   : > { %2557 = vrot.lane.b32.xlu0 %v4636_v31, %s3373_s15 }
 0x771   : > { %2604 = vrot.lane.b32.xlu1 %v4633_v28, %s3382_s24 }
 0x774   : > { %2602 = vrot.lane.b32.xlu0 %v4636_v31, %s3382_s24 }
 0x775   : > { %2659 = vrot.lane.b32.xlu1 %v4633_v28, %s3383_s25 }
 0x778   : > { %2657 = vrot.lane.b32.xlu0 %v4636_v31, %s3383_s25 }
 0x779   : > { %2704 = vrot.lane.b32.xlu1 %v4633_v28, %s3384_s26 }
 0x77c   : > { %2702 = vrot.lane.b32.xlu0 %v4636_v31, %s3384_s26 }
 0x77d   : > { %2311 = vrot.lane.b32.xlu1 %v4657_v40, %s3379_s21 }
 0x780   : > { %2309 = vrot.lane.b32.xlu0 %v4662_v60, %s3379_s21  ;;  %s5459_s21 = scalar_lea.vmem %s5482_s5, %s3131_s28 }
 0x781   : > { %2374 = vrot.lane.b32.xlu1 %v4657_v40, %s3380_s22 }
 0x784   : > { %2372 = vrot.lane.b32.xlu0 %v4662_v60, %s3380_s22 }
 0x785   : > { %2425 = vrot.lane.b32.xlu1 %v4657_v40, %s3381_s23 }
 0x788   : > { %2423 = vrot.lane.b32.xlu0 %v4662_v60, %s3381_s23 }
 0x789   : > { %2476 = vrot.lane.b32.xlu1 %v4657_v40, %s3372_s6 }
 0x78c   : > { %2474 = vrot.lane.b32.xlu0 %v4662_v60, %s3372_s6 }
 0x78d   : > { %2563 = vrot.lane.b32.xlu1 %v4657_v40, %s3373_s15 }
 0x790   : > { %2561 = vrot.lane.b32.xlu0 %v4662_v60, %s3373_s15 }
 0x791   : > { %2608 = vrot.lane.b32.xlu1 %v4657_v40, %s3382_s24 }
 0x794   : > { %2606 = vrot.lane.b32.xlu0 %v4662_v60, %s3382_s24 }
 0x795   : > { %2663 = vrot.lane.b32.xlu1 %v4657_v40, %s3383_s25 }
 0x798   : > { %2661 = vrot.lane.b32.xlu0 %v4662_v60, %s3383_s25 }
 0x7d7   : > { %v2247_v2 = vpop.xlane.xlu0 %2246 }
 0x7d8   : > { %v2251_v38 = vsub.f32 %v4621_v33, %v2247_v2  ;;  %v2252_v47 = vsub.f32 %v4623_v17, %v2247_v2  ;;  %v837_v33 = vld [vmem:[%s5481_s4 + $0x80] sm:$0xff]  ;;  %v931_v17 = vld [vmem:[%s5481_s4 + $0x1c8] sm:$0xff] }
 0x7d9   : > { %v2250_v36 = vpop.xlane.xlu1 %2249 }
 0x7da   : > { %v2255_v6 = vmul.f32 1.442695, %v2251_v38  ;;  %v2257_v57 = vmul.f32 1.442695, %v2252_v47  ;;  %v2253_v44 = vsub.f32 %v4625_v63, %v2250_v36  ;;  %v2254_v45 = vsub.f32 %v4629_v13, %v2250_v36  ;;  %v933_v63 = vld [vmem:[%s5481_s4 + $0x1d8] sm:$0xff]  ;;  %v2851_v13 = vld [vmem:[%s5481_s4 + $0x1a0] sm:$0xff] }
 0x7db   : > { %v2952_v47 = vld [vmem:[%s5481_s4 + $0x1e0] sm:$0xff]  ;;  %v2955_v36 = vld [vmem:[%s5481_s4 + $0x1f8] sm:$0xff] }
 0x7dc   : > { %3348 = vpow2.f32 %v2255_v6  ;;  %v2259_v8 = vmul.f32 1.442695, %v2253_v44  ;;  %v2261_v25 = vmul.f32 1.442695, %v2254_v45  ;;  %v4790_v6 = vpop.permute.xlu0 %2305 }
 0x7dd   : > { %3350 = vpow2.f32 %v2257_v57  ;;  %v2954_v57 = vld [vmem:[%s5481_s4 + $0x1f0] sm:$0xff]  ;;  %v4795_v44 = vpop.permute.xlu1 %2307 }
 0x7de   : > { %3352 = vpow2.f32 %v2259_v8 }
 0x7df   : > { %3354 = vpow2.f32 %v2261_v25  ;;  %v4802_v25 = vcvt.s32.f32 %v3532_v14 }
 0x7e0   : > { %v4797_v45 = vpop.permute.xlu0 %2368 }
 0x7e1   : > { %v4799_v8 = vpop.permute.xlu1 %2370  ;;  %vm5496_vm3 = vcmp.lt.f32.partialorder %v4802_v25, 196.0 }
 0x7e6   : > { %v4725_v3 = vpop.eup %3348 }
 0x7e7   : > { %5568 = vst [vmem:[#allocation23_spill] sm:$0xff] %v4725_v3  ;;  %v3351_v34 = vpop.eup %3350 }
 0x7e8   : > { %v4727_v59 = vpop.eup %3352  ;;  %v4731_v55 = vsel %vm5570_vm14, %v3351_v34, 0.0  ;;  %v4804_v34 = vpop.permute.xlu0 %2419 }
 0x7e9   : > { %5569 = vst [vmem:[#allocation24_spill] sm:$0xff] %v4727_v59  ;;  %5571 = vst [vmem:[#allocation25_spill] sm:$0xff] %v4731_v55  ;;  %v3355_v37 = vpop.eup %3354  ;;  %v2267_v20 = vadd.f32 %v4725_v3, %v4731_v55  ;;  %v5602_v55 = vmov 0 }
 0x7ea   : > { %v4737_v30 = vsel %vm5572_vm5, %v3355_v37, 0.0  ;;  %v4806_v37 = vpop.permute.xlu1 %2421 }
 0x7eb   : > { %5573 = vst [vmem:[#allocation26_spill] sm:$0xff] %v4737_v30  ;;  %2268 = vadd.xlane.f32.xlu0 %v2267_v20  ;;  %v2270_v51 = vadd.f32 %v4727_v59, %v4737_v30  ;;  %v2296_v20 = vadd.f32 0.5, %v4802_v25 }
 0x7ed   : > { %2271 = vadd.xlane.f32.xlu1 %v2270_v51  ;;  %v2297_v51 = vmul.f32 0.071428575, %v4428_v21 }
 0x7fe   : > { %2708 = vrot.lane.b32.xlu1 %v4657_v40, %s3384_s26 }
 0x801   : > { %2706 = vrot.lane.b32.xlu0 %v4662_v60, %s3384_s26 }
 0x802   : > { %848 = vperm.xlu1 %3209, %v838_v62   ;;  %v4810_v62 = vpop.permute.xlu0 %2470 }
 0x805   : > { %843 = vperm.xlu0 %3208, %v837_v33   ;;  %v2298_v33 = vmul.f32 0.071428575, %v2296_v20 }
 0x806   : > { %858 = vperm.xlu1 %3209, %v840_v61   ;;  %v4812_v61 = vpop.permute.xlu1 %2472 }
 0x809   : > { %853 = vperm.xlu0 %3208, %v839_v49   ;;  %v2299_v49 = vfloor.f32 %v2297_v51 }
 0x80a   : > { %941 = vperm.xlu1 %3209, %v931_v17   ;;  %v4814_v17 = vfloor.f32 %v2298_v33 }
 0x80b   : > { %v2301_v14 = vmul.f32 14.0, %v2299_v49  ;;  %vm2485_vm12 = vcmp.ge.f32.partialorder %v2299_v49, 0.0  ;;  %vm2489_vm15 = vcmp.lt.f32.partialorder %v2299_v49, 14.0  ;;  %v2615_v3 = vadd.f32 1.0, %v2299_v49 }
 0x80c   : > { %vm2486_vm0 = vcmp.ge.f32.partialorder %v4814_v17, 0.0  ;;  %vm2487_vm13 = vmand %vm5497_vm8, %vm2485_vm12  ;;  %vm2490_vm9 = vcmp.lt.f32.partialorder %v4814_v17, 14.0  ;;  %v2616_v33 = vadd.f32 1.0, %v4814_v17 }
 0x80d   : > { %936 = vperm.xlu0 %3208, %v930_v53   ;;  %v4816_v53 = vpop.permute.xlu0 %2557  ;;  %v4825_v21 = vsub.f32 %v4425_v48, %v2301_v14  ;;  %vm2488_vm6 = vmand %vm5496_vm3, %vm2486_vm0 }
 0x80e   : > { %951 = vperm.xlu1 %3209, %v933_v63   ;;  %v4818_v63 = vpop.permute.xlu1 %2559  ;;  %vm4841_vm7 = vmand %vm2487_vm13, %vm2489_vm15 }
 0x80f   : > { %vm5495_vm2 = vcmp.ge.f32.partialorder %v4825_v21, 0.0  ;;  %vm4846_vm11 = vmand %vm2488_vm6, %vm2490_vm9  ;;  %vm5499_vm12 = vcmp.lt.f32.partialorder %v4825_v21, 14.0  ;;  %v4890_v20 = vadd.f32 1.0, %v4825_v21 }
 0x810   : > { %vm2525_vm5 = vmand %vm4841_vm7, %vm5495_vm2 }
 0x811   : > { %946 = vperm.xlu0 %3208, %v932_v7   ;;  %v2302_v7 = vmul.f32 14.0, %v4814_v17 }
 0x812   : > { %2862 = vperm.xlu1 %3209, %v2852_v39   ;;  %v4827_v39 = vpop.permute.xlu0 %2602 }
 0x814   : > { %v1795_v9 = vpop.f32.mrb[36].mxu0 }
 0x815   : > { %2857 = vperm.xlu0 %3208, %v2851_v13   ;;  %v1797_v46 = vpop.f32.mrb[37].mxu0  ;;  %v4830_v13 = vsub.f32 %v4802_v25, %v2302_v7  ;;  %v5587_v7 = vmov 0 }
 0x816   : > { %2872 = vperm.xlu1 %3209, %v2854_v18   ;;  %v1799_v5 = vpop.f32.mrb[38].mxu0  ;;  %v2320_v18 = vadd.f32 -1.0, %v2299_v49 }
 0x817   : > { %v1801_v58 = vpop.f32.mrb[39].mxu0  ;;  %v2843_v2 = vpack.c.bf16 %v1799_v5, %v1795_v9  ;;  %v4837_v9 = vpop.permute.xlu1 %2604  ;;  %vm5494_vm10 = vcmp.ge.f32.partialorder %v4830_v13, 0.0  ;;  %vm5498_vm1 = vcmp.lt.f32.partialorder %v4830_v13, 14.0  ;;  %v4900_v14 = vadd.f32 1.0, %v4830_v13 }
 0x818   : > { %v2844_v38 = vpack.c.bf16 %v1801_v58, %v1797_v46  ;;  %v2321_v46 = vadd.f32 -1.0, %v4814_v17  ;;  %vm2322_vm4 = vcmp.ge.f32.partialorder %v2320_v18, 0.0  ;;  %v4850_v58 = vpop.permute.xlu0 %2657  ;;  %vm4864_vm0 = vmand %vm4846_vm11, %vm5494_vm10  ;;  %vm2326_vm15 = vcmp.lt.f32.partialorder %v2320_v18, 14.0 }
 0x819   : > { %2867 = vperm.xlu0 %3208, %v2853_v35   ;;  %v5576_v35 = vmov 0  ;;  %vm2324_vm13 = vmand %vm5497_vm8, %vm2322_vm4  ;;  %vm5590_vm8 = vcmp.ge.f32.partialorder %v4825_v21, 0.0  ;;  %v5614_v17 = vmov 0 }
 0x81a   : > { %2963 = vperm.xlu1 %3209, %v2953_v12   ;;  %2891 = vmatprep.subr.bf16.mxu1 %v2844_v38  ;;  %v5577_v35 = vsel %vm4846_vm11, 4294967295, %v5576_v35  ;;  %vm2323_vm14 = vcmp.ge.f32.partialorder %v2321_v46, 0.0  ;;  %v4857_v12 = vadd.f32 -1.0, %v4825_v21  ;;  %vm2327_vm9 = vcmp.lt.f32.partialorder %v2321_v46, 14.0  ;;  %vm4880_vm10 = vmand %vm2525_vm5, %vm5499_vm12 }
 0x81b   : > { %2892 = vmatpush1.bf16.msra.mxu1 %v2843_v2  ;;  %v4868_v38 = vpop.permute.xlu1 %2659  ;;  %vm2325_vm6 = vmand %vm5496_vm3, %vm2323_vm14  ;;  %vm5508_vm3 = vcmp.ge.f32.partialorder %v4890_v20, 0.0  ;;  %v2531_v49 = vsel %vm4880_vm10, 1, %v5548_v41 }
 0x81c   : > { %vm4884_vm2 = vmand %vm2324_vm13, %vm2326_vm15  ;;  %vm5500_vm4 = vcmp.ge.f32.partialorder %v4857_v12, 0.0  ;;  %v4892_v51 = vpop.permute.xlu0 %2702 }
 0x81d   : > { %2958 = vperm.xlu0 %3208, %v2952_v47   ;;  %v4873_v47 = vadd.f32 -1.0, %v4830_v13  ;;  %5584 = vst [vmem:[#allocation27_spill] sm:$0xff] %v4892_v51  ;;  %vm4894_vm14 = vmand %vm2325_vm6, %vm2327_vm9  ;;  %vm5505_vm9 = vcmp.lt.f32.partialorder %v4857_v12, 14.0 }
 0x81e   : > { %2973 = vperm.xlu1 %3209, %v2955_v36   ;;  %vm4906_vm13 = vmand %vm4864_vm0, %vm5498_vm1  ;;  %v5611_v36 = vmov 0 }
 0x81f   : > { %vm5501_vm5 = vcmp.ge.f32.partialorder %v4873_v47, 0.0  ;;  %v5588_v7 = vsel %vm4906_vm13, 4294967295, %v5587_v7  ;;  %v4910_v18 = vpop.permute.xlu1 %2704  ;;  %vm2334_vm15 = vmand %vm4884_vm2, %vm5500_vm4  ;;  %vm5591_vm4 = vcmp.ge.f32.partialorder %v4830_v13, 0.0  ;;  %vm5594_vm12 = vcmp.lt.f32.partialorder %v4873_v47, 14.0 }
 0x820   : > { %5589 = vst [vmem:[#allocation28_spill] sm:$0xff] %v4910_v18  ;;  %vm2335_vm6 = vmand %vm4894_vm14, %vm5501_vm5  ;;  %v2310_v2 = vpop.permute.xlu0 %2309 }
 0x821   : > { %2968 = vperm.xlu0 %3208, %v2954_v57   ;;  %vm2385_vm1 = vmand %vm4884_vm2, %vm5590_vm8  ;;  %v5599_v57 = vmov 0  ;;  %vm5604_vm8 = vcmp.ge.f32.partialorder %v4857_v12, 0.0 }
 0x822   : > { %vm2386_vm13 = vmand %vm4894_vm14, %vm5591_vm4  ;;  %vm5597_vm4 = vcmp.ge.f32.partialorder %v4900_v14, 0.0 }
 0x823   : > { %vm4934_vm5 = vmand %vm2334_vm15, %vm5505_vm9  ;;  %vm5513_vm9 = vcmp.lt.f32.partialorder %v4900_v14, 14.0  ;;  %v4954_v30 = vpop.permute.xlu1 %2311 }
 0x824   : > { %vm2436_vm0 = vmand %vm4884_vm2, %vm5508_vm3  ;;  %vm5598_vm2 = vcmp.lt.f32.partialorder %v4825_v21, 14.0  ;;  %v2373_v1 = vpop.permute.xlu0 %2372 }
 0x825   : > { %vm4945_vm11 = vmand %vm2335_vm6, %vm5594_vm12  ;;  %vm5601_vm12 = vcmp.lt.f32.partialorder %v4830_v13, 14.0 }
 0x826   : > { %vm2437_vm15 = vmand %vm4894_vm14, %vm5597_vm4 }
 0x827   : > { %vm4958_vm3 = vmand %vm2385_vm1, %vm5598_vm2  ;;  %vm5605_vm1 = vcmp.lt.f32.partialorder %v4890_v20, 14.0  ;;  %vm5609_vm2 = vnez %v5577_v35  ;;  %v2375_v32 = vpop.permute.xlu1 %2374  ;;  %v5045_v35 = vsel %vm4945_vm11, 1, %v5548_v41 }
 0x828   : > { %v5600_v57 = vsel %vm4958_vm3, 4294967295, %v5599_v57  ;;  %vm4964_vm6 = vmand %vm2386_vm13, %vm5601_vm12  ;;  %vm5608_vm13 = vcmp.ge.f32.partialorder %v4873_v47, 0.0 }
 0x829   : > { %v5603_v55 = vsel %vm4964_vm6, 4294967295, %v5602_v55  ;;  %vm2493_vm14 = vmand %vm4841_vm7, %vm5604_vm8  ;;  %vm5610_vm8 = vnez %v5588_v7  ;;  %vm2617_vm6 = vcmp.ge.f32.partialorder %v2615_v3, 0.0  ;;  %v5617_v7 = vmov 0 }
 0x82a   : > { %vm4978_vm4 = vmand %vm2436_vm0, %vm5605_vm1  ;;  %v2532_v24 = vsel %vm5610_vm8, 1, %v5548_v41  ;;  %vm5613_vm0 = vcmp.lt.f32.partialorder %v4857_v12, 14.0  ;;  %vm5632_vm11 = vnez %v5603_v55 }
 0x82b   : > { %v5607_v56 = vsel %vm4978_vm4, 4294967295, %v5606_v56  ;;  %vm2494_vm12 = vmand %vm5609_vm2, %vm5608_vm13  ;;  %vm2533_vm4 = vcmp.eq.s32.totalorder %v2531_v49, 1  ;;  %vm5616_vm13 = vcmp.lt.f32.partialorder %v4873_v47, 14.0  ;;  %vm2534_vm8 = vcmp.eq.s32.totalorder %v2532_v24, 1 }
 0x82c   : > { %vm4991_vm10 = vmand %vm2437_vm15, %vm5513_vm9  ;;  %vm2618_vm15 = vcmp.ge.f32.partialorder %v2616_v33, 0.0  ;;  %vm5619_vm9 = vcmp.ge.f32.partialorder %v4890_v20, 0.0  ;;  %v2535_v49 = vsel %vm2533_vm4, %v4636_v31, 0.0  ;;  %v2536_v51 = vsel %vm2534_vm8, %v4662_v60, 0.0 }
 0x82d   : > { %v5612_v36 = vsel %vm4991_vm10, 4294967295, %v5611_v36  ;;  %vm4997_vm1 = vmand %vm2493_vm14, %vm5613_vm0  ;;  %vm5622_vm14 = vcmp.lt.f32.partialorder %v4425_v48, 196.0  ;;  %v2537_v24 = vsel %vm2533_vm4, %v4633_v28, 0.0  ;;  %v2538_v48 = vsel %vm2534_vm8, %v4657_v40, 0.0 }
 0x82e   : > { %v5615_v17 = vsel %vm4997_vm1, 4294967295, %v5614_v17  ;;  %vm5003_vm3 = vmand %vm2494_vm12, %vm5616_vm13  ;;  %vm2621_vm12 = vcmp.lt.f32.partialorder %v2615_v3, 14.0  ;;  %vm5623_vm13 = vcmp.lt.f32.partialorder %v4802_v25, 196.0  ;;  %vm2622_vm1 = vcmp.lt.f32.partialorder %v2616_v33, 14.0  ;;  %v2424_v33 = vpop.permute.xlu0 %2423 }
 0x82f   : > { %v5618_v7 = vsel %vm5003_vm3, 4294967295, %v5617_v7  ;;  %vm5011_vm10 = vmand %vm4841_vm7, %vm5619_vm9  ;;  %vm5624_vm7 = vcmp.ge.f32.partialorder %v4900_v14, 0.0  ;;  %v2342_v3 = vsel %vm4934_vm5, 1, %v5548_v41  ;;  %v5035_v28 = vmul.f32 %v4697_v0, %v2535_v49 }
 0x830   : > { %vm2619_vm0 = vmand %vm5622_vm14, %vm2617_vm6  ;;  %vm5520_vm4 = vcmp.lt.s32.totalorder %v3529_v10, 15  ;;  %v5048_v40 = vmul.f32 %v4697_v0, %v2536_v51  ;;  %v5051_v46 = vmul.f32 %v4699_v19, %v2537_v24  ;;  %vm5631_vm8 = vnez %v5600_v57  ;;  %v2426_v24 = vpop.permute.xlu1 %2425 }
 0x831   : > { %vm2620_vm3 = vmand %vm5623_vm13, %vm2618_vm15  ;;  %v2393_v60 = vsel %vm5631_vm8, 1, %v5548_v41  ;;  %v2394_v59 = vsel %vm5632_vm11, 1, %v5548_v41  ;;  %vm5633_vm15 = vcmp.lt.f32.partialorder %v4890_v20, 14.0  ;;  %v5073_v51 = vmul.f32 %v4699_v19, %v2538_v48 }
 0x832   : > { %vm5026_vm9 = vmand %vm5609_vm2, %vm5624_vm7  ;;  %vm2376_vm2 = vcmp.lt.s32.totalorder %v3529_v10, 14  ;;  %vm5642_vm8 = vnez %v5618_v7  ;;  %vm5643_vm11 = vcmp.ge.f32.partialorder %v4873_v47, 0.0  ;;  %v2475_v5 = vpop.permute.xlu0 %2474 }
 0x833   : > { %vm5037_vm6 = vmand %vm2619_vm0, %vm2621_vm12  ;;  %vm5637_vm0 = vnez %v5612_v36  ;;  %vm5639_vm12 = vcmp.ge.f32.partialorder %v4857_v12, 0.0  ;;  %v2316_v36 = vsel %vm5520_vm4, %v2310_v2, %v4790_v6  ;;  %v2378_v19 = vsel %vm2376_vm2, %v4799_v8, %v2375_v32 }
 0x834   : > { %vm5053_vm5 = vmand %vm2620_vm3, %vm2622_vm1  ;;  %vm2344_vm3 = vcmp.eq.s32.totalorder %v2342_v3, 1  ;;  %vm5636_vm1 = vnez %v5607_v56  ;;  %v5083_v55 = vsel %vm5637_vm0, 1, %v5548_v41  ;;  %v2314_v56 = vsel %vm5520_vm4, %v4790_v6, %v2310_v2 }
 0x835   : > { %vm5068_vm14 = vmand %vm5011_vm10, %vm5633_vm15  ;;  %v5078_v57 = vsel %vm5636_vm1, 1, %v5548_v41  ;;  %vm5638_vm10 = vnez %v5615_v17  ;;  %v5108_v17 = vsel %vm5642_vm8, 1, %v5548_v41  ;;  %vm5646_vm4 = vcmp.lt.f32.partialorder %v4900_v14, 14.0 }
 0x836   : > { %v5088_v18 = vsel %vm5638_vm10, 1, %v5548_v41  ;;  %vm5094_vm13 = vmand %vm5037_vm6, %vm5639_vm12  ;;  %v2379_v6 = vsel %vm2376_vm2, %v2373_v1, %v4797_v45  ;;  %vm2447_vm7 = vcmp.eq.s32.totalorder %v5083_v55, 1  ;;  %vm5647_vm0 = vcmp.lt.f32.partialorder %v4857_v12, 14.0 }
 0x837   : > { %vm5114_vm15 = vmand %vm5053_vm5, %vm5643_vm11  ;;  %vm2446_vm11 = vcmp.eq.s32.totalorder %v5078_v57, 1  ;;  %v2346_v2 = vsel %vm2344_vm3, %v2316_v36, 0.0  ;;  %vm5648_vm10 = vcmp.eq.s32.totalorder %v5045_v35, 1  ;;  %v5141_v31 = vsel %vm5068_vm14, 1, %v5548_v41 }
 0x838   : > { %vm2573_vm8 = vmand %vm5026_vm9, %vm5646_vm4  ;;  %v2347_v7 = vsel %vm5648_vm10, %v2314_v56, 0.0  ;;  %vm2502_vm9 = vcmp.eq.s32.totalorder %v5108_v17, 1  ;;  %vm5649_vm4 = vcmp.lt.f32.partialorder %v4873_v47, 14.0  ;;  %v2377_v12 = vsel %vm2376_vm2, %v4797_v45, %v2373_v1  ;;  %v2477_v45 = vpop.permute.xlu1 %2476 }
 0x839   : > { %vm2627_vm12 = vmand %vm5094_vm13, %vm5647_vm0  ;;  %v2380_v56 = vsel %vm2376_vm2, %v2375_v32, %v4799_v8  ;;  %v5157_v0 = vsel %vm2573_vm8, 1, %v5548_v41  ;;  %vm5650_vm14 = vcmp.lt.s32.totalorder %v3529_v10, 15  ;;  %vm5651_vm13 = vcmp.eq.s32.totalorder %v2393_v60, 1 }
 0x83a   : > { %vm2628_vm1 = vmand %vm5114_vm15, %vm5649_vm4  ;;  %v2317_v47 = vsel %vm5650_vm14, %v4954_v30, %v4795_v44  ;;  %v2397_v36 = vsel %vm5651_vm13, %v2379_v6, 0.0  ;;  %vm5652_vm15 = vcmp.lt.s32.totalorder %v3529_v10, 13  ;;  %v5168_v48 = vsel %vm2627_vm12, 1, %v5548_v41 }
 0x83b   : > { %v2430_v1 = vsel %vm5652_vm15, %v2424_v33, %v4804_v34  ;;  %v2360_v32 = vmul.f32 %v4681_v11, %v2346_v2  ;;  %v2361_v8 = vmul.f32 %v4681_v11, %v2347_v7  ;;  %vm5653_vm2 = vmmov %vm5652_vm15  ;;  %vm2565_vm0 = vcmp.lt.s32.totalorder %v3529_v10, 127 }
 0x83c   : > { %v2428_v16 = vsel %vm5653_vm2, %v4804_v34, %v2424_v33  ;;  %v5177_v6 = vsel %vm2628_vm1, 1, %v5548_v41  ;;  %vm5654_vm10 = vmmov %vm5650_vm14  ;;  %vm5655_vm12 = vcmp.eq.s32.totalorder %v2394_v59, 1  ;;  %vm5658_vm14 = vcmp.ge.f32.partialorder %v4825_v21, 0.0 }
 0x83d   : > { %v2315_v54 = vsel %vm5654_vm10, %v4795_v44, %v4954_v30  ;;  %v2398_v42 = vsel %vm5655_vm12, %v2377_v12, 0.0  ;;  %vm5656_vm8 = vmmov %vm5651_vm13  ;;  %v2348_v33 = vsel %vm2344_vm3, %v2317_v47, 0.0  ;;  %v2411_v7 = vmul.f32 %v4685_v52, %v2397_v36 }
 0x83e   : > { %v2399_v2 = vsel %vm5656_vm8, %v2380_v56, 0.0  ;;  %vm5657_vm4 = vmmov %vm5655_vm12  ;;  %v2448_v30 = vsel %vm2446_vm11, %v2430_v1, 0.0  ;;  %vm5661_vm1 = vcmp.lt.s32.totalorder %v3529_v10, 1  ;;  %v2449_v44 = vsel %vm2447_vm7, %v2428_v16, 0.0 }
 0x83f   : > { %v2400_v11 = vsel %vm5657_vm4, %v2378_v19, 0.0  ;;  %vm5190_vm13 = vmand %vm5037_vm6, %vm5658_vm14  ;;  %v2481_v60 = vsel %vm5661_vm1, %v2475_v5, %v4810_v62  ;;  %v2431_v3 = vsel %vm5653_vm2, %v2426_v24, %v4806_v37  ;;  %vm2578_vm10 = vcmp.eq.s32.totalorder %v5141_v31, 1  ;;  %v2562_v19 = vpop.permute.xlu0 %2561 }
 0x840   : > { %vm5662_vm15 = vmmov %vm5653_vm2  ;;  %vm2579_vm12 = vcmp.eq.s32.totalorder %v5157_v0, 1  ;;  %vm5664_vm8 = vcmp.ge.f32.partialorder %v4830_v13, 0.0  ;;  %vm5667_vm14 = vcmp.eq.s32.totalorder %v5045_v35, 1  ;;  %v2462_v47 = vmul.f32 %v4689_v29, %v2448_v30 }
 0x841   : > { %v2429_v59 = vsel %vm5662_vm15, %v4806_v37, %v2426_v24  ;;  %vm5663_vm3 = vmmov %vm5661_vm1  ;;  %v2349_v37 = vsel %vm5667_vm14, %v2315_v54, 0.0  ;;  %v2412_v24 = vmul.f32 %v4685_v52, %v2398_v42  ;;  %vm5668_vm1 = vcmp.lt.f32.partialorder %v4825_v21, 14.0  ;;  %v2564_v42 = vpop.permute.xlu1 %2563 }
 0x842   : > { %v2479_v12 = vsel %vm5663_vm3, %v4810_v62, %v2475_v5  ;;  %vm5218_vm4 = vmand %vm5053_vm5, %vm5664_vm8  ;;  %v2413_v62 = vmul.f32 %v4687_v23, %v2399_v2  ;;  %v2414_v5 = vmul.f32 %v4687_v23, %v2400_v11  ;;  %vm5671_vm2 = vcmp.eq.s32.totalorder %v5088_v18, 1 }
 0x843   : > { %vm5231_vm15 = vmand %vm5190_vm13, %vm5668_vm1  ;;  %v2503_v35 = vsel %vm5671_vm2, %v2481_v60, 0.0  ;;  %v2480_v52 = vsel %vm5663_vm3, %v4812_v61, %v2477_v45  ;;  %vm2610_vm14 = vcmp.lt.s32.totalorder %v3529_v10, 115  ;;  %v2463_v54 = vmul.f32 %v4689_v29, %v2449_v44 }
 0x844   : > { %vm5672_vm8 = vmmov %vm5663_vm3  ;;  %v2450_v21 = vsel %vm2446_vm11, %v2431_v3, 0.0  ;;  %v2451_v36 = vsel %vm2447_vm7, %v2429_v59, 0.0  ;;  %v2504_v1 = vsel %vm2502_vm9, %v2479_v12, 0.0  ;;  %vm5673_vm13 = vcmp.lt.f32.partialorder %v4830_v13, 14.0 }
 0x845   : > { %v2482_v23 = vsel %vm5672_vm8, %v2477_v45, %v4812_v61  ;;  %vm5256_vm1 = vmand %vm5218_vm4, %vm5673_vm13  ;;  %v2362_v45 = vmul.f32 %v4683_v15, %v2348_v33  ;;  %v2363_v29 = vmul.f32 %v4683_v15, %v2349_v37  ;;  %v2415_v57 = vadd.f32 %v2411_v7, %v2360_v32  ;;  %v2607_v7 = vpop.permute.xlu0 %2606  ;;  %v2609_v12 = vpop.permute.xlu1 %2608 }
 0x846   : > { %vm2665_vm11 = vcmp.lt.s32.totalorder %v3529_v10, 114  ;;  %v5266_v55 = vsel %vm5231_vm15, 1, %v5548_v41  ;;  %vm5676_vm7 = vcmp.ge.f32.partialorder %v4890_v20, 0.0  ;;  %v2416_v2 = vadd.f32 %v2412_v24, %v2361_v8 }
 0x847   : > { %vm5272_vm4 = vmand %vm5037_vm6, %vm5676_vm7  ;;  %v2517_v11 = vmul.f32 %v4693_v22, %v2503_v35  ;;  %v2505_v15 = vsel %vm5671_vm2, %v2482_v23, 0.0  ;;  %v2506_v32 = vsel %vm2502_vm9, %v2480_v52, 0.0  ;;  %vm5679_vm15 = vcmp.ge.f32.partialorder %v4900_v14, 0.0 }
 0x848   : > { %vm5285_vm3 = vmand %vm5053_vm5, %vm5679_vm15  ;;  %v2464_v25 = vmul.f32 %v4691_v26, %v2450_v21  ;;  %v2465_v8 = vmul.f32 %v4691_v26, %v2451_v36  ;;  %v2518_v33 = vmul.f32 %v4693_v22, %v2504_v1  ;;  %v5295_v18 = vsel %vm5256_vm1, 1, %v5548_v41 }
 0x849   : > { %v2417_v17 = vadd.f32 %v2413_v62, %v2362_v45  ;;  %v2418_v30 = vadd.f32 %v2414_v5, %v2363_v29  ;;  %v2466_v60 = vadd.f32 %v2462_v47, %v2415_v57  ;;  %v2467_v49 = vadd.f32 %v2463_v54, %v2416_v2  ;;  %v2662_v35 = vpop.permute.xlu0 %2661  ;;  %v2664_v1 = vpop.permute.xlu1 %2663 }
 0x84a   : > { %vm5682_vm6 = vcmp.lt.f32.partialorder %v4890_v20, 14.0  ;;  %v2519_v26 = vmul.f32 %v4695_v27, %v2505_v15  ;;  %v2520_v22 = vmul.f32 %v4695_v27, %v2506_v32  ;;  %v2566_v59 = vsel %vm2565_vm0, %v4816_v53, %v2562_v19  ;;  %v5686_v15 = vld [vmem:[#allocation16_spill] sm:$0xff] }
 0x84b   : > { %vm5301_vm5 = vmand %vm5272_vm4, %vm5682_vm6  ;;  %v2568_v3 = vsel %vm2565_vm0, %v2562_v19, %v4816_v53  ;;  %vm5685_vm9 = vcmp.lt.f32.partialorder %v4900_v14, 14.0  ;;  %v2521_v20 = vadd.f32 %v2517_v11, %v2466_v60  ;;  %vm2633_vm13 = vcmp.eq.s32.totalorder %v5168_v48, 1 }
 0x84c   : > { %vm2718_vm8 = vmand %vm5285_vm3, %vm5685_vm9  ;;  %vm2634_vm1 = vcmp.eq.s32.totalorder %v5177_v6, 1  ;;  %vm2678_vm7 = vcmp.eq.s32.totalorder %v5266_v55, 1  ;;  %v2468_v27 = vadd.f32 %v2464_v25, %v2417_v17  ;;  %v2469_v16 = vadd.f32 %v2465_v8, %v2418_v30  ;;  %v5688_v55 = vld [vmem:[#allocation18_spill] sm:$0xff] }
 0x84d   : > { %v2522_v37 = vadd.f32 %v2518_v33, %v2467_v49  ;;  %vm2679_vm4 = vcmp.eq.s32.totalorder %v5295_v18, 1  ;;  %v2580_v53 = vsel %vm2578_vm10, %v2566_v59, 0.0  ;;  %v2581_v14 = vsel %vm2579_vm12, %v2568_v3, 0.0 }
 0x84e   : > { %v5328_v19 = vsel %vm5301_vm5, 1, %v5548_v41  ;;  %v5331_v24 = vsel %vm2718_vm8, 1, %v5548_v41  ;;  %v2523_v62 = vadd.f32 %v2519_v26, %v2468_v27  ;;  %v2524_v5 = vadd.f32 %v2520_v22, %v2469_v16 }
 0x84f   : > { %v2567_v56 = vsel %vm2565_vm0, %v4818_v63, %v2564_v42  ;;  %v2569_v47 = vsel %vm2565_vm0, %v2564_v42, %v4818_v63  ;;  %v2553_v52 = vadd.f32 %v5035_v28, %v2521_v20  ;;  %v2611_v23 = vsel %vm2610_vm14, %v4827_v39, %v2607_v7  ;;  %v5689_v20 = vld [vmem:[#allocation27_spill] sm:$0xff] }
 0x850   : > { %v2613_v54 = vsel %vm2610_vm14, %v2607_v7, %v4827_v39  ;;  %v2612_v21 = vsel %vm2610_vm14, %v4837_v9, %v2609_v12  ;;  %vm2710_vm2 = vcmp.lt.s32.totalorder %v3529_v10, 113  ;;  %v2554_v36 = vadd.f32 %v5048_v40, %v2522_v37  ;;  %v5687_v7 = vld [vmem:[#allocation17_spill] sm:$0xff] }
 0x851   : > { %v2594_v63 = vmul.f32 %v4701_v43, %v2580_v53  ;;  %v2595_v28 = vmul.f32 %v4701_v43, %v2581_v14  ;;  %v2614_v42 = vsel %vm2610_vm14, %v2609_v12, %v4837_v9  ;;  %v2582_v39 = vsel %vm2578_vm10, %v2567_v56, 0.0  ;;  %v5690_v56 = vld [vmem:[#allocation19_spill] sm:$0xff] }
 0x852   : > { %v2583_v61 = vsel %vm2579_vm12, %v2569_v47, 0.0  ;;  %v2666_v45 = vsel %vm2665_vm11, %v4850_v58, %v2662_v35  ;;  %v2668_v40 = vsel %vm2665_vm11, %v2662_v35, %v4850_v58  ;;  %v2555_v43 = vadd.f32 %v5051_v46, %v2523_v62 }
 0x853   : > { %v2635_v9 = vsel %vm2633_vm13, %v2611_v23, 0.0  ;;  %v2636_v31 = vsel %vm2634_vm1, %v2613_v54, 0.0  ;;  %v2637_v0 = vsel %vm2633_vm13, %v2612_v21, 0.0  ;;  %v2556_v29 = vadd.f32 %v5073_v51, %v2524_v5 }
 0x854   : > { %v2638_v57 = vsel %vm2634_vm1, %v2614_v42, 0.0  ;;  %v2667_v58 = vsel %vm2665_vm11, %v4868_v38, %v2664_v1  ;;  %v2669_v46 = vsel %vm2665_vm11, %v2664_v1, %v4868_v38  ;;  %v2596_v13 = vmul.f32 %v4703_v50, %v2582_v39  ;;  %v5692_v39 = vld [vmem:[#allocation20_spill] sm:$0xff] }
 0x855   : > { %v2597_v2 = vmul.f32 %v4703_v50, %v2583_v61  ;;  %v2680_v48 = vsel %vm2678_vm7, %v2666_v45, 0.0  ;;  %v2681_v51 = vsel %vm2679_vm4, %v2668_v40, 0.0  ;;  %v2649_v6 = vmul.f32 %v4705_v4, %v2635_v9  ;;  %v5693_v40 = vld [vmem:[#allocation13_spill] sm:$0xff] }
 0x856   : > { %v2650_v11 = vmul.f32 %v4705_v4, %v2636_v31  ;;  %v2651_v32 = vmul.f32 %v5686_v15, %v2637_v0  ;;  %vm2723_vm0 = vcmp.eq.s32.totalorder %v5328_v19, 1  ;;  %v2652_v38 = vmul.f32 %v5686_v15, %v2638_v57  ;;  %v5695_v31 = vld [vmem:[#allocation15_spill] sm:$0xff]  ;;  %v5697_v57 = vld [vmem:[#allocation22_spill] sm:$0xff]  ;;  %v5699_v15 = vld [vmem:[#allocation25_spill] sm:$0xff] }
 0x857   : > { %v2682_v50 = vsel %vm2678_vm7, %v2667_v58, 0.0  ;;  %v2683_v25 = vsel %vm2679_vm4, %v2669_v46, 0.0  ;;  %v2598_v8 = vadd.f32 %v2594_v63, %v2553_v52  ;;  %v2599_v33 = vadd.f32 %v2595_v28, %v2554_v36  ;;  %v5691_v52 = vld [vmem:[#allocation28_spill] sm:$0xff] }
 0x858   : > { %v2694_v17 = vmul.f32 %v5687_v7, %v2680_v48  ;;  %v2695_v4 = vmul.f32 %v5687_v7, %v2681_v51  ;;  %v2600_v60 = vadd.f32 %v2596_v13, %v2555_v43  ;;  %v2601_v49 = vadd.f32 %v2597_v2, %v2556_v29  ;;  %v5694_v43 = vld [vmem:[#allocation21_spill] sm:$0xff]  ;;  %v5696_v29 = vld [vmem:[#allocation12_spill] sm:$0xff] }
 0x859   : > { %vm2724_vm10 = vcmp.eq.s32.totalorder %v5331_v24, 1  ;;  %v2653_v44 = vadd.f32 %v2649_v6, %v2598_v8  ;;  %v2654_v26 = vadd.f32 %v2650_v11, %v2599_v33  ;;  %v2696_v22 = vmul.f32 %v5688_v55, %v2682_v50  ;;  %v5698_v24 = vld [vmem:[#allocation14_spill] sm:$0xff]  ;;  %v5701_v50 = vld [vmem:[#allocation23_spill] sm:$0xff]  ;;  %v5702_v8 = vld [vmem:[#allocation24_spill] sm:$0xff] }
 0x85a   : > { %v2697_v18 = vmul.f32 %v5688_v55, %v2683_v25  ;;  %v2655_v3 = vadd.f32 %v2651_v32, %v2600_v60  ;;  %v2656_v12 = vadd.f32 %v2652_v38, %v2601_v49  ;;  %v2291_v9 = vadd.f32 %v5694_v43, %v5693_v40  ;;  %v5703_v60 = vld [vmem:[#allocation3_spill] sm:$0xff]  ;;  %v5704_v49 = vld [vmem:[#allocation2_spill] sm:$0xff] }
 0x85b   : > { %v2698_v37 = vadd.f32 %v2694_v17, %v2653_v44  ;;  %v2699_v53 = vadd.f32 %v2695_v4, %v2654_v26  ;;  %v2292_v10 = vadd.f32 %v5694_v43, %v5695_v31  ;;  %v2293_v19 = vadd.f32 %v5697_v57, %v5696_v29  ;;  %v5710_v31 = vld [vmem:[#allocation6_spill] sm:$0xff] }
 0x85c   : > { %v2700_v21 = vadd.f32 %v2696_v22, %v2655_v3  ;;  %v2701_v36 = vadd.f32 %v2697_v18, %v2656_v12  ;;  %v2294_v13 = vadd.f32 %v5697_v57, %v5698_v24  ;;  %vm5705_vm12 = vcmask 130048  }
 0x85d   : > { %vm5706_vm14 = vcmask 261120  }
 0x85e   : > { %vm5707_vm11 = vmmov %vm5706_vm14 }
 0x878   : > { %v2269_v34 = vpop.xlane.xlu0 %2268 }
 0x879   : > { %3356 = vrcp.f32 %v2269_v34  ;;  %v5700_v34 = vld [vmem:[#allocation26_spill] sm:$0xff] }
 0x87a   : > { %v2272_v30 = vpop.xlane.xlu1 %2271 }
 0x87b   : > { %3358 = vrcp.f32 %v2272_v30 }
 0x87c   : > { %v2707_v59 = vpop.permute.xlu0 %2706 }
 0x87d   : > { %v2711_v27 = vsel %vm2710_vm2, %v5689_v20, %v2707_v59  ;;  %v2713_v16 = vsel %vm2710_vm2, %v2707_v59, %v5689_v20 }
 0x87e   : > { %v2725_v14 = vsel %vm2723_vm0, %v2711_v27, 0.0  ;;  %v2726_v62 = vsel %vm2724_vm10, %v2713_v16, 0.0  ;;  %v2709_v5 = vpop.permute.xlu1 %2708 }
 0x87f   : > { %v2739_v47 = vmul.f32 %v5690_v56, %v2725_v14  ;;  %v2740_v35 = vmul.f32 %v5690_v56, %v2726_v62  ;;  %v2712_v23 = vsel %vm2710_vm2, %v5691_v52, %v2709_v5  ;;  %v2714_v54 = vsel %vm2710_vm2, %v2709_v5, %v5691_v52 }
 0x880   : > { %v2727_v63 = vsel %vm2723_vm0, %v2712_v23, 0.0  ;;  %v2728_v28 = vsel %vm2724_vm10, %v2714_v54, 0.0 }
 0x881   : > { %v2743_v42 = vadd.f32 %v2739_v47, %v2698_v37  ;;  %v2744_v1 = vadd.f32 %v2740_v35, %v2699_v53  ;;  %v2741_v61 = vmul.f32 %v5692_v39, %v2727_v63  ;;  %v2742_v45 = vmul.f32 %v5692_v39, %v2728_v28  ;;  %v3240_v37 = vld [vmem:[%s5479_s2 + $0x70] sm:$0xff]   ;;  %v3241_v53 = vld [vmem:[%s5479_s2 + $0x78] sm:$0xff]  }
 0x882   : > { %v849_v62 = vpop.permute.xlu1 %848  ;;  %v5708_v28 = vld [vmem:[#allocation4_spill] sm:$0xff] }
 0x883   : > { %v3357_v0 = vpop.eup %3356  ;;  %v2745_v58 = vadd.f32 %v2741_v61, %v2700_v21  ;;  %v2746_v46 = vadd.f32 %v2742_v45, %v2701_v36  ;;  %v2747_v48 = vadd.f32 %v2743_v42, %v2291_v9  ;;  %v2748_v6 = vadd.f32 %v2744_v1, %v2292_v10  ;;  %v5709_v61 = vld [vmem:[#allocation5_spill] sm:$0xff] }
 0x884   : > { %v2276_v32 = vmul.f32 %v3357_v0, %v5699_v15  ;;  %v2275_v25 = vmul.f32 %v3357_v0, %v5701_v50  ;;  %v844_v14 = vpop.permute.xlu0 %843  ;;  %v916_v10 = vadd.f32 %v5710_v31, %v849_v62 }
 0x885   : > { %v3359_v2 = vpop.eup %3358  ;;  %v2749_v51 = vadd.f32 %v2745_v58, %v2293_v19  ;;  %v2750_v11 = vadd.f32 %v2746_v46, %v2294_v13  ;;  %v912_v42 = vadd.f32 %v5708_v28, %v844_v14  ;;  %v914_v45 = vadd.f32 %v5709_v61, %v844_v14  ;;  %v5711_v58 = vld [vmem:[#allocation7_spill] sm:$0xff] }
 0x886   : > { %v2278_v38 = vmul.f32 %v3359_v2, %v5700_v34  ;;  %v2277_v33 = vmul.f32 %v3359_v2, %v5702_v8  ;;  %v859_v56 = vpop.permute.xlu1 %858  ;;  %v918_v46 = vadd.f32 %v5711_v58, %v849_v62  ;;  %v5712_v8 = vld [vmem:[#allocation8_spill] sm:$0xff] }
 0x887   : > { %v2752_v7 = vpack.c.bf16 %v2750_v11, %v2748_v6  ;;  %v2751_v17 = vpack.c.bf16 %v2749_v51, %v2747_v48 }
 0x888   : > { %v2754_v4 = vpack.c.bf16 %v2278_v38, %v2276_v32  ;;  %v2753_v30 = vpack.c.bf16 %v2277_v33, %v2275_v25  ;;  %v854_v5 = vpop.permute.xlu0 %853 }
 0x889   : > { %2787 = vmatprep.mubr.bf16.mxu0 %v2752_v7  ;;  %v922_v33 = vadd.f32 %v5712_v8, %v854_v5 }
 0x88a   : > { %2755 = vmatprep.subr.bf16.mxu0 %v2754_v4  ;;  %v942_v35 = vpop.permute.xlu1 %941  ;;  %v5713_v4 = vld [vmem:[#allocation9_spill] sm:$0xff] }
 0x88b   : > { %2756 = vmatpush1.bf16.xpose.msra.mxu0 %v2753_v30  ;;  %v956_v51 = vmul.f32 %v942_v35, %v916_v10  ;;  %v957_v15 = vmul.f32 %v942_v35, %v918_v46  ;;  %v924_v30 = vadd.f32 %v5713_v4, %v854_v5 }
 0x88c   : > { %2800 = vmatprep.subr.bf16.mxu0 %v5703_v60  ;;  %v937_v47 = vpop.permute.xlu0 %936 }
 0x88d   : > { %v954_v0 = vmul.f32 %v937_v47, %v912_v42  ;;  %v955_v24 = vmul.f32 %v937_v47, %v914_v45 }
 0x88e   : > { %v952_v23 = vpop.permute.xlu1 %951 }
 0x890   : > { %v947_v52 = vpop.permute.xlu0 %946 }
 0x892   : > { %2788 = vmatmul.mubr.bf16.vlgmr.msra.gmra.mrb[40].mxu0 %v2751_v17  ;;  %v2863_v21 = vpop.permute.xlu1 %2862 }
 0x893   : > { %2801 = vmatpush1.bf16.msra.mxu0 %v5704_v49  ;;  %2832 = vmatprep.mubr.bf16.mxu0 %v5548_v41 }
 0x894   : > { %v2858_v54 = vpop.permute.xlu0 %2857 }
 0x896   : > { %v2873_v63 = vpop.permute.xlu1 %2872 }
 0x898   : > { %v2868_v36 = vpop.permute.xlu0 %2867 }
 0x89a   : > { %v2964_v13 = vpop.permute.xlu1 %2963 }
 0x89c   : > { %v2959_v40 = vpop.permute.xlu0 %2958 }
 0x8a0   : > { %v2969_v60 = vpop.permute.xlu0 %2968 }
 0x965   : > { %v2789_v44 = vpop.f32.mrb[40].mxu0 }
 0x966   : > { %v2791_v26 = vpop.f32.mrb[41].mxu0 }
 0x967   : > { %v2792_v55 = vpop.f32.mrb[42].mxu0  ;;  %v5714_v26 = vld [vmem:[#allocation10_spill] sm:$0xff] }
 0x968   : > { %v2796_v22 = vpack.c.bf16 %v2792_v55, %v2789_v44  ;;  %v2794_v18 = vpop.f32.mrb[43].mxu0  ;;  %v926_v55 = vadd.f32 %v5714_v26, %v859_v56 }
 0x96a   : > { %3123 = vmatmul.mubr.msk.bf16.vlgmr.msra.gmra.mrb[44].mxu0 %vm5705_vm12, %v2796_v22  ;;  %v958_v22 = vmul.f32 %v947_v52, %v922_v33  ;;  %v960_v14 = vmul.f32 %v952_v23, %v926_v55 }
 0xa3d   : > { %v2834_v59 = vpop.f32.mrb[44].mxu0 }
 0xa3e   : > { %v2836_v3 = vpop.f32.mrb[45].mxu0 }
 0xa3f   : > { %v2838_v12 = vpop.f32.mrb[46].mxu0 }
 0xa40   : > { %v2845_v20 = vpack.c.bf16 %v2838_v12, %v2834_v59  ;;  %v2840_v27 = vpop.f32.mrb[47].mxu0  ;;  %v5715_v12 = vld [vmem:[#allocation11_spill] sm:$0xff] }
 0xa41   : > { %v2846_v16 = vpack.c.bf16 %v2840_v27, %v2836_v3  ;;  %v959_v27 = vmul.f32 %v947_v52, %v924_v30 }
 0xa43   : > { %2893 = vmatprep.subr.bf16.mxu1 %v2846_v16  ;;  %v2974_v16 = vpop.permute.xlu1 %2973 }
 0xa44   : > { %2894 = vmatpush1.bf16.msra.mxu1 %v2845_v20  ;;  %v928_v20 = vadd.f32 %v5715_v12, %v859_v56 }
 0xa46   : > { %v961_v47 = vmul.f32 %v952_v23, %v928_v20 }
 0xa47   : > { %3126 = vmatmul.mubr.msk.bf16.vlgmr.msra.gmra.mrb[40].mxu1 %vm5706_vm14, %v3240_v37 }
 0xa48   : > { %2933 = vmatprep.mubr.bf16.mxu1 %v5548_v41 }
 0xa4f   : > { %3127 = vmatmul.mubr.msk.bf16.gmra.mrb[44].mxu1 %vm5707_vm11, %v3241_v53 }
 0xb1a   : > { %v2925_v41 = vpop.f32.mrb[40].mxu1 }
 0xb1b   : > { %v2926_v1 = vadd.f32 %v2925_v41, %v2858_v54  ;;  %v2927_v39 = vpop.f32.mrb[41].mxu1 }
 0xb1c   : > { %v2928_v43 = vadd.f32 %v2927_v39, %v2858_v54  ;;  %v2929_v9 = vpop.f32.mrb[42].mxu1 }
 0xb1d   : > { %v2976_v29 = vmul.f32 %v2959_v40, %v2926_v1  ;;  %v2930_v57 = vadd.f32 %v2929_v9, %v2863_v21  ;;  %v2931_v19 = vpop.f32.mrb[43].mxu1 }
 0xb1e   : > { %v2977_v2 = vmul.f32 %v2959_v40, %v2928_v43  ;;  %v2932_v48 = vadd.f32 %v2931_v19, %v2863_v21 }
 0xb1f   : > { %v2984_v6 = vadd.f32 %v2976_v29, %v954_v0  ;;  %v2978_v11 = vmul.f32 %v2964_v13, %v2930_v57 }
 0xb20   : > { %v2985_v32 = vadd.f32 %v2977_v2, %v955_v24  ;;  %v2979_v34 = vmul.f32 %v2964_v13, %v2932_v48 }
 0xb21   : > { %2992 = vst [vmem:[%s5459_s21] sm:$0xff] %v2984_v6  ;;  %v2986_v38 = vadd.f32 %v2978_v11, %v956_v51 }
 0xb22   : > { %2993 = vst [vmem:[%s5459_s21 + $0x8] sm:$0xff] %v2985_v32  ;;  %v2987_v50 = vadd.f32 %v2979_v34, %v957_v15  ;;  %v2935_v25 = vpop.f32.mrb[44].mxu1 }
 0xb23   : > { %2994 = vst [vmem:[%s5459_s21 + $0x10] sm:$0xff] %v2986_v38  ;;  %v2936_v7 = vadd.f32 %v2935_v25, %v2868_v36  ;;  %v2937_v17 = vpop.f32.mrb[45].mxu1 }
 0xb24   : > { %2995 = vst [vmem:[%s5459_s21 + $0x18] sm:$0xff] %v2987_v50  ;;  %v2938_v49 = vadd.f32 %v2937_v17, %v2868_v36  ;;  %v2939_v44 = vpop.f32.mrb[46].mxu1 }
 0xb25   : > { %v2980_v18 = vmul.f32 %v2969_v60, %v2936_v7  ;;  %v2940_v59 = vadd.f32 %v2939_v44, %v2873_v63  ;;  %v2941_v3 = vpop.f32.mrb[47].mxu1 }
 0xb26   : > { %v2981_v37 = vmul.f32 %v2969_v60, %v2938_v49  ;;  %v2942_v53 = vadd.f32 %v2941_v3, %v2873_v63 }
 0xb27   : > { %v2988_v62 = vadd.f32 %v2980_v18, %v958_v22  ;;  %v2982_v5 = vmul.f32 %v2974_v16, %v2940_v59 }
 0xb28   : > { %v2989_v35 = vadd.f32 %v2981_v37, %v959_v27  ;;  %v2983_v54 = vmul.f32 %v2974_v16, %v2942_v53 }
 0xb29   : > { %2996 = vst [vmem:[%s5459_s21 + $0x20] sm:$0xff] %v2988_v62  ;;  %v2990_v21 = vadd.f32 %v2982_v5, %v960_v14 }
 0xb2a   : > { %2997 = vst [vmem:[%s5459_s21 + $0x28] sm:$0xff] %v2989_v35  ;;  %v2991_v36 = vadd.f32 %v2983_v54, %v961_v47 }
 0xb2b   : > { %2998 = vst [vmem:[%s5459_s21 + $0x30] sm:$0xff] %v2990_v21 }
 0xb2c   : > { %2999 = vst [vmem:[%s5459_s21 + $0x38] sm:$0xff] %v2991_v36 }
 0xb2d PF: > { %s15_s18 = sadd.s32 1, %s3366_s18  }
 0xb2e   : > { %p12_p4 = scmp.ge.s32.totalorder %s15_s18, 4  }
 0xb30   :  { %14 = sbr.rel (!%p12_p4) target bundleno = 1 (0x1), region = 73 }

</bundles_post_ra>
